<compile_context>
chip_gen: v7x
topology: tpu7x:2x2x1
jax: 0.10.0
libtpu: 0.0.40
codegen_flags: <defaults>
</compile_context>

<pallas_src>
import functools

import jax
import jax.numpy as jnp
from jax.experimental import pallas as pl
from jax.experimental.pallas import tpu as pltpu


def _local_encoder_kernel(s1_ref, s2_ref, mask_ref, w_ref, v_ref,
                          out_ref, s1_prj_ref, acc_ref, *, lp):
    j = pl.program_id(1)

    @pl.when(j == 0)
    def _init():
        # s1 projection is reused by every S step of this N tile: compute once.
        s1_prj_ref[...] = jnp.dot(s1_ref[...], w_ref[:, :lp],
                                  preferred_element_type=jnp.float32)
        acc_ref[...] = jnp.zeros_like(acc_ref)

    s2 = s2_ref[...]                                   # (tn, ts, Hp)
    tn, ts, hp = s2.shape

    # A2 * s2 as one large 2-D MXU matmul.  ts % 8 == 0 and Hp/Lp % 128 == 0,
    # so the leading-dim collapse / re-expand are layout-preserving views.
    s2_prj = jnp.dot(s2.reshape(tn * ts, hp), w_ref[:, lp:],
                     preferred_element_type=jnp.float32).reshape(tn, ts, lp)

    x = s1_prj_ref[...][:, None, :] + s2_prj           # (tn, ts, Lp) f32
    # sigmoid(x) == 0.5*tanh(0.5*x) + 0.5 : one EUP push per vreg instead of
    # exp + reciprocal.  Padded Lp lanes give 0.5 but multiply v == 0 below,
    # so they contribute nothing to alphas.
    state = 0.5 * jnp.tanh(0.5 * x) + 0.5

    # alphas = state . v via VPU multiply + lane reduction (no width-1 matmul).
    alphas = jnp.sum(state * v_ref[...], axis=-1, keepdims=True)     # (tn, ts, 1)

    # Lane-dense 2-D mask tile; only here is it broadcast to rank 3, and the
    # mask is folded into alphas *before* touching the big (tn, ts, Hp) tensor.
    masked_alphas = alphas * mask_ref[...][:, :, None]                # (tn, ts, 1)

    acc_ref[...] += jnp.sum(masked_alphas * s2.astype(jnp.float32), axis=1)

    @pl.when(j == pl.num_programs(1) - 1)
    def _finalize():
        out_ref[...] = acc_ref[...].astype(out_ref.dtype)


def _round_up(x, m):
    return ((x + m - 1) // m) * m


def _pad_to(x, shape):
    pads = [(0, t - d) for d, t in zip(x.shape, shape)]
    if not any(hi for _, hi in pads):
        return x
    return jnp.pad(x, pads)


def _default_vmem_limit_bytes():
    """Generation-aware scoped-VMEM request: ~3/4 of physical, capped at 96 MiB.
    128 MiB chips (v5e/v6e) -> 96 MiB; 64 MiB-per-core chips (v7x) -> 48 MiB."""
    phys = 64 * 1024 * 1024          # conservative fallback (v7x per-core VMEM)
    try:
        phys = int(getattr(pltpu.get_tpu_info(), "vmem_capacity_bytes", phys))
    except Exception:
        pass
    return min((phys * 3) // 4, 96 * 1024 * 1024)


def _derive_tiles(n, s, hp, lp, stream_itemsize, budget_bytes):
    """Pick (tile_n, tile_s) so the double-buffered s2 stream PLUS the in-body
    f32 intermediates (s2_prj, state, masked product) fit inside budget_bytes."""
    per_ns = (2 * hp * stream_itemsize    # s2 tile, double buffered
              + 2 * 4                     # mask tile (f32), double buffered
              + 2 * lp * 4                # s2_prj + state f32 intermediates
              + hp * 4)                   # f32 product / s2 upcast temp
    max_ns = max(budget_bytes // per_ns, 64)

    n8 = _round_up(n, 8)
    s8 = _round_up(s, 8)
    if 8 * s8 <= max_ns:
        tile_s = s8                       # whole (padded) sequence in one step
    else:
        # Tiled S: lane-dense 2-D mask tiles require tile_s % 128 == 0.
        tile_s = max(128, ((max_ns // 8) // 128) * 128)
        tile_s = min(tile_s, _round_up(s, 128))
    tile_n = max(8, min(n8, ((max_ns // tile_s) // 8) * 8))
    return tile_n, tile_s


def local_encoder_layer(s1, s2, mask, a1_weight, a2_weight, v, *,
                        tile_n=None, tile_s=None, compute_dtype=None,
                        vmem_limit_bytes=None, n_axis_semantics="parallel"):
    """
    s1:        (N, H)
    s2:        (N, S, H)
    mask:      (N, S)
    a1_weight: (L, H)      torch nn.Linear weight layout
    a2_weight: (L, H)
    v:         (L,)
    compute_dtype: dtype for the streamed s1/s2/weight operands (e.g.
        jnp.bfloat16 on v6e/v7x); accumulation always stays f32.
    returns:   (N, H)
    """
    n, seq, h = s2.shape
    l = a1_weight.shape[0]
    hp = _round_up(h, 128)            # lane-dense hidden axis (dense stores/DMA)
    lp = _round_up(l, 128)            # lane-dense latent axis

    compute_dtype = jnp.dtype(s2.dtype if compute_dtype is None else compute_dtype)
    out_dtype = s1.dtype

    if vmem_limit_bytes is None:
        vmem_limit_bytes = _default_vmem_limit_bytes()
    vmem_limit_bytes = int(vmem_limit_bytes)

    # ~55% of the scoped limit goes to the streamed tiles + in-body f32
    # intermediates; the rest covers resident weights, s1/out blocks, scratch
    # and compiler-internal VMEM.
    fixed = 2 * hp * 2 * lp * compute_dtype.itemsize + 2 * lp * 4
    budget = max(int(vmem_limit_bytes * 0.55) - fixed, 1 << 20)

    auto_n, auto_s = _derive_tiles(n, seq, hp, lp, compute_dtype.itemsize, budget)
    if tile_n is None:
        tile_n = auto_n
    if tile_s is None:
        tile_s = auto_s

    tile_n = _round_up(int(tile_n), 8)
    tile_s = int(tile_s)
    if tile_s % 128 != 0:
        # A non-multiple-of-128 S tile is only legal if it covers the whole
        # (padded) sequence (mask BlockSpec last-dim constraint).
        tile_s = _round_up(tile_s, 8)
        if tile_s < _round_up(seq, 8):
            raise ValueError("tile_s must be a multiple of 128 or >= the padded "
                             f"sequence length (got tile_s={tile_s}, S={seq})")

    n_pad = _round_up(n, tile_n)
    s_pad = _round_up(seq, tile_s)

    # Host-side prep: zero-pad N/S/H/L (padded S/N rows carry mask == 0 so they
    # contribute nothing), lane-dense H and L, fused [A1^T | A2^T] weight and
    # optional bf16 streams.
    s1_p = _pad_to(s1, (n_pad, hp)).astype(compute_dtype)
    s2_p = _pad_to(s2, (n_pad, s_pad, hp)).astype(compute_dtype)
    mask_p = _pad_to(mask.astype(jnp.float32), (n_pad, s_pad))
    w1t = _pad_to(jnp.transpose(a1_weight), (hp, lp))
    w2t = _pad_to(jnp.transpose(a2_weight), (hp, lp))
    w = jnp.concatenate([w1t, w2t], axis=1).astype(compute_dtype)   # (Hp, 2*Lp)
    v_p = _pad_to(v.reshape(1, l).astype(jnp.float32), (1, lp))

    grid = (n_pad // tile_n, s_pad // tile_s)

    grid_spec = pltpu.PrefetchScalarGridSpec(
        num_scalar_prefetch=0,
        grid=grid,
        in_specs=[
            pl.BlockSpec((tile_n, hp), lambda i, j: (i, 0)),             # s1
            pl.BlockSpec((tile_n, tile_s, hp), lambda i, j: (i, j, 0)),  # s2
            pl.BlockSpec((tile_n, tile_s), lambda i, j: (i, j)),         # mask (2-D, lane-dense)
            pl.BlockSpec((hp, 2 * lp), lambda i, j: (0, 0)),             # [W1^T | W2^T] resident
            pl.BlockSpec((1, lp), lambda i, j: (0, 0)),                  # v resident
        ],
        out_specs=pl.BlockSpec((tile_n, hp), lambda i, j: (i, 0)),
        scratch_shapes=[
            pltpu.VMEM((tile_n, lp), jnp.float32),   # cached s1 projection
            pltpu.VMEM((tile_n, hp), jnp.float32),   # f32 output accumulator
        ],
    )

    out = pl.pallas_call(
        functools.partial(_local_encoder_kernel, lp=lp),
        out_shape=jax.ShapeDtypeStruct((n_pad, hp), out_dtype),
        grid_spec=grid_spec,
        compiler_params=pltpu.CompilerParams(
            # TODO(synk): on v7x, pass n_axis_semantics=pltpu.CORE_PARALLEL (with
            # an even N grid) to shard the N axis across the two TensorCores.
            dimension_semantics=(n_axis_semantics, "arbitrary"),
            vmem_limit_bytes=vmem_limit_bytes,
        ),
    )(s1_p, s2_p, mask_p, w, v_p)

    return out[:n, :h]


def _reference(s1, s2, mask, a1_weight, a2_weight, v):
    s1_prj = s1 @ a1_weight.T                          # (N, L)
    s2_prj = jnp.einsum("nsh,lh->nsl", s2, a2_weight)  # (N, S, L)
    state = jax.nn.sigmoid(s1_prj[:, None, :] + s2_prj)
    alphas = jnp.einsum("nsl,l->ns", state, v)
    weighted = alphas[:, :, None] * s2
    weighted = mask[:, :, None].astype(weighted.dtype) * weighted
    return jnp.sum(weighted, axis=1)


if __name__ == "__main__":
    # Deliberately awkward sizes (not multiples of 8 / 128) so the host-side
    # padding paths (lane-dense H/L, masked S/N padding) are exercised.
    N, S, H, L = 12, 200, 48, 20   # batch, seq, hidden_size, latent_size

    key = jax.random.PRNGKey(0)
    k_s1, k_s2, k_mask, k_w1, k_w2, k_v = jax.random.split(key, 6)

    s1 = jax.random.normal(k_s1, (N, H), dtype=jnp.float32)
    s2 = jax.random.normal(k_s2, (N, S, H), dtype=jnp.float32)
    mask = (jax.random.uniform(k_mask, (N, S)) > 0.3).astype(jnp.float32)

    # Shapes match nn.Linear(H, L, bias=False) and nn.Parameter(torch.Tensor(L))
    # with uniform(-1, 1) init for v.
    bound = 1.0 / jnp.sqrt(H)
    a1_weight = jax.random.uniform(k_w1, (L, H), minval=-bound, maxval=bound,
                                   dtype=jnp.float32)
    a2_weight = jax.random.uniform(k_w2, (L, H), minval=-bound, maxval=bound,
                                   dtype=jnp.float32)
    v = jax.random.uniform(k_v, (L,), minval=-1.0, maxval=1.0, dtype=jnp.float32)

    ref = _reference(s1, s2, mask, a1_weight, a2_weight, v)

    # (1) f32 streams with explicit tiles: 2 N-tiles ("parallel") x 2 S-steps
    #     accumulated in the resident f32 scratch (also exercises S/N padding).
    out = local_encoder_layer(s1, s2, mask, a1_weight, a2_weight, v,
                              tile_n=8, tile_s=128)
    out = jax.block_until_ready(out)
    assert out.shape == (N, H)
    assert jnp.allclose(out, ref, atol=5e-3, rtol=1e-3), \
        float(jnp.max(jnp.abs(out - ref)))

    # (2) Auto (chip-budgeted) tiles with bf16 MXU/stream inputs, f32 accumulate.
    out_bf16 = local_encoder_layer(s1, s2, mask, a1_weight, a2_weight, v,
                                   compute_dtype=jnp.bfloat16)
    out_bf16 = jax.block_until_ready(out_bf16)
    rel_err = float(jnp.max(jnp.abs(out_bf16 - ref)) /
                    (jnp.max(jnp.abs(ref)) + 1e-6))
    assert rel_err < 3e-2, rel_err

    print("KERNEL_OK")
</pallas_src>

<mosaic_0001>
module attributes {stable_mosaic.version = 11 : i64} {
  func.func @_local_encoder_kernel(%arg0: i32, %arg1: i32, %arg2: memref<8x128xf32, #tpu.memory_space<vmem>>, %arg3: memref<8x128x128xf32, #tpu.memory_space<vmem>>, %arg4: memref<8x128xf32, #tpu.memory_space<vmem>>, %arg5: memref<128x256xf32, #tpu.memory_space<vmem>>, %arg6: memref<1x128xf32, #tpu.memory_space<vmem>>, %arg7: memref<8x128xf32, #tpu.memory_space<vmem>>, %arg8: memref<8x128xf32, #tpu.memory_space<vmem>>, %arg9: memref<8x128xf32, #tpu.memory_space<vmem>>) attributes {dimension_semantics = [#tpu.dimension_semantics<parallel>, #tpu.dimension_semantics<arbitrary>], iteration_bounds = array<i64: 2, 2>, scalar_prefetch = 0 : i64, scratch_operands = 2 : i64, tpu.core_type = #tpu.core_type<tc>, window_params = [{transform_indices = @transform_0, window_bounds = array<i64: 8, 128>}, {transform_indices = @transform_1, window_bounds = array<i64: 8, 128, 128>}, {transform_indices = @transform_2, window_bounds = array<i64: 8, 128>}, {pipeline_mode = #tpu.pipeline_mode<synchronous>, transform_indices = @transform_3, window_bounds = array<i64: 128, 256>}, {pipeline_mode = #tpu.pipeline_mode<synchronous>, transform_indices = @transform_4, window_bounds = array<i64: 1, 128>}, {transform_indices = @transform_5, window_bounds = array<i64: 8, 128>}]} {
    %c0_i32 = arith.constant 0 : i32
    %0 = arith.cmpi eq, %arg1, %c0_i32 : i32
    %1 = arith.extui %0 : i1 to i32
    %c0_i32_0 = arith.constant 0 : i32
    %2 = arith.cmpi ne, %1, %c0_i32_0 : i32
    scf.if %2 {
      %c0_20 = arith.constant 0 : index
      %c0_21 = arith.constant 0 : index
      %37 = vector.load %arg2[%c0_20, %c0_21] : memref<8x128xf32, #tpu.memory_space<vmem>>, vector<8x128xf32>
      %c0_22 = arith.constant 0 : index
      %c0_23 = arith.constant 0 : index
      %38 = vector.load %arg5[%c0_22, %c0_23] : memref<128x256xf32, #tpu.memory_space<vmem>>, vector<128x128xf32>
      %cst_24 = arith.constant dense<0.000000e+00> : vector<8x128xf32>
      %39 = tpu.matmul %37, %38, %cst_24 {dimension_numbers = #tpu.dot_dimension_numbers<[1], [0], [0], [1], [0, 0, 1, 1], [], []>} : vector<8x128xf32>, vector<128x128xf32>, vector<8x128xf32> -> vector<8x128xf32>
      %c0_25 = arith.constant 0 : index
      %c0_26 = arith.constant 0 : index
      %40 = vector.load %arg8[%c0_25, %c0_26] : memref<8x128xf32, #tpu.memory_space<vmem>>, vector<8x128xf32>
      tpu.vector_store %arg8[%c0_25, %c0_26], %39 {strides = array<i32>} : memref<8x128xf32, #tpu.memory_space<vmem>>, vector<8x128xf32>,
      %cst_27 = arith.constant 0.000000e+00 : f32
      %41 = vector.broadcast %cst_27 : f32 to vector<8x128xf32>
      %c0_28 = arith.constant 0 : index
      %c0_29 = arith.constant 0 : index
      %42 = vector.load %arg9[%c0_28, %c0_29] : memref<8x128xf32, #tpu.memory_space<vmem>>, vector<8x128xf32>
      tpu.vector_store %arg9[%c0_28, %c0_29], %41 {strides = array<i32>} : memref<8x128xf32, #tpu.memory_space<vmem>>, vector<8x128xf32>,
    } else {
    }
    %c0 = arith.constant 0 : index
    %c0_1 = arith.constant 0 : index
    %c0_2 = arith.constant 0 : index
    %3 = vector.load %arg3[%c0, %c0_1, %c0_2] : memref<8x128x128xf32, #tpu.memory_space<vmem>>, vector<8x128x128xf32>
    %4 = vector.shape_cast %3 : vector<8x128x128xf32> to vector<1024x128xf32>
    %c0_3 = arith.constant 0 : index
    %c128 = arith.constant 128 : index
    %5 = vector.load %arg5[%c0_3, %c128] : memref<128x256xf32, #tpu.memory_space<vmem>>, vector<128x128xf32>
    %cst = arith.constant dense<0.000000e+00> : vector<1024x128xf32>
    %6 = tpu.matmul %4, %5, %cst {dimension_numbers = #tpu.dot_dimension_numbers<[1], [0], [0], [1], [0, 0, 1, 1], [], []>} : vector<1024x128xf32>, vector<128x128xf32>, vector<1024x128xf32> -> vector<1024x128xf32>
    %7 = vector.shape_cast %6 : vector<1024x128xf32> to vector<8x128x128xf32>
    %c0_4 = arith.constant 0 : index
    %c0_5 = arith.constant 0 : index
    %8 = vector.load %arg8[%c0_4, %c0_5] : memref<8x128xf32, #tpu.memory_space<vmem>>, vector<8x128xf32>
    %9 = vector.shape_cast %8 : vector<8x128xf32> to vector<8x1x128xf32>
    %10 = vector.broadcast %9 : vector<8x1x128xf32> to vector<8x128x128xf32>
    %11 = arith.addf %10, %7 : vector<8x128x128xf32>
    %cst_6 = arith.constant 5.000000e-01 : f32
    %12 = vector.broadcast %cst_6 : f32 to vector<8x128x128xf32>
    %13 = arith.mulf %12, %11 : vector<8x128x128xf32>
    %14 = math.tanh %13 : vector<8x128x128xf32>
    %cst_7 = arith.constant 5.000000e-01 : f32
    %15 = vector.broadcast %cst_7 : f32 to vector<8x128x128xf32>
    %16 = arith.mulf %15, %14 : vector<8x128x128xf32>
    %cst_8 = arith.constant 5.000000e-01 : f32
    %17 = vector.broadcast %cst_8 : f32 to vector<8x128x128xf32>
    %18 = arith.addf %16, %17 : vector<8x128x128xf32>
    %c0_9 = arith.constant 0 : index
    %c0_10 = arith.constant 0 : index
    %19 = vector.load %arg6[%c0_9, %c0_10] : memref<1x128xf32, #tpu.memory_space<vmem>>, vector<1x128xf32>
    %20 = vector.shape_cast %19 : vector<1x128xf32> to vector<1x1x128xf32>
    %21 = vector.broadcast %20 : vector<1x1x128xf32> to vector<8x128x128xf32>
    %22 = arith.mulf %18, %21 : vector<8x128x128xf32>
    %cst_11 = arith.constant dense<0.000000e+00> : vector<8x128xf32>
    %23 = vector.multi_reduction <add>, %22, %cst_11 [2] : vector<8x128x128xf32> to vector<8x128xf32>
    %24 = vector.shape_cast %23 : vector<8x128xf32> to vector<8x128x1xf32>
    %c0_12 = arith.constant 0 : index
    %c0_13 = arith.constant 0 : index
    %25 = vector.load %arg4[%c0_12, %c0_13] : memref<8x128xf32, #tpu.memory_space<vmem>>, vector<8x128xf32>
    %26 = vector.shape_cast %25 : vector<8x128xf32> to vector<8x128x1xf32>
    %27 = arith.mulf %24, %26 : vector<8x128x1xf32>
    %c0_14 = arith.constant 0 : index
    %c0_15 = arith.constant 0 : index
    %28 = vector.load %arg9[%c0_14, %c0_15] : memref<8x128xf32, #tpu.memory_space<vmem>>, vector<8x128xf32>
    %29 = vector.broadcast %27 : vector<8x128x1xf32> to vector<8x128x128xf32>
    %30 = arith.mulf %29, %3 : vector<8x128x128xf32>
    %cst_16 = arith.constant dense<0.000000e+00> : vector<8x128xf32>
    %31 = vector.multi_reduction <add>, %30, %cst_16 [1] : vector<8x128x128xf32> to vector<8x128xf32>
    %32 = arith.addf %28, %31 : vector<8x128xf32>
    %c0_17 = arith.constant 0 : index
    %c0_18 = arith.constant 0 : index
    %33 = vector.load %arg9[%c0_17, %c0_18] : memref<8x128xf32, #tpu.memory_space<vmem>>, vector<8x128xf32>
    tpu.vector_store %arg9[%c0_17, %c0_18], %32 {strides = array<i32>} : memref<8x128xf32, #tpu.memory_space<vmem>>, vector<8x128xf32>,
    %c1_i32 = arith.constant 1 : i32
    %34 = arith.cmpi eq, %arg1, %c1_i32 : i32
    %35 = arith.extui %34 : i1 to i32
    %c0_i32_19 = arith.constant 0 : i32
    %36 = arith.cmpi ne, %35, %c0_i32_19 : i32
    scf.if %36 {
      %c0_20 = arith.constant 0 : index
      %c0_21 = arith.constant 0 : index
      %37 = vector.load %arg9[%c0_20, %c0_21] : memref<8x128xf32, #tpu.memory_space<vmem>>, vector<8x128xf32>
      %c0_22 = arith.constant 0 : index
      %c0_23 = arith.constant 0 : index
      %38 = vector.load %arg7[%c0_22, %c0_23] : memref<8x128xf32, #tpu.memory_space<vmem>>, vector<8x128xf32>
      tpu.vector_store %arg7[%c0_22, %c0_23], %37 {strides = array<i32>} : memref<8x128xf32, #tpu.memory_space<vmem>>, vector<8x128xf32>,
    } else {
    }
    return
  }
  func.func @transform_0(%arg0: i32, %arg1: i32) -> (i32, i32) {
    %c0_i32 = arith.constant 0 : i32
    %c0_i32_0 = arith.constant 0 : i32
    return %arg0, %c0_i32 : i32, i32
  }
  func.func @transform_1(%arg0: i32, %arg1: i32) -> (i32, i32, i32) {
    %c0_i32 = arith.constant 0 : i32
    %c0_i32_0 = arith.constant 0 : i32
    return %arg0, %arg1, %c0_i32 : i32, i32, i32
  }
  func.func @transform_2(%arg0: i32, %arg1: i32) -> (i32, i32) {
    %c0_i32 = arith.constant 0 : i32
    return %arg0, %arg1 : i32, i32
  }
  func.func @transform_3(%arg0: i32, %arg1: i32) -> (i32, i32) {
    %c0_i32 = arith.constant 0 : i32
    %c0_i32_0 = arith.constant 0 : i32
    %c0_i32_1 = arith.constant 0 : i32
    return %c0_i32, %c0_i32_0 : i32, i32
  }
  func.func @transform_4(%arg0: i32, %arg1: i32) -> (i32, i32) {
    %c0_i32 = arith.constant 0 : i32
    %c0_i32_0 = arith.constant 0 : i32
    %c0_i32_1 = arith.constant 0 : i32
    return %c0_i32, %c0_i32_0 : i32, i32
  }
  func.func @transform_5(%arg0: i32, %arg1: i32) -> (i32, i32) {
    %c0_i32 = arith.constant 0 : i32
    %c0_i32_0 = arith.constant 0 : i32
    return %arg0, %c0_i32 : i32, i32
  }
}

</mosaic_0001>

<bundles_post_ra>
// kernel: tpu_custom_call.1
= control target key start
LH: loop header
LB: loop body
LE: loop exit
PB: predicated region body
PF: predicated region fallthrough
CT: control target
= control target key end

     0   :  { %s6924_s0 = inlined_call_operand.hbm [shape: f32[16,128], index: 0, kind: input, shape index: {}]   ;;  %s6925_s1 = inlined_call_operand.hbm [shape: f32[16,256,128], index: 1, kind: input, shape index: {}]   ;;  %s6926_s2 = inlined_call_operand.hbm [shape: f32[16,256], index: 2, kind: input, shape index: {}]   ;;  %s6927_s3 = inlined_call_operand.hbm [shape: f32[128,256], index: 3, kind: input, shape index: {}]   ;;  %s6928_s4 = inlined_call_operand.hbm [shape: f32[1,128], index: 4, kind: input, shape index: {}]   ;;  %s6929_s5 = inlined_call_operand.hbm [shape: f32[16,128], index: 5, kind: output, shape index: {}]  }
   0x1   :  { %6953 = sst [smem:[#allocation115_spill]] %s6924_s0 }
   0x2   :  { %6954 = sst [smem:[#allocation116_spill]] %s6927_s3 }
   0x3   :  { %6955 = sst [smem:[#allocation117_spill]] %s6929_s5 }
   0x4   :  { %10 = vsyncpa [#allocation5], 0 }
   0x5   :  { %12 = vsyncpa [#allocation5 + $0x1], 0 }
   0x6   :  { %13 = vsyncpa [#allocation8], 0 }
   0x7   :  { %15 = vsyncpa [#allocation8 + $0x1], 0 }
   0x8   :  { %16 = vsyncpa [#allocation11], 0 }
   0x9   :  { %17 = vsyncpa [#allocation6], 0 }
   0xa   :  { %19 = vsyncpa [#allocation6 + $0x1], 0  ;;  %s4953_s18 = smov 0   ;;  %s4955_s19 = smov 0  }
   0xb   :  { %s4957_s20 = smov 0   ;;  %s4959_s21 = smov 0  }
   0xc   :  { %s4961_s22 = smov 0   ;;  %s4963_s23 = smov 0  }
   0xd   :  { %s4965_s24 = smov 0   ;;  %s4967_s25 = smov 0  }
   0xe   :  { %s4969_s26 = smov 0   ;;  %s4971_s27 = smov 0  }
   0xf   :  { %s4973_s28 = smov 0  }
  0x10 LB: > { %6956 = sst [smem:[#allocation21_spill]] %s4876_s21  ;;  %s5009_s29 = sadd.s32 4294967295, %s4904_s28   ;;  %s4904_s28 = sphi %s4973_s28, %s25_s28   ;;  %s4900_s27 = sphi %s4971_s27, %s7263_s27   ;;  %s4896_s26 = sphi %s4969_s26, %s7262_s26   ;;  %s4892_s25 = sphi %s4967_s25, %s7261_s25   ;;  %s4888_s24 = sphi %s4965_s24, %s7260_s24   ;;  %s4884_s23 = sphi %s4963_s23, %s7259_s23   ;;  %s4880_s22 = sphi %s4961_s22, %s7258_s22   ;;  %s4876_s21 = sphi %s4959_s21, %s7257_s21   ;;  %s4872_s20 = sphi %s4957_s20, %s7256_s20   ;;  %s4868_s19 = sphi %s4955_s19, %s7255_s19   ;;  %s4864_s18 = sphi %s4953_s18, %s7254_s18  }
  0x11   : > { %6957 = sst [smem:[#allocation22_spill]] %s4888_s24  ;;  %s3609_s30 = sadd.s32 4294967294, %s4904_s28  }
  0x12   : > { %6958 = sst [smem:[#allocation23_spill]] %s4892_s25  ;;  %s34_s6 = sadd.s32 1, %s4896_s26 }
  0x13   : > { %s37_s7 = sadd.s32 1, %s4900_s27  ;;  %p35_p0 = scmp.ge.s32.totalorder %s34_s6, 2 }
  0x14   : > { %s44_s8 = sadd.s32 1, %s4884_s23  ;;  %p51_p1 = scmp.ne.s32.totalorder %s4884_s23, %s4880_s22 }
  0x15   : > { %p52_p2 = scmp.eq.s32.totalorder %s4904_s28, 0  ;;  %s7265_s6 = smov (%p35_p0, %s34_s6), 0 }
  0x16   : > { %6959 = sst [smem:[#allocation24_spill]] %s7265_s6  ;;  %s7267_s7 = smov (!%p35_p0, %s37_s7), %s4900_s27 }
  0x17   : > { %p5026_p3 = por %p52_p2, %p51_p1  ;;  %p6931_p4 = scmp.ne.s32.totalorder %s4880_s22, %s4876_s21 }
  0x18   : > { %p39_p5 = scmp.ge.s32.totalorder %s7267_s7, 2  ;;  %p6940_p6 = scmp.eq.s32.totalorder %s5009_s29, 0 }
  0x19   : > { %s6960_s9 = scalar_select %p5026_p3, 1, 0 }
  0x1a   : > { %s68_s10 = ssub.s32 %s4896_s26, %s7265_s6  ;;  %s72_s11 = sadd.s32 1, %s4872_s20 }
  0x1b   : > { %s7269_s7 = smov (%p39_p5, %s7267_s7), 0  ;;  %p5043_p7 = por %p6940_p6, %p6931_p4 }
  0x1c   : > { %6961 = sst [smem:[#allocation25_spill]] %s7269_s7  ;;  %p79_p8 = scmp.ne.s32.totalorder %s4872_s20, %s4868_s19 }
  0x1d   : > { %s6962_s12 = scalar_select %p5043_p7, 1, 0 }
  0x1e   : > { %s41_s13 = ssub.s32 %s4900_s27, %s7269_s7  ;;  %p85_p9 = scmp.ne.s32.totalorder %s4868_s19, %s4864_s18 }
  0x1f   : > { %p42_p10 = scmp.eq.s32.totalorder %s41_s13, 0  ;;  %s69_s14 = sor.u32 %s68_s10, %s41_s13 }
  0x20   : > { %p70_p11 = scmp.eq.s32.totalorder %s69_s14, 0  ;;  %p5055_p12 = por %p79_p8, %p52_p2 }
  0x21   : > { %s5060_s16 = scalar_select %p42_p10, %s4884_s23, %s44_s8  }
  0x22   : > { %s6963_s15 = scalar_select %p5055_p12, 1, 0 }
  0x23   : > { %6964 = sst [smem:[#allocation26_spill]] %s5060_s16  ;;  %p5067_p13 = por %p85_p9, %p6940_p6 }
  0x24   : > { %s5063_s17 = scalar_select %p70_p11, %s4872_s20, %s72_s11  }
  0x25   : > { %s6966_s6 = scalar_select %p5067_p13, 1, 0 }
  0x26   : > { %6965 = sst [smem:[#allocation27_spill]] %s5063_s17  ;;  %p179_p0 = scmp.eq.s32.totalorder %s5009_s29, 3 }
  0x27   : > { %6967 = sst [smem:[#allocation28_spill]] %s6966_s6  ;;  %p185_p5 = scmp.eq.s32.totalorder %s3609_s30, 3 }
  0x28   : > { %p3610_p4 = scmp.ge.s32.totalorder %s4904_s28, 1  ;;  %p5076_p7 = por %p179_p0, %p51_p1 }
  0x29   : > { %p192_p2 = scmp.lt.s32.totalorder %s4904_s28, 5  ;;  %p6970_p8 = scmp.ne.s32.totalorder %s4880_s22, %s4876_s21 }
  0x2a   : > { %s6968_s18 = scalar_select %p5076_p7, 1, 0 }
  0x2b   : > { %p5084_p12 = por %p185_p5, %p6970_p8  ;;  %p5088_p10 = pnand %p3610_p4, %p192_p2 }
  0x2c   : > { %6969 = sst [smem:[#allocation29_spill]] %s6968_s18  ;;  %s4906_s11 = smov [#allocation10]  }
  0x2d   : > { %s6971_s8 = scalar_select %p5084_p12, 1, 0 }
  0x2e   : > { %s6973_s10 = scalar_select %p5088_p10, 1, 0 }
  0x2f   : > { %6972 = sst [smem:[#allocation30_spill]] %s6971_s8  ;;  %s204_s13 = sshll.u32 %s4906_s11, 4  ;;  %s205_s13 = int_to_ptr.vmem [resolvable:$true] %s204_s13 }
  0x30   : > { %p4156_p9 = pneg %p5088_p10  ;;  %s4907_s14 = smov [#allocation12]  }
  0x31   : > { %s218_s7 = sshll.u32 %s4907_s14, 4  ;;  %s6975_s3 = sld [smem:[#allocation116_spill]]  ;;  %s5100_s7 = int_to_ptr.vmem [resolvable:$true] %s218_s7 }
  0x32   : > { %p5096_p1 = pnand %p4156_p9, %p6940_p6 }
  0x34   : > { %p4664_p11 = pneg %p5096_p1 }
  0x37   : > { %s4662_s8 = scalar_lea.hbm %s6975_s3, 4096 }
  0x38   : > { %p4663_p4 = scmp.ne.s32.totalorder %s6975_s3, %s4662_s8  ;;  %p4669_p2 = scmp.lt.u32.totalorder %s4662_s8, %s6975_s3 }
  0x3a   : > { %p4665_p0 = pnand %p4664_p11, %p4663_p4 }
  0x3c   : > { %p4666_p5 = pneg %p4665_p0 }
  0x3e   : > { %p4671_p8 = pnand %p4669_p2, %p4666_p5 }
  0x40   : > { %4674 = shalt.err (!%p4671_p8)
}
  0x41   : > { %s4675_s14 = scalar_lea.vmem %s205_s13, 4096  ;;  %p4683_p7 = scmp.lt.s32.totalorder %s205_s13, %s205_s13 }
  0x42   : > { %p4676_p9 = scmp.ne.s32.totalorder %s205_s13, %s4675_s14  ;;  %p4684_p13 = scmp.lt.s32.totalorder %s4675_s14, %s4675_s14 }
  0x44   : > { %p4678_p6 = pnand %p4676_p9, %p4664_p11  ;;  %p4685_p10 = por %p4684_p13, %p4683_p7 }
  0x46   : > { %p4679_p12 = pneg %p4678_p6 }
  0x48   : > { %p4686_p3 = pnand %p4685_p10, %p4679_p12 }
  0x4a   : > { %4689 = shalt.err (!%p4686_p3)
}
  0x4b   : > { %s4908_s21 = smov 256   ;;  %s4909_s16 = smov 16  }
  0x4c   : > { %4159 = dma.hbm_to_vmem [thread:$0]  (!%p5096_p1), %s6975_s3, 4096, %s205_s13, [#allocation11], %s4908_s21, %s4908_s21, %s4909_s16  }
  0x4d   : > { %s4690_s11 = scalar_lea.hbm %s6928_s4, 16 }
  0x4e   : > { %p4691_p6 = scmp.ne.s32.totalorder %s6928_s4, %s4690_s11  ;;  %p4697_p12 = scmp.lt.u32.totalorder %s4690_s11, %s6928_s4 }
  0x50   : > { %p4693_p3 = pnand %p4691_p6, %p4664_p11 }
  0x52   : > { %p4694_p7 = pneg %p4693_p3 }
  0x54   : > { %p4699_p13 = pnand %p4697_p12, %p4694_p7 }
  0x56   : > { %4702 = shalt.err (!%p4699_p13)
}
  0x57   : > { %s4703_s13 = scalar_lea.vmem %s5100_s7, 16  ;;  %s4710_s24 = scalar_lea.vmem %s5100_s7, 32 }
  0x58   : > { %p4704_p10 = scmp.ne.s32.totalorder %s5100_s7, %s4703_s13  ;;  %p4711_p5 = scmp.lt.s32.totalorder %s5100_s7, %s5100_s7 }
  0x59   : > { %p4712_p2 = scmp.lt.s32.totalorder %s4710_s24, %s4703_s13 }
  0x5a   : > { %p4706_p4 = pnand %p4704_p10, %p4664_p11 }
  0x5b   : > { %p4713_p8 = por %p4712_p2, %p4711_p5 }
  0x5c   : > { %p4707_p0 = pneg %p4706_p4 }
  0x5e   : > { %p4714_p9 = pnand %p4713_p8, %p4707_p0 }
  0x60   : > { %4717 = shalt.err (!%p4714_p9)
}
  0x61   : > { %4162 = dma.hbm_to_vmem [thread:$0]  (!%p5096_p1), %s6928_s4, 16, %s5100_s7, [#allocation11]  }
  0x62   : > { %p3613_p6 = scmp.ge.s32.totalorder %s4904_s28, 4 }
  0x63   : > { %s229_s21 = sand.u32 (!%p3613_p6), 1, %s4884_s23   ;;  %s3615_s16 = sshll.u32 (!%p3613_p6), %s4900_s27, 7 }
  0x64   : > { %225 = sbr.rel (%p3613_p6) target bundleno = 170 (0xaa), region = 24  ;;  %s3614_s5 = sshll.u32 (!%p3613_p6), %s229_s21, 3 }
  0x65   : > { %s6976_s0 = sld [smem:[#allocation115_spill]] (!%p3613_p6)  ;;  %s233_s30 = scalar_lea.vmem (!%p3613_p6), [#allocation4], %s3614_s5 }
  0x66   : > { %s240_s7 = sshll.u32 (!%p3613_p6), %s233_s30, 4  ;;  %s230_s11 = scalar_lea.sflag (!%p3613_p6), [#allocation5], %s229_s21  ;;  %s241_s7 = int_to_ptr.vmem [resolvable:$true] %s240_s7 }
  0x67   : > { %p6977_p11 = scmp.ne.s32.totalorder (!%p3613_p6), %s6960_s9, 0 }
  0x6b   : > { %s5156_s8 = scalar_lea.hbm %s6976_s0, %s3615_s16  ;;  %s4722_s25 = scalar_lea.hbm %s6976_s0, 256 }
  0x6c   : > { %s4718_s14 = scalar_lea.hbm %s5156_s8, 128  ;;  %p4723_p12 = scmp.lt.u32.totalorder %s5156_s8, %s6976_s0 }
  0x6d   : > { %p4719_p1 = scmp.ne.s32.totalorder %s5156_s8, %s4718_s14  ;;  %p4724_p13 = scmp.lt.u32.totalorder %s4722_s25, %s4718_s14 }
  0x6e   : > { %p4726_p4 = scmp.lt.u32.totalorder %s4718_s14, %s5156_s8 }
  0x6f   : > { %p4720_p3 = pnand %p4719_p1, %p6977_p11  ;;  %p4725_p10 = por %p4724_p13, %p4723_p12 }
  0x71   : > { %p4721_p7 = pneg %p4720_p3  ;;  %p4727_p0 = por %p4726_p4, %p4725_p10 }
  0x73   : > { %p4728_p5 = pnand %p4727_p0, %p4721_p7 }
  0x75   : > { %4731 = shalt.err (!%p4728_p5)
}
  0x76   : > { %s4732_s21 = scalar_lea.vmem %s241_s7, 128  ;;  %s4910_s5 = smov [#allocation4]  }
  0x77   : > { %p4733_p2 = scmp.ne.s32.totalorder %s241_s7, %s4732_s21  ;;  %s4736_s17 = sshll.u32 %s4910_s5, 4  ;;  %s4737_s17 = int_to_ptr.vmem [resolvable:$false] %s4736_s17 }
  0x78   : > { %s4738_s18 = scalar_lea.vmem %s4737_s17, 256  ;;  %p4739_p6 = scmp.lt.s32.totalorder %s241_s7, %s4737_s17 }
  0x79   : > { %p4734_p8 = pnand %p4733_p2, %p6977_p11  ;;  %p4740_p1 = scmp.lt.s32.totalorder %s4738_s18, %s4732_s21 }
  0x7b   : > { %p4735_p9 = pneg %p4734_p8  ;;  %p4741_p3 = por %p4740_p1, %p4739_p6 }
  0x7d   : > { %p4742_p12 = pnand %p4741_p3, %p4735_p9 }
  0x7f   : > { %4745 = shalt.err (!%p4742_p12)
}
  0x80   : > { %4137 = dma.hbm_to_vmem [thread:$0]  (%p6977_p11), %s5156_s8, 128, %s241_s7, %s230_s11  }
  0x81   : > { %s249_s30 = sand.u32 1, %s4872_s20   ;;  %s3618_s13 = sshll.u32 %s4896_s26, 4 }
  0x82   : > { %s3616_s14 = sshll.u32 %s249_s30, 10  ;;  %s3640_s24 = sshll.u32 %s4900_s27, 8 }
  0x83   : > { %s247_s25 = sand.u32 1, %s4904_s28   ;;  %s258_s9 = sadd.s32 %s3640_s24, %s3618_s13 }
  0x84   : > { %s251_s6 = scalar_lea.vmem [#allocation7], %s3616_s14  ;;  %s3620_s7 = sshll.u32 %s258_s9, 7 }
  0x85   : > { %s273_s8 = sshll.u32 %s251_s6, 4  ;;  %s4911_s11 = smov 4096   ;;  %s274_s8 = int_to_ptr.vmem [resolvable:$true] %s273_s8 }
  0x86   : > { %p6978_p11 = scmp.ne.s32.totalorder %s6963_s15, 0  ;;  %s4912_s5 = smov 2048  }
  0x87   : > { %s4913_s17 = smov 16   ;;  %s4914_s18 = smov 128  }
  0x88   : > { %4139 = sst [smem:[#allocation15]] (%p6978_p11), %s4911_s11  ;;  %s4915_s14 = smov 8  }
  0x89   : > { %s4138_s16 = scalar_select %p6978_p11, [#allocation0], [#allocation16] }
  0x8a   : > { %4140 = sst [smem:[#allocation15 + $0x1]] (%p6978_p11), %s4912_s5  ;;  %s260_s9 = scalar_lea.hbm %s6925_s1, %s3620_s7 }
  0x8b   : > { %s265_s21 = sld [smem:[%s4138_s16]]   ;;  %s5198_s16 = scalar_lea.sflag [#allocation8], %s247_s25 }
  0x8c   : > { %4141 = sst [smem:[#allocation15 + $0x2]] (%p6978_p11), %s4913_s17  ;;  %s4916_s5 = smov [#allocation14]  }
  0x8d   : > { %4142 = sst [smem:[#allocation15 + $0x3]] (%p6978_p11), %s4914_s18  ;;  %s3623_s17 = sshll.u32 %s249_s30, 3 }
  0x8e   : > { %4143 = sst [smem:[#allocation15 + $0x4]] (%p6978_p11), %s4914_s18  ;;  %s3624_s18 = sshll.u32 %s4900_s27, 1 }
  0x8f   : > { %4144 = sst [smem:[#allocation15 + $0x5]] (%p6978_p11), %s4915_s14  ;;  %s305_s14 = sadd.s32 %s4896_s26, %s3624_s18 }
  0x90   : > { %s3625_s0 = sshll.u32 %s305_s14, 7  ;;  %s300_s3 = scalar_lea.vmem [#allocation9], %s3623_s17 }
  0x91   : > { %s3621_s6 = sshll.u32 %s265_s21, 26  ;;  %s309_s13 = sshll.u32 %s300_s3, 4  ;;  %s310_s13 = int_to_ptr.vmem [resolvable:$true] %s309_s13 }
  0x92   : > { %s3622_s11 = sadd.s32 134217728, %s3621_s6  ;;  %s307_s25 = scalar_lea.hbm %s6926_s2, %s3625_s0 }
  0x93   : > { %4145 = dma.general (%p6978_p11), %s260_s9, 16384, %s274_s8, %s5198_s16, %s4916_s5, [#allocation15], %s3622_s11, 0  }
  0x94   : > { %s4746_s24 = scalar_lea.hbm %s307_s25, 128  ;;  %s4750_s6 = scalar_lea.hbm %s6926_s2, 512 }
  0x95   : > { %p4747_p7 = scmp.ne.s32.totalorder %s307_s25, %s4746_s24  ;;  %p4751_p4 = scmp.lt.u32.totalorder %s307_s25, %s6926_s2 }
  0x96   : > { %p4752_p0 = scmp.lt.u32.totalorder %s4750_s6, %s4746_s24  ;;  %p4754_p2 = scmp.lt.u32.totalorder %s4746_s24, %s307_s25 }
  0x97   : > { %p4748_p13 = pnand %p4747_p7, %p6978_p11 }
  0x98   : > { %p4753_p5 = por %p4752_p0, %p4751_p4 }
  0x99   : > { %p4749_p10 = pneg %p4748_p13 }
  0x9a   : > { %p4755_p8 = por %p4754_p2, %p4753_p5 }
  0x9c   : > { %p4756_p9 = pnand %p4755_p8, %p4749_p10 }
  0x9e   : > { %4759 = shalt.err (!%p4756_p9)
}
  0x9f   : > { %s4760_s0 = scalar_lea.vmem %s310_s13, 128  ;;  %s4917_s3 = smov [#allocation9]  }
  0xa0   : > { %p4761_p6 = scmp.ne.s32.totalorder %s310_s13, %s4760_s0  ;;  %s4764_s5 = sshll.u32 %s4917_s3, 4  ;;  %s4765_s5 = int_to_ptr.vmem [resolvable:$false] %s4764_s5 }
  0xa1   : > { %s4766_s17 = scalar_lea.vmem %s4765_s5, 256  ;;  %p4767_p12 = scmp.lt.s32.totalorder %s310_s13, %s4765_s5 }
  0xa2   : > { %p4762_p1 = pnand %p4761_p6, %p6978_p11  ;;  %p4768_p7 = scmp.lt.s32.totalorder %s4766_s17, %s4760_s0 }
  0xa4   : > { %p4763_p3 = pneg %p4762_p1  ;;  %p4769_p13 = por %p4768_p7, %p4767_p12 }
  0xa6   : > { %p4770_p0 = pnand %p4769_p13, %p4763_p3 }
  0xa8   : > { %4773 = shalt.err (!%p4770_p0)
}
  0xa9   : > { %4146 = dma.hbm_to_vmem [thread:$0]  (%p6978_p11), %s307_s25, 128, %s310_s13, %s5198_s16  }
  0xaa PF: > { %p6979_p10 = scmp.ne.s32.totalorder %s6973_s10, 0 }
  0xac   : > { %318 = sbr.rel (%p6979_p10) target bundleno = 1305 (0x519), region = 40 }
  0xb3   : > { %s5226_s18 = sand.u32 1, %s4880_s22   ;;  %p6980_p4 = scmp.ne.s32.totalorder %s6962_s12, 0 }
  0xb4   : > { %s3627_s14 = sshll.u32 %s5226_s18, 3  ;;  %s321_s7 = scalar_lea.sflag [#allocation5], %s5226_s18 }
  0xb5   : > { %s5230_s21 = scalar_lea.vmem [#allocation4], %s3627_s14 }
  0xb6   : > { %4847 = dma.done.wait (%p6980_p4), %s321_s7, 128  }
  0xb7   : > { %4849 = vsyncadd (%p6980_p4), %s321_s7, 4294967168  ;;  %s6981_s15 = sld [smem:[#allocation28_spill]]  ;;  %s329_s10 = sand.u32 1, %s5009_s29  }
  0xb8   : > { %s331_s16 = sand.u32 1, %s4868_s19   ;;  %s330_s25 = scalar_lea.sflag [#allocation8], %s329_s10 }
  0xb9   : > { %s3628_s13 = sshll.u32 %s331_s16, 10 }
  0xba   : > { %s5238_s24 = scalar_lea.vmem [#allocation7], %s3628_s13 }
  0xbd   : > { %p6982_p11 = scmp.ne.s32.totalorder %s6981_s15, 0 }
  0xbf   : > { %4851 = dma.done.wait (%p6982_p11), %s330_s25, 16512  }
  0xc0   : > { %4853 = vsyncadd (%p6982_p11), %s330_s25, 4294950784  ;;  %s5244_s8 = sshll.u32 %s331_s16, 3  ;;  %p6983_p5 = scmp.eq.s32.totalorder %s5009_s29, 0 }
  0xc1   : > { %s342_s12 = scalar_lea.vmem [#allocation9], %s5244_s8 }
  0xc2   : > { %4855 = dma.done.wait (%p6983_p5), [#allocation11], 4112   ;;  %p6984_p2 = pmov %p6983_p5 }
  0xc3   : > { %s5251_s9 = scalar_lea.vmem [#allocation13], %s3627_s14  ;;  %s6985_s6 = sld [smem:[#allocation22_spill]] }
  0xc4   : > { %4857 = vsyncadd (%p6984_p2), [#allocation11], 4294963184 }
  0xc9   : > { %p3633_p8 = scmp.ne.s32.totalorder %s6985_s6, 0 }
  0xca   : > { %v394_v0 = vld [vmem:[#allocation10] sm:$0xff] (!%p3633_p8)  ;;  %v395_v1 = vld [vmem:[#allocation10 + $0x10] sm:$0xff] (!%p3633_p8)  ;;  %v4918_v3 = vmov (!%p3633_p8), 0.0|0.0   ;;  %vm4919_vm0 = vmmov (!%p3633_p8), 0   ;;  %v4920_v6 = vmov (!%p3633_p8), 0.0  }
  0xcb   : > { %392 = sbr.rel (%p3633_p8) target bundleno = 449 (0x1c1), region = 64  ;;  %v396_v2 = vld [vmem:[#allocation10 + $0x20] sm:$0xff] (!%p3633_p8)  ;;  %4061 = vmatprep.subr.bf16.mxu0 (!%p3633_p8), %v4918_v3  ;;  %v4062_v4 = vpack.c.bf16 (!%p3633_p8), %v395_v1, %v394_v0  ;;  %v397_v5 = vld [vmem:[#allocation10 + $0x30] sm:$0xff] (!%p3633_p8)  ;;  %3834 = vmatprep.mubr.msk.f32.mxu0 (!%p3633_p8), %vm4919_vm0, %v4920_v6  ;;  %481 = vst [vmem:[#allocation3] sm:$0xff] (!%p3633_p8), %v4920_v6 }
  0xcc   : > { %v4065_v7 = vpack.c.bf16 (!%p3633_p8), %v397_v5, %v396_v2  ;;  %v398_v8 = vld [vmem:[#allocation10 + $0x40] sm:$0xff] (!%p3633_p8)  ;;  %v399_v9 = vld [vmem:[#allocation10 + $0x50] sm:$0xff] (!%p3633_p8) }
  0xcd   : > { %4063 = vmatpush3.bf16.msra.mxu0 (!%p3633_p8), %v4062_v4  ;;  %v4068_v10 = vpack.c.bf16 (!%p3633_p8), %v399_v9, %v398_v8  ;;  %v400_v11 = vld [vmem:[#allocation10 + $0x60] sm:$0xff] (!%p3633_p8)  ;;  %v401_v12 = vld [vmem:[#allocation10 + $0x70] sm:$0xff] (!%p3633_p8) }
  0xce   : > { %4064 = vmatprep.subr.bf16.mxu0 (!%p3633_p8), %v4918_v3  ;;  %v4071_v13 = vpack.c.bf16 (!%p3633_p8), %v401_v12, %v400_v11  ;;  %v402_v14 = vld [vmem:[#allocation10 + $0x80] sm:$0xff] (!%p3633_p8)  ;;  %v403_v15 = vld [vmem:[#allocation10 + $0x90] sm:$0xff] (!%p3633_p8) }
  0xcf   : > { %v4074_v16 = vpack.c.bf16 (!%p3633_p8), %v403_v15, %v402_v14  ;;  %v404_v17 = vld [vmem:[#allocation10 + $0xa0] sm:$0xff] (!%p3633_p8)  ;;  %v405_v18 = vld [vmem:[#allocation10 + $0xb0] sm:$0xff] (!%p3633_p8) }
  0xd0   : > { %v4077_v19 = vpack.c.bf16 (!%p3633_p8), %v405_v18, %v404_v17  ;;  %v406_v20 = vld [vmem:[#allocation10 + $0xc0] sm:$0xff] (!%p3633_p8)  ;;  %v407_v21 = vld [vmem:[#allocation10 + $0xd0] sm:$0xff] (!%p3633_p8) }
  0xd1   : > { %4066 = vmatpush3.bf16.msra.mxu0 (!%p3633_p8), %v4065_v7  ;;  %v4080_v22 = vpack.c.bf16 (!%p3633_p8), %v407_v21, %v406_v20  ;;  %v408_v23 = vld [vmem:[#allocation10 + $0xe0] sm:$0xff] (!%p3633_p8)  ;;  %v409_v24 = vld [vmem:[#allocation10 + $0xf0] sm:$0xff] (!%p3633_p8) }
  0xd2   : > { %4067 = vmatprep.subr.bf16.mxu0 %v4918_v3  ;;  %v4083_v25 = vpack.c.bf16 %v409_v24, %v408_v23  ;;  %v393_v26 = vld [vmem:[%s5230_s21] sm:$0xff] }
  0xd5   : > { %4069 = vmatpush3.bf16.msra.mxu0 %v4068_v10 }
  0xd6   : > { %4070 = vmatprep.subr.bf16.mxu0 %v4918_v3 }
  0xd9   : > { %4072 = vmatpush3.bf16.msra.mxu0 %v4071_v13 }
  0xda   : > { %4073 = vmatprep.subr.bf16.mxu0 %v4918_v3 }
  0xdd   : > { %4075 = vmatpush3.bf16.msra.mxu0 %v4074_v16 }
  0xde   : > { %4076 = vmatprep.subr.bf16.mxu0 %v4918_v3 }
  0xe1   : > { %4078 = vmatpush3.bf16.msra.mxu0 %v4077_v19 }
  0xe2   : > { %4079 = vmatprep.subr.bf16.mxu0 %v4918_v3 }
  0xe5   : > { %4081 = vmatpush3.bf16.msra.mxu0 %v4080_v22 }
  0xe6   : > { %4082 = vmatprep.subr.bf16.mxu0 %v4918_v3 }
  0xe9   : > { %4084 = vmatpush3.bf16.msra.mxu0 %v4083_v25 }
  0xec   : > { %3835 = vmatmul.mubr.f32.vlgmr.msra.gmra.mrb[0].mxu0 %v393_v26 }
 0x1bf   : > { %v476_v27 = vpop.f32.mrb[0].mxu0 }
 0x1c0   : > { %480 = vst [vmem:[#allocation2] sm:$0xff] %v476_v27  ;;  %v3836_v28 = vpop.f32.mrb[1].mxu0 }
 0x1c1 PF: > { %v610_v29 = vld [vmem:[#allocation10 + $0x8] sm:$0xff]  ;;  %v611_v30 = vld [vmem:[#allocation10 + $0x18] sm:$0xff]  ;;  %v482_v38 = vld [vmem:[%s5238_s24] sm:$0xff]  ;;  %v1337_v42 = vlaneseq  ;;  %vm3423_vm1 = vcmask 1041409   ;;  %vm3425_vm2 = vcmask 1042434   ;;  %vm3427_vm3 = vcmask 1043459  }
 0x1c2   : > { %v612_v31 = vld [vmem:[#allocation10 + $0x28] sm:$0xff]  ;;  %v4085_v32 = vpack.c.bf16 %v611_v30, %v610_v29  ;;  %v613_v33 = vld [vmem:[#allocation10 + $0x38] sm:$0xff]  ;;  %v546_v39 = vld [vmem:[%s5238_s24 + $0x200] sm:$0xff]  ;;  %3869 = vmatprep.mubr.f32.mxu0 %v482_v38  ;;  %vm3429_vm4 = vcmask 1044484   ;;  %vm3431_vm5 = vcmask 1045509   ;;  %vm3433_vm6 = vcmask 1046534  }
 0x1c3   : > { %v4089_v34 = vpack.c.bf16 %v613_v33, %v612_v31  ;;  %v614_v35 = vld [vmem:[#allocation10 + $0x48] sm:$0xff]  ;;  %v615_v36 = vld [vmem:[#allocation10 + $0x58] sm:$0xff]  ;;  %3965 = vmatprep.mubr.f32.mxu1 %v546_v39  ;;  %v5257_v46 = vshrl.u32 %v1337_v42, 7  ;;  %v484_v62 = vld [vmem:[%s5238_s24 + $0x10] sm:$0xff]  ;;  %vm3435_vm7 = vcmask 1047559   ;;  %s7242_s29 = sld [smem:[#allocation22_spill]] }
 0x1c4   : > { %4086 = vmatprep.subr.bf16.mxu0 %v4085_v32  ;;  %4117 = vmatprep.subr.bf16.mxu1 %v4085_v32  ;;  %v4093_v37 = vpack.c.bf16 %v615_v36, %v614_v35  ;;  %v616_v40 = vld [vmem:[#allocation10 + $0x68] sm:$0xff]  ;;  %v617_v41 = vld [vmem:[#allocation10 + $0x78] sm:$0xff]  ;;  %v548_v63 = vld [vmem:[%s5238_s24 + $0x210] sm:$0xff] }
 0x1c5   : > { %4088 = vmatpush3.bf16.msra.mxu0 %v4085_v32  ;;  %4125 = vmatpush3.bf16.msra.mxu1 %v4085_v32  ;;  %v4097_v43 = vpack.c.bf16 %v617_v41, %v616_v40  ;;  %v618_v44 = vld [vmem:[#allocation10 + $0x88] sm:$0xff]  ;;  %v619_v45 = vld [vmem:[#allocation10 + $0x98] sm:$0xff]  ;;  %6986 = vst [vmem:[#allocation31_spill] sm:$0xff] %v5257_v46  ;;  %v5260_v50 = vsub.s32 0, %v5257_v46  ;;  %v486_v2 = vld [vmem:[%s5238_s24 + $0x20] sm:$0xff]  ;;  %v2523_v8 = vsub.s32 1, %v5257_v46 }
 0x1c6   : > { %4090 = vmatprep.subr.bf16.mxu0 %v4089_v34  ;;  %4118 = vmatprep.subr.bf16.mxu1 %v4089_v34  ;;  %v4101_v47 = vpack.c.bf16 %v619_v45, %v618_v44  ;;  %v620_v48 = vld [vmem:[#allocation10 + $0xa8] sm:$0xff]  ;;  %v621_v49 = vld [vmem:[#allocation10 + $0xb8] sm:$0xff]  ;;  %v550_v3 = vld [vmem:[%s5238_s24 + $0x220] sm:$0xff]  ;;  %v2590_v42 = vsub.s32 2, %v5257_v46 }
 0x1c7   : > { %v4105_v51 = vpack.c.bf16 %v621_v49, %v620_v48  ;;  %v622_v52 = vld [vmem:[#allocation10 + $0xc8] sm:$0xff]  ;;  %v623_v53 = vld [vmem:[#allocation10 + $0xd8] sm:$0xff]  ;;  %v488_v6 = vld [vmem:[%s5238_s24 + $0x30] sm:$0xff] }
 0x1c8   : > { %v5264_v54 = vld [vmem:[%s342_s12] sm:$0xff]  ;;  %v4109_v56 = vpack.c.bf16 %v623_v53, %v622_v52  ;;  %v624_v57 = vld [vmem:[#allocation10 + $0xe8] sm:$0xff]  ;;  %v552_v7 = vld [vmem:[%s5238_s24 + $0x230] sm:$0xff] }
 0x1c9   : > { %4092 = vmatpush3.bf16.msra.mxu0 %v4089_v34  ;;  %4126 = vmatpush3.bf16.msra.mxu1 %v4089_v34  ;;  %v5268_v55 = vrot.slane %v5264_v54, %v5260_v50  ;;  %v625_v58 = vld [vmem:[#allocation10 + $0xf8] sm:$0xff]  ;;  %v485_v0 = vld [vmem:[%s5238_s24 + $0x18] sm:$0xff]  ;;  %v490_v11 = vld [vmem:[%s5238_s24 + $0x40] sm:$0xff]  ;;  %v5302_v13 = vrot.slane %v5264_v54, %v2523_v8  ;;  %v5354_v48 = vrot.slane %v5264_v54, %v2590_v42  ;;  %p3635_p9 = scmp.ne.s32.totalorder %s7242_s29, 1 }
 0x1ca   : > { %4094 = vmatprep.subr.bf16.mxu0 %v4093_v37  ;;  %4119 = vmatprep.subr.bf16.mxu1 %v4093_v37  ;;  %v4113_v59 = vpack.c.bf16 %v625_v58, %v624_v57  ;;  %v483_v60 = vld [vmem:[%s5238_s24 + $0x8] sm:$0xff]  ;;  %v549_v1 = vld [vmem:[%s5238_s24 + $0x218] sm:$0xff]  ;;  %v554_v12 = vld [vmem:[%s5238_s24 + $0x240] sm:$0xff] }
 0x1cb   : > { %2463 = vbcast.lane.b32.xlu1 %v5268_v55, 264  ;;  %2459 = vbcast.lane.b32.xlu0 %v5268_v55, 256  ;;  %v547_v61 = vld [vmem:[%s5238_s24 + $0x208] sm:$0xff]  ;;  %v489_v9 = vld [vmem:[%s5238_s24 + $0x38] sm:$0xff]  ;;  %v492_v16 = vld [vmem:[%s5238_s24 + $0x50] sm:$0xff] }
 0x1cc   : > { %v487_v4 = vld [vmem:[%s5238_s24 + $0x28] sm:$0xff]  ;;  %v553_v10 = vld [vmem:[%s5238_s24 + $0x238] sm:$0xff]  ;;  %v556_v17 = vld [vmem:[%s5238_s24 + $0x250] sm:$0xff] }
 0x1cd   : > { %4096 = vmatpush3.bf16.msra.mxu0 %v4093_v37  ;;  %4127 = vmatpush3.bf16.msra.mxu1 %v4093_v37  ;;  %v551_v5 = vld [vmem:[%s5238_s24 + $0x228] sm:$0xff]  ;;  %v493_v18 = vld [vmem:[%s5238_s24 + $0x58] sm:$0xff]  ;;  %v494_v20 = vld [vmem:[%s5238_s24 + $0x60] sm:$0xff] }
 0x1ce   : > { %4098 = vmatprep.subr.bf16.mxu0 %v4097_v43  ;;  %4120 = vmatprep.subr.bf16.mxu1 %v4097_v43  ;;  %v491_v14 = vld [vmem:[%s5238_s24 + $0x48] sm:$0xff]  ;;  %v557_v19 = vld [vmem:[%s5238_s24 + $0x258] sm:$0xff]  ;;  %v558_v21 = vld [vmem:[%s5238_s24 + $0x260] sm:$0xff] }
 0x1cf   : > { %2467 = vbcast.lane.b32.xlu1 %v5268_v55, 272  ;;  %2475 = vbcast.lane.b32.xlu0 %v5268_v55, 288  ;;  %v555_v15 = vld [vmem:[%s5238_s24 + $0x248] sm:$0xff]  ;;  %v496_v24 = vld [vmem:[%s5238_s24 + $0x70] sm:$0xff]  ;;  %v497_v26 = vld [vmem:[%s5238_s24 + $0x78] sm:$0xff] }
 0x1d0   : > { %v495_v22 = vld [vmem:[%s5238_s24 + $0x68] sm:$0xff]  ;;  %v560_v25 = vld [vmem:[%s5238_s24 + $0x270] sm:$0xff]  ;;  %v561_v27 = vld [vmem:[%s5238_s24 + $0x278] sm:$0xff] }
 0x1d1   : > { %4100 = vmatpush3.bf16.msra.mxu0 %v4097_v43  ;;  %4128 = vmatpush3.bf16.msra.mxu1 %v4097_v43  ;;  %v559_v23 = vld [vmem:[%s5238_s24 + $0x268] sm:$0xff]  ;;  %v498_v28 = vld [vmem:[%s5238_s24 + $0x80] sm:$0xff]  ;;  %v500_v32 = vld [vmem:[%s5238_s24 + $0x90] sm:$0xff] }
 0x1d2   : > { %4102 = vmatprep.subr.bf16.mxu0 %v4101_v47  ;;  %4121 = vmatprep.subr.bf16.mxu1 %v4101_v47  ;;  %v562_v29 = vld [vmem:[%s5238_s24 + $0x280] sm:$0xff]  ;;  %v499_v30 = vld [vmem:[%s5238_s24 + $0x88] sm:$0xff]  ;;  %v564_v33 = vld [vmem:[%s5238_s24 + $0x290] sm:$0xff] }
 0x1d3   : > { %2471 = vbcast.lane.b32.xlu1 %v5268_v55, 280  ;;  %2483 = vbcast.lane.b32.xlu0 %v5268_v55, 304  ;;  %v563_v31 = vld [vmem:[%s5238_s24 + $0x288] sm:$0xff]  ;;  %v501_v34 = vld [vmem:[%s5238_s24 + $0x98] sm:$0xff]  ;;  %v502_v36 = vld [vmem:[%s5238_s24 + $0xa0] sm:$0xff] }
 0x1d4   : > { %v565_v35 = vld [vmem:[%s5238_s24 + $0x298] sm:$0xff]  ;;  %v566_v37 = vld [vmem:[%s5238_s24 + $0x2a0] sm:$0xff]  ;;  %v503_v38 = vld [vmem:[%s5238_s24 + $0xa8] sm:$0xff] }
 0x1d5   : > { %4104 = vmatpush3.bf16.msra.mxu0 %v4101_v47  ;;  %4129 = vmatpush3.bf16.msra.mxu1 %v4101_v47  ;;  %v567_v39 = vld [vmem:[%s5238_s24 + $0x2a8] sm:$0xff]  ;;  %v504_v40 = vld [vmem:[%s5238_s24 + $0xb0] sm:$0xff]  ;;  %v505_v43 = vld [vmem:[%s5238_s24 + $0xb8] sm:$0xff] }
 0x1d6   : > { %4106 = vmatprep.subr.bf16.mxu0 %v4105_v51  ;;  %4122 = vmatprep.subr.bf16.mxu1 %v4105_v51  ;;  %v568_v41 = vld [vmem:[%s5238_s24 + $0x2b0] sm:$0xff]  ;;  %v569_v44 = vld [vmem:[%s5238_s24 + $0x2b8] sm:$0xff]  ;;  %v506_v45 = vld [vmem:[%s5238_s24 + $0xc0] sm:$0xff] }
 0x1d7   : > { %2479 = vbcast.lane.b32.xlu1 %v5268_v55, 296  ;;  %2491 = vbcast.lane.b32.xlu0 %v5268_v55, 320  ;;  %v570_v47 = vld [vmem:[%s5238_s24 + $0x2c0] sm:$0xff]  ;;  %v507_v49 = vld [vmem:[%s5238_s24 + $0xc8] sm:$0xff]  ;;  %v508_v52 = vld [vmem:[%s5238_s24 + $0xd0] sm:$0xff] }
 0x1d8   : > { %v572_v53 = vld [vmem:[%s5238_s24 + $0x2d0] sm:$0xff]  ;;  %v510_v57 = vld [vmem:[%s5238_s24 + $0xe0] sm:$0xff]  ;;  %v581_v8 = vld [vmem:[%s5238_s24 + $0x318] sm:$0xff] }
 0x1d9   : > { %4108 = vmatpush3.bf16.msra.mxu0 %v4105_v51  ;;  %4130 = vmatpush3.bf16.msra.mxu1 %v4105_v51  ;;  %v571_v51 = vld [vmem:[%s5238_s24 + $0x2c8] sm:$0xff]  ;;  %v574_v58 = vld [vmem:[%s5238_s24 + $0x2e0] sm:$0xff] }
 0x1da   : > { %4110 = vmatprep.subr.bf16.mxu0 %v4109_v56  ;;  %4123 = vmatprep.subr.bf16.mxu1 %v4109_v56  ;;  %v534_v42 = vld [vmem:[%s5238_s24 + $0x1a0] sm:$0xff] }
 0x1db   : > { %2487 = vbcast.lane.b32.xlu1 %v5268_v55, 312  ;;  %2499 = vbcast.lane.b32.xlu0 %v5268_v55, 336 }
 0x1dd   : > { %4112 = vmatpush3.bf16.msra.mxu0 %v4109_v56  ;;  %4131 = vmatpush3.bf16.msra.mxu1 %v4109_v56  ;;  %v573_v56 = vld [vmem:[%s5238_s24 + $0x2d8] sm:$0xff] }
 0x1de   : > { %4114 = vmatprep.subr.bf16.mxu0 %v4113_v59  ;;  %4124 = vmatprep.subr.bf16.mxu1 %v4113_v59 }
 0x1df   : > { %2495 = vbcast.lane.b32.xlu1 %v5268_v55, 328  ;;  %2507 = vbcast.lane.b32.xlu0 %v5268_v55, 352 }
 0x1e1   : > { %4116 = vmatpush3.bf16.msra.mxu0 %v4113_v59  ;;  %4132 = vmatpush3.bf16.msra.mxu1 %v4113_v59  ;;  %v511_v59 = vld [vmem:[%s5238_s24 + $0xe8] sm:$0xff] }
 0x1e3   : > { %2503 = vbcast.lane.b32.xlu1 %v5268_v55, 344  ;;  %2515 = vbcast.lane.b32.xlu0 %v5268_v55, 368 }
 0x1e4   : > { %3870 = vmatmul.mubr.f32.vlgmr.msra.gmra.mrb[0].mxu0 %v483_v60  ;;  %3966 = vmatmul.mubr.f32.vlgmr.msra.gmra.mrb[0].mxu1 %v547_v61  ;;  %v575_v60 = vld [vmem:[%s5238_s24 + $0x2e8] sm:$0xff]  ;;  %v512_v61 = vld [vmem:[%s5238_s24 + $0xf0] sm:$0xff] }
 0x1e5   : > { %3872 = vmatprep.mubr.f32.mxu0 %v484_v62  ;;  %3968 = vmatprep.mubr.f32.mxu1 %v548_v63  ;;  %v576_v62 = vld [vmem:[%s5238_s24 + $0x2f0] sm:$0xff]  ;;  %v513_v63 = vld [vmem:[%s5238_s24 + $0xf8] sm:$0xff] }
 0x1e7   : > { %2511 = vbcast.lane.b32.xlu1 %v5268_v55, 360  ;;  %2526 = vbcast.lane.b32.xlu0 %v5302_v13, 256 }
 0x1e8   : > { %3873 = vmatmul.mubr.f32.gmra.mrb[2].mxu0 %v485_v0  ;;  %3969 = vmatmul.mubr.f32.gmra.mrb[2].mxu1 %v549_v1  ;;  %v577_v0 = vld [vmem:[%s5238_s24 + $0x2f8] sm:$0xff]  ;;  %v514_v1 = vld [vmem:[%s5238_s24 + $0x100] sm:$0xff] }
 0x1e9   : > { %3875 = vmatprep.mubr.f32.mxu0 %v486_v2  ;;  %3971 = vmatprep.mubr.f32.mxu1 %v550_v3  ;;  %v578_v2 = vld [vmem:[%s5238_s24 + $0x300] sm:$0xff]  ;;  %v515_v3 = vld [vmem:[%s5238_s24 + $0x108] sm:$0xff] }
 0x1eb   : > { %2519 = vbcast.lane.b32.xlu1 %v5268_v55, 376  ;;  %2534 = vbcast.lane.b32.xlu0 %v5302_v13, 272  ;;  %v509_v55 = vld [vmem:[%s5238_s24 + $0xd8] sm:$0xff] }
 0x1ec   : > { %3876 = vmatmul.mubr.f32.gmra.mrb[4].mxu0 %v487_v4  ;;  %3972 = vmatmul.mubr.f32.gmra.mrb[4].mxu1 %v551_v5  ;;  %v579_v4 = vld [vmem:[%s5238_s24 + $0x308] sm:$0xff]  ;;  %v516_v5 = vld [vmem:[%s5238_s24 + $0x110] sm:$0xff] }
 0x1ed   : > { %3878 = vmatprep.mubr.f32.mxu0 %v488_v6  ;;  %3974 = vmatprep.mubr.f32.mxu1 %v552_v7  ;;  %v580_v6 = vld [vmem:[%s5238_s24 + $0x310] sm:$0xff]  ;;  %v517_v7 = vld [vmem:[%s5238_s24 + $0x118] sm:$0xff] }
 0x1ef   : > { %2530 = vbcast.lane.b32.xlu1 %v5302_v13, 264  ;;  %2542 = vbcast.lane.b32.xlu0 %v5302_v13, 288 }
 0x1f0   : > { %3879 = vmatmul.mubr.f32.gmra.mrb[6].mxu0 %v489_v9  ;;  %3975 = vmatmul.mubr.f32.gmra.mrb[6].mxu1 %v553_v10  ;;  %v518_v9 = vld [vmem:[%s5238_s24 + $0x120] sm:$0xff] }
 0x1f1   : > { %3881 = vmatprep.mubr.f32.mxu0 %v490_v11  ;;  %3977 = vmatprep.mubr.f32.mxu1 %v554_v12  ;;  %v582_v10 = vld [vmem:[%s5238_s24 + $0x320] sm:$0xff]  ;;  %v519_v11 = vld [vmem:[%s5238_s24 + $0x128] sm:$0xff] }
 0x1f2   : > { %v583_v12 = vld [vmem:[%s5238_s24 + $0x328] sm:$0xff] }
 0x1f3   : > { %2538 = vbcast.lane.b32.xlu1 %v5302_v13, 280  ;;  %2550 = vbcast.lane.b32.xlu0 %v5302_v13, 304 }
 0x1f4   : > { %3882 = vmatmul.mubr.f32.gmra.mrb[8].mxu0 %v491_v14  ;;  %3978 = vmatmul.mubr.f32.gmra.mrb[8].mxu1 %v555_v15  ;;  %v584_v14 = vld [vmem:[%s5238_s24 + $0x330] sm:$0xff]  ;;  %v2657_v15 = vsub.s32 3, %v5257_v46 }
 0x1f5   : > { %3884 = vmatprep.mubr.f32.mxu0 %v492_v16  ;;  %3980 = vmatprep.mubr.f32.mxu1 %v556_v17  ;;  %v521_v16 = vld [vmem:[%s5238_s24 + $0x138] sm:$0xff] }
 0x1f6   : > { %v585_v17 = vld [vmem:[%s5238_s24 + $0x338] sm:$0xff] }
 0x1f7   : > { %2546 = vbcast.lane.b32.xlu1 %v5302_v13, 296  ;;  %2558 = vbcast.lane.b32.xlu0 %v5302_v13, 320 }
 0x1f8   : > { %3885 = vmatmul.mubr.f32.gmra.mrb[10].mxu0 %v493_v18  ;;  %3981 = vmatmul.mubr.f32.gmra.mrb[10].mxu1 %v557_v19  ;;  %v522_v18 = vld [vmem:[%s5238_s24 + $0x140] sm:$0xff] }
 0x1f9   : > { %3887 = vmatprep.mubr.f32.mxu0 %v494_v20  ;;  %3983 = vmatprep.mubr.f32.mxu1 %v558_v21  ;;  %v586_v19 = vld [vmem:[%s5238_s24 + $0x340] sm:$0xff]  ;;  %v5406_v20 = vrot.slane %v5264_v54, %v2657_v15  ;;  %v523_v21 = vld [vmem:[%s5238_s24 + $0x148] sm:$0xff]  ;;  %v525_v54 = vld [vmem:[%s5238_s24 + $0x158] sm:$0xff] }
 0x1fb   : > { %2554 = vbcast.lane.b32.xlu1 %v5302_v13, 312  ;;  %2566 = vbcast.lane.b32.xlu0 %v5302_v13, 336  ;;  %6987 = vst [vmem:[#allocation32_spill] sm:$0xff] %v5406_v20 }
 0x1fc   : > { %3888 = vmatmul.mubr.f32.gmra.mrb[12].mxu0 %v495_v22  ;;  %3984 = vmatmul.mubr.f32.gmra.mrb[12].mxu1 %v559_v23  ;;  %v587_v22 = vld [vmem:[%s5238_s24 + $0x348] sm:$0xff]  ;;  %v524_v23 = vld [vmem:[%s5238_s24 + $0x150] sm:$0xff] }
 0x1fd   : > { %3890 = vmatprep.mubr.f32.mxu0 %v496_v24  ;;  %3986 = vmatprep.mubr.f32.mxu1 %v560_v25  ;;  %v588_v24 = vld [vmem:[%s5238_s24 + $0x350] sm:$0xff]  ;;  %v589_v25 = vld [vmem:[%s5238_s24 + $0x358] sm:$0xff] }
 0x1ff   : > { %2562 = vbcast.lane.b32.xlu1 %v5302_v13, 328  ;;  %2574 = vbcast.lane.b32.xlu0 %v5302_v13, 352 }
 0x200   : > { %3891 = vmatmul.mubr.f32.gmra.mrb[14].mxu0 %v497_v26  ;;  %3987 = vmatmul.mubr.f32.gmra.mrb[14].mxu1 %v561_v27  ;;  %v526_v26 = vld [vmem:[%s5238_s24 + $0x160] sm:$0xff] }
 0x201   : > { %3893 = vmatprep.mubr.f32.mxu0 %v498_v28  ;;  %3989 = vmatprep.mubr.f32.mxu1 %v562_v29  ;;  %v590_v27 = vld [vmem:[%s5238_s24 + $0x360] sm:$0xff]  ;;  %v527_v28 = vld [vmem:[%s5238_s24 + $0x168] sm:$0xff] }
 0x202   : > { %v591_v29 = vld [vmem:[%s5238_s24 + $0x368] sm:$0xff] }
 0x203   : > { %2570 = vbcast.lane.b32.xlu1 %v5302_v13, 344  ;;  %2582 = vbcast.lane.b32.xlu0 %v5302_v13, 368 }
 0x204   : > { %3894 = vmatmul.mubr.f32.gmra.mrb[16].mxu0 %v499_v30  ;;  %3990 = vmatmul.mubr.f32.gmra.mrb[16].mxu1 %v563_v31  ;;  %v528_v30 = vld [vmem:[%s5238_s24 + $0x170] sm:$0xff] }
 0x205   : > { %3896 = vmatprep.mubr.f32.mxu0 %v500_v32  ;;  %3992 = vmatprep.mubr.f32.mxu1 %v564_v33  ;;  %v592_v31 = vld [vmem:[%s5238_s24 + $0x370] sm:$0xff]  ;;  %v529_v32 = vld [vmem:[%s5238_s24 + $0x178] sm:$0xff] }
 0x206   : > { %v593_v33 = vld [vmem:[%s5238_s24 + $0x378] sm:$0xff] }
 0x207   : > { %2578 = vbcast.lane.b32.xlu1 %v5302_v13, 360  ;;  %2593 = vbcast.lane.b32.xlu0 %v5354_v48, 256 }
 0x208   : > { %3897 = vmatmul.mubr.f32.gmra.mrb[18].mxu0 %v501_v34  ;;  %3993 = vmatmul.mubr.f32.gmra.mrb[18].mxu1 %v565_v35  ;;  %v530_v34 = vld [vmem:[%s5238_s24 + $0x180] sm:$0xff] }
 0x209   : > { %3899 = vmatprep.mubr.f32.mxu0 %v502_v36  ;;  %3995 = vmatprep.mubr.f32.mxu1 %v566_v37  ;;  %v594_v35 = vld [vmem:[%s5238_s24 + $0x380] sm:$0xff]  ;;  %v531_v36 = vld [vmem:[%s5238_s24 + $0x188] sm:$0xff] }
 0x20a   : > { %v595_v37 = vld [vmem:[%s5238_s24 + $0x388] sm:$0xff] }
 0x20b   : > { %2586 = vbcast.lane.b32.xlu1 %v5302_v13, 376  ;;  %2601 = vbcast.lane.b32.xlu0 %v5354_v48, 272  ;;  %v520_v13 = vld [vmem:[%s5238_s24 + $0x130] sm:$0xff] }
 0x20c   : > { %3900 = vmatmul.mubr.f32.gmra.mrb[20].mxu0 %v503_v38  ;;  %3996 = vmatmul.mubr.f32.gmra.mrb[20].mxu1 %v567_v39  ;;  %v532_v38 = vld [vmem:[%s5238_s24 + $0x190] sm:$0xff] }
 0x20d   : > { %3902 = vmatprep.mubr.f32.mxu0 %v504_v40  ;;  %3998 = vmatprep.mubr.f32.mxu1 %v568_v41  ;;  %v596_v39 = vld [vmem:[%s5238_s24 + $0x390] sm:$0xff]  ;;  %v533_v40 = vld [vmem:[%s5238_s24 + $0x198] sm:$0xff] }
 0x20e   : > { %v597_v41 = vld [vmem:[%s5238_s24 + $0x398] sm:$0xff] }
 0x20f   : > { %2597 = vbcast.lane.b32.xlu1 %v5354_v48, 264  ;;  %2609 = vbcast.lane.b32.xlu0 %v5354_v48, 288 }
 0x210   : > { %3903 = vmatmul.mubr.f32.gmra.mrb[22].mxu0 %v505_v43  ;;  %3999 = vmatmul.mubr.f32.gmra.mrb[22].mxu1 %v569_v44  ;;  %v598_v43 = vld [vmem:[%s5238_s24 + $0x3a0] sm:$0xff]  ;;  %v535_v44 = vld [vmem:[%s5238_s24 + $0x1a8] sm:$0xff] }
 0x211   : > { %3905 = vmatprep.mubr.f32.mxu0 %v506_v45  ;;  %4001 = vmatprep.mubr.f32.mxu1 %v570_v47  ;;  %v599_v45 = vld [vmem:[%s5238_s24 + $0x3a8] sm:$0xff]  ;;  %v536_v47 = vld [vmem:[%s5238_s24 + $0x1b0] sm:$0xff] }
 0x213   : > { %2605 = vbcast.lane.b32.xlu1 %v5354_v48, 280  ;;  %2617 = vbcast.lane.b32.xlu0 %v5354_v48, 304 }
 0x214   : > { %3906 = vmatmul.mubr.f32.gmra.mrb[24].mxu0 %v507_v49  ;;  %4002 = vmatmul.mubr.f32.gmra.mrb[24].mxu1 %v571_v51  ;;  %v537_v49 = vld [vmem:[%s5238_s24 + $0x1b8] sm:$0xff] }
 0x215   : > { %3908 = vmatprep.mubr.f32.mxu0 %v508_v52  ;;  %4004 = vmatprep.mubr.f32.mxu1 %v572_v53  ;;  %v601_v51 = vld [vmem:[%s5238_s24 + $0x3b8] sm:$0xff]  ;;  %v538_v52 = vld [vmem:[%s5238_s24 + $0x1c0] sm:$0xff] }
 0x216   : > { %v602_v53 = vld [vmem:[%s5238_s24 + $0x3c0] sm:$0xff] }
 0x217   : > { %2613 = vbcast.lane.b32.xlu1 %v5354_v48, 296  ;;  %2625 = vbcast.lane.b32.xlu0 %v5354_v48, 320 }
 0x218   : > { %3909 = vmatmul.mubr.f32.gmra.mrb[26].mxu0 %v509_v55  ;;  %4005 = vmatmul.mubr.f32.gmra.mrb[26].mxu1 %v573_v56  ;;  %v539_v55 = vld [vmem:[%s5238_s24 + $0x1c8] sm:$0xff] }
 0x219   : > { %3911 = vmatprep.mubr.f32.mxu0 %v510_v57  ;;  %4007 = vmatprep.mubr.f32.mxu1 %v574_v58  ;;  %v603_v56 = vld [vmem:[%s5238_s24 + $0x3c8] sm:$0xff]  ;;  %v540_v57 = vld [vmem:[%s5238_s24 + $0x1d0] sm:$0xff] }
 0x21a   : > { %v604_v58 = vld [vmem:[%s5238_s24 + $0x3d0] sm:$0xff] }
 0x21b   : > { %2621 = vbcast.lane.b32.xlu1 %v5354_v48, 312  ;;  %2633 = vbcast.lane.b32.xlu0 %v5354_v48, 336 }
 0x21c   : > { %3912 = vmatmul.mubr.f32.gmra.mrb[28].mxu0 %v511_v59  ;;  %4008 = vmatmul.mubr.f32.gmra.mrb[28].mxu1 %v575_v60  ;;  %v541_v59 = vld [vmem:[%s5238_s24 + $0x1d8] sm:$0xff] }
 0x21d   : > { %3914 = vmatprep.mubr.f32.mxu0 %v512_v61  ;;  %4010 = vmatprep.mubr.f32.mxu1 %v576_v62  ;;  %v605_v60 = vld [vmem:[%s5238_s24 + $0x3d8] sm:$0xff]  ;;  %v542_v61 = vld [vmem:[%s5238_s24 + $0x1e0] sm:$0xff] }
 0x21e   : > { %v606_v62 = vld [vmem:[%s5238_s24 + $0x3e0] sm:$0xff] }
 0x21f   : > { %2629 = vbcast.lane.b32.xlu1 %v5354_v48, 328  ;;  %2641 = vbcast.lane.b32.xlu0 %v5354_v48, 352 }
 0x220   : > { %3915 = vmatmul.mubr.f32.gmra.mrb[30].mxu0 %v513_v63  ;;  %4011 = vmatmul.mubr.f32.gmra.mrb[30].mxu1 %v577_v0  ;;  %v543_v63 = vld [vmem:[%s5238_s24 + $0x1e8] sm:$0xff] }
 0x221   : > { %3917 = vmatprep.mubr.f32.mxu0 %v514_v1  ;;  %4013 = vmatprep.mubr.f32.mxu1 %v578_v2  ;;  %v607_v0 = vld [vmem:[%s5238_s24 + $0x3e8] sm:$0xff]  ;;  %v544_v1 = vld [vmem:[%s5238_s24 + $0x1f0] sm:$0xff]  ;;  %v545_v2 = vld [vmem:[%s5238_s24 + $0x1f8] sm:$0xff] }
 0x223   : > { %2637 = vbcast.lane.b32.xlu1 %v5354_v48, 344  ;;  %2649 = vbcast.lane.b32.xlu0 %v5354_v48, 368 }
 0x224   : > { %3918 = vmatmul.mubr.f32.gmra.mrb[32].mxu0 %v515_v3  ;;  %4014 = vmatmul.mubr.f32.gmra.mrb[32].mxu1 %v579_v4  ;;  %v608_v3 = vld [vmem:[%s5238_s24 + $0x3f0] sm:$0xff]  ;;  %v609_v4 = vld [vmem:[%s5238_s24 + $0x3f8] sm:$0xff] }
 0x225   : > { %3920 = vmatprep.mubr.f32.mxu0 %v516_v5  ;;  %4016 = vmatprep.mubr.f32.mxu1 %v580_v6 }
 0x227   : > { %2645 = vbcast.lane.b32.xlu1 %v5354_v48, 360  ;;  %2660 = vbcast.lane.b32.xlu0 %v5406_v20, 256 }
 0x228   : > { %3921 = vmatmul.mubr.f32.gmra.mrb[34].mxu0 %v517_v7  ;;  %4017 = vmatmul.mubr.f32.gmra.mrb[34].mxu1 %v581_v8 }
 0x229   : > { %3923 = vmatprep.mubr.f32.mxu0 %v518_v9  ;;  %4019 = vmatprep.mubr.f32.mxu1 %v582_v10 }
 0x22b   : > { %2653 = vbcast.lane.b32.xlu1 %v5354_v48, 376  ;;  %2668 = vbcast.lane.b32.xlu0 %v5406_v20, 272  ;;  %v600_v48 = vld [vmem:[%s5238_s24 + $0x3b0] sm:$0xff] }
 0x22c   : > { %3924 = vmatmul.mubr.f32.gmra.mrb[36].mxu0 %v519_v11  ;;  %4020 = vmatmul.mubr.f32.gmra.mrb[36].mxu1 %v583_v12 }
 0x22d   : > { %3926 = vmatprep.mubr.f32.mxu0 %v520_v13  ;;  %4022 = vmatprep.mubr.f32.mxu1 %v584_v14  ;;  %v4921_v14 = vmov 1966171168  }
 0x22e   : > { %v1335_v15 = vunpack.c.l.s4 %v4921_v14 }
 0x22f   : > { %2664 = vbcast.lane.b32.xlu1 %v5406_v20, 264  ;;  %2676 = vbcast.lane.b32.xlu0 %v5406_v20, 288 }
 0x230   : > { %3927 = vmatmul.mubr.f32.gmra.mrb[38].mxu0 %v521_v16  ;;  %4023 = vmatmul.mubr.f32.gmra.mrb[38].mxu1 %v585_v17 }
 0x231   : > { %3929 = vmatprep.mubr.f32.mxu0 %v522_v18  ;;  %4025 = vmatprep.mubr.f32.mxu1 %v586_v19  ;;  %v1336_v18 = vunpack.c.0.s8 %v1335_v15  ;;  %v1331_v19 = vld [vmem:[#allocation2] sm:$0xff] }
 0x233   : > { %2672 = vbcast.lane.b32.xlu1 %v5406_v20, 280  ;;  %2684 = vbcast.lane.b32.xlu0 %v5406_v20, 304 }
 0x234   : > { %3930 = vmatmul.mubr.f32.gmra.mrb[40].mxu0 %v523_v21  ;;  %4026 = vmatmul.mubr.f32.gmra.mrb[40].mxu1 %v587_v22  ;;  %v5492_v21 = vsub.s32 %v1336_v18, %v5257_v46  ;;  %v1333_v22 = vcombine.high %v1331_v19, %v1331_v19 }
 0x235   : > { %3932 = vmatprep.mubr.f32.mxu0 %v524_v23  ;;  %4028 = vmatprep.mubr.f32.mxu1 %v588_v24 }
 0x237   : > { %2680 = vbcast.lane.b32.xlu1 %v5406_v20, 296  ;;  %2692 = vbcast.lane.b32.xlu0 %v5406_v20, 320 }
 0x238   : > { %3933 = vmatmul.mubr.f32.gmra.mrb[42].mxu0 %v525_v54  ;;  %4029 = vmatmul.mubr.f32.gmra.mrb[42].mxu1 %v589_v25  ;;  %v5499_v54 = vrot.slane %v1331_v19, %v5492_v21  ;;  %v5502_v25 = vrot.slane %v1333_v22, %v5492_v21 }
 0x239   : > { %3935 = vmatprep.mubr.f32.mxu0 %v526_v26  ;;  %4031 = vmatprep.mubr.f32.mxu1 %v590_v27 }
 0x23b   : > { %2688 = vbcast.lane.b32.xlu1 %v5406_v20, 312  ;;  %2700 = vbcast.lane.b32.xlu0 %v5406_v20, 336 }
 0x23c   : > { %3936 = vmatmul.mubr.f32.gmra.mrb[44].mxu0 %v527_v28  ;;  %4032 = vmatmul.mubr.f32.gmra.mrb[44].mxu1 %v591_v29  ;;  %v5510_v28 = vrot.slane %v5499_v54, %v5492_v21  ;;  %v5514_v29 = vrot.slane %v5502_v25, %v5492_v21 }
 0x23d   : > { %3938 = vmatprep.mubr.f32.mxu0 %v528_v30  ;;  %4034 = vmatprep.mubr.f32.mxu1 %v592_v31  ;;  %v5469_v5 = vpop.permute.xlu1 %2463  ;;  %v5473_v7 = vpop.permute.xlu0 %2459 }
 0x23e   : > { %6988 = vst [vmem:[#allocation33_spill] sm:$0xff] %v5469_v5  ;;  %6990 = vst [vmem:[#allocation35_spill] sm:$0xff] %v5473_v7  ;;  %v5518_v30 = vrot.slane %v5510_v28, %v5260_v50  ;;  %v5522_v31 = vrot.slane %v5514_v29, %v5260_v50 }
 0x23f   : > { %2696 = vbcast.lane.b32.xlu1 %v5406_v20, 328  ;;  %2708 = vbcast.lane.b32.xlu0 %v5406_v20, 352 }
 0x240   : > { %3939 = vmatmul.mubr.f32.gmra.mrb[46].mxu0 %v529_v32  ;;  %4035 = vmatmul.mubr.f32.gmra.mrb[46].mxu1 %v593_v33 }
 0x241   : > { %3941 = vmatprep.mubr.f32.mxu0 %v530_v34  ;;  %4037 = vmatprep.mubr.f32.mxu1 %v594_v35  ;;  %v5471_v6 = vpop.permute.xlu1 %2467  ;;  %v5477_v9 = vpop.permute.xlu0 %2475 }
 0x242   : > { %6989 = vst [vmem:[#allocation34_spill] sm:$0xff] %v5471_v6  ;;  %6992 = vst [vmem:[#allocation37_spill] sm:$0xff] %v5477_v9 }
 0x243   : > { %2704 = vbcast.lane.b32.xlu1 %v5406_v20, 344 }
 0x244   : > { %3942 = vmatmul.mubr.f32.gmra.mrb[48].mxu0 %v531_v36  ;;  %4038 = vmatmul.mubr.f32.gmra.mrb[48].mxu1 %v595_v37 }
 0x245   : > { %3944 = vmatprep.mubr.f32.mxu0 %v532_v38  ;;  %4040 = vmatprep.mubr.f32.mxu1 %v596_v39  ;;  %v5475_v8 = vpop.permute.xlu1 %2471  ;;  %v5481_v11 = vpop.permute.xlu0 %2483 }
 0x246   : > { %6991 = vst [vmem:[#allocation36_spill] sm:$0xff] %v5475_v8  ;;  %6994 = vst [vmem:[#allocation39_spill] sm:$0xff] %v5481_v11 }
 0x248   : > { %3945 = vmatmul.mubr.f32.gmra.mrb[50].mxu0 %v533_v40  ;;  %4041 = vmatmul.mubr.f32.gmra.mrb[50].mxu1 %v597_v41 }
 0x249   : > { %3947 = vmatprep.mubr.f32.mxu0 %v534_v42  ;;  %4043 = vmatprep.mubr.f32.mxu1 %v598_v43  ;;  %v5479_v10 = vpop.permute.xlu1 %2479  ;;  %v5485_v13 = vpop.permute.xlu0 %2491 }
 0x24a   : > { %6993 = vst [vmem:[#allocation38_spill] sm:$0xff] %v5479_v10  ;;  %6996 = vst [vmem:[#allocation41_spill] sm:$0xff] %v5485_v13 }
 0x24c   : > { %3948 = vmatmul.mubr.f32.gmra.mrb[52].mxu0 %v535_v44  ;;  %4044 = vmatmul.mubr.f32.gmra.mrb[52].mxu1 %v599_v45 }
 0x24d   : > { %3950 = vmatprep.mubr.f32.mxu0 %v536_v47  ;;  %4046 = vmatprep.mubr.f32.mxu1 %v600_v48  ;;  %v5483_v12 = vpop.permute.xlu1 %2487  ;;  %v5489_v17 = vpop.permute.xlu0 %2499 }
 0x24e   : > { %6995 = vst [vmem:[#allocation40_spill] sm:$0xff] %v5483_v12  ;;  %6998 = vst [vmem:[#allocation43_spill] sm:$0xff] %v5489_v17 }
 0x250   : > { %3951 = vmatmul.mubr.f32.gmra.mrb[54].mxu0 %v537_v49  ;;  %4047 = vmatmul.mubr.f32.gmra.mrb[54].mxu1 %v601_v51 }
 0x251   : > { %3953 = vmatprep.mubr.f32.mxu0 %v538_v52  ;;  %4049 = vmatprep.mubr.f32.mxu1 %v602_v53  ;;  %v5487_v16 = vpop.permute.xlu1 %2495  ;;  %v5496_v24 = vpop.permute.xlu0 %2507 }
 0x252   : > { %6997 = vst [vmem:[#allocation42_spill] sm:$0xff] %v5487_v16  ;;  %7000 = vst [vmem:[#allocation45_spill] sm:$0xff] %v5496_v24 }
 0x254   : > { %3954 = vmatmul.mubr.f32.gmra.mrb[56].mxu0 %v539_v55  ;;  %4050 = vmatmul.mubr.f32.gmra.mrb[56].mxu1 %v603_v56 }
 0x255   : > { %3956 = vmatprep.mubr.f32.mxu0 %v540_v57  ;;  %4052 = vmatprep.mubr.f32.mxu1 %v604_v58  ;;  %v5494_v23 = vpop.permute.xlu1 %2503  ;;  %v5506_v27 = vpop.permute.xlu0 %2515 }
 0x256   : > { %6999 = vst [vmem:[#allocation44_spill] sm:$0xff] %v5494_v23  ;;  %7002 = vst [vmem:[#allocation47_spill] sm:$0xff] %v5506_v27 }
 0x258   : > { %3957 = vmatmul.mubr.f32.gmra.mrb[58].mxu0 %v541_v59  ;;  %4053 = vmatmul.mubr.f32.gmra.mrb[58].mxu1 %v605_v60 }
 0x259   : > { %3959 = vmatprep.mubr.f32.mxu0 %v542_v61  ;;  %4055 = vmatprep.mubr.f32.mxu1 %v606_v62  ;;  %v5504_v26 = vpop.permute.xlu1 %2511  ;;  %v5526_v33 = vpop.permute.xlu0 %2526 }
 0x25a   : > { %7001 = vst [vmem:[#allocation46_spill] sm:$0xff] %v5504_v26  ;;  %7004 = vst [vmem:[#allocation49_spill] sm:$0xff] %v5526_v33 }
 0x25c   : > { %3960 = vmatmul.mubr.f32.gmra.mrb[60].mxu0 %v543_v63  ;;  %4056 = vmatmul.mubr.f32.gmra.mrb[60].mxu1 %v607_v0 }
 0x25d   : > { %3962 = vmatprep.mubr.f32.mxu0 %v544_v1  ;;  %4058 = vmatprep.mubr.f32.mxu1 %v608_v3  ;;  %v5524_v32 = vpop.permute.xlu1 %2519  ;;  %v5534_v45 = vpop.permute.xlu0 %2534 }
 0x25e   : > { %7003 = vst [vmem:[#allocation48_spill] sm:$0xff] %v5524_v32  ;;  %7006 = vst [vmem:[#allocation51_spill] sm:$0xff] %v5534_v45 }
 0x260   : > { %3963 = vmatmul.mubr.f32.gmra.mrb[62].mxu0 %v545_v2  ;;  %4059 = vmatmul.mubr.f32.gmra.mrb[62].mxu1 %v609_v4 }
 0x261   : > { %v5532_v44 = vpop.permute.xlu1 %2530  ;;  %v5546_v22 = vpop.permute.xlu0 %2542 }
 0x262   : > { %7005 = vst [vmem:[#allocation50_spill] sm:$0xff] %v5532_v44  ;;  %7008 = vst [vmem:[#allocation53_spill] sm:$0xff] %v5546_v22 }
 0x265   : > { %v5544_v19 = vpop.permute.xlu1 %2538 }
 0x266   : > { %7007 = vst [vmem:[#allocation52_spill] sm:$0xff] %v5544_v19 }
 0x2b7   : > { %v3871_v34 = vpop.f32.mrb[0].mxu0  ;;  %v3967_v35 = vpop.f32.mrb[0].mxu1 }
 0x2b8   : > { %v1423_v36 = vadd.f32 %v3871_v34, %v5518_v30  ;;  %v1487_v37 = vadd.f32 %v3967_v35, %v5522_v31  ;;  %v692_v38 = vpop.f32.mrb[1].mxu0  ;;  %v1012_v39 = vpop.f32.mrb[1].mxu1 }
 0x2b9   : > { %v1422_v40 = vadd.f32 %v5518_v30, %v692_v38  ;;  %v1486_v41 = vadd.f32 %v5522_v31, %v1012_v39 }
 0x2ba   : > { %v1551_v42 = vmul.f32 0.5, %v1423_v36  ;;  %v1615_v43 = vmul.f32 0.5, %v1487_v37 }
 0x2bb   : > { %v1550_v47 = vmul.f32 0.5, %v1422_v40  ;;  %v1614_v48 = vmul.f32 0.5, %v1486_v41  ;;  %v3874_v49 = vpop.f32.mrb[2].mxu0  ;;  %v3970_v51 = vpop.f32.mrb[2].mxu1 }
 0x2bc   : > { %4275 = vtanh.f32 %v1551_v42  ;;  %v1425_v52 = vadd.f32 %v3874_v49, %v5518_v30  ;;  %v702_v53 = vpop.f32.mrb[3].mxu0  ;;  %v1489_v55 = vadd.f32 %v3970_v51, %v5522_v31  ;;  %v1022_v56 = vpop.f32.mrb[3].mxu1 }
 0x2bd   : > { %4277 = vtanh.f32 %v1615_v43  ;;  %v1424_v57 = vadd.f32 %v5518_v30, %v702_v53  ;;  %v1488_v58 = vadd.f32 %v5522_v31, %v1022_v56  ;;  %v5551_v56 = vld [vmem:[#allocation12] ss:$0 sm:$0xff] }
 0x2be   : > { %4279 = vtanh.f32 %v1550_v47  ;;  %v1553_v59 = vmul.f32 0.5, %v1425_v52  ;;  %v1617_v60 = vmul.f32 0.5, %v1489_v55 }
 0x2bf   : > { %4281 = vtanh.f32 %v1614_v48  ;;  %v1552_v61 = vmul.f32 0.5, %v1424_v57  ;;  %v1616_v62 = vmul.f32 0.5, %v1488_v58  ;;  %v3877_v63 = vpop.f32.mrb[4].mxu0  ;;  %v3973_v0 = vpop.f32.mrb[4].mxu1 }
 0x2c0   : > { %4283 = vtanh.f32 %v1553_v59  ;;  %v1427_v1 = vadd.f32 %v3877_v63, %v5518_v30  ;;  %v712_v2 = vpop.f32.mrb[5].mxu0  ;;  %v1032_v3 = vpop.f32.mrb[5].mxu1  ;;  %v1491_v14 = vadd.f32 %v3973_v0, %v5522_v31 }
 0x2c1   : > { %4285 = vtanh.f32 %v1552_v61  ;;  %v1426_v4 = vadd.f32 %v5518_v30, %v712_v2  ;;  %v1490_v15 = vadd.f32 %v5522_v31, %v1032_v3  ;;  %v5554_v3 = vpop.permute.xlu1 %2546 }
 0x2c2   : > { %4287 = vtanh.f32 %v1617_v60  ;;  %v1555_v18 = vmul.f32 0.5, %v1427_v1  ;;  %v1619_v40 = vmul.f32 0.5, %v1491_v14  ;;  %7009 = vst [vmem:[#allocation54_spill] sm:$0xff] %v5554_v3  ;;  %v5556_v14 = vpop.permute.xlu0 %2550 }
 0x2c3   : > { %4289 = vtanh.f32 %v1616_v62  ;;  %v1554_v34 = vmul.f32 0.5, %v1426_v4  ;;  %v3880_v35 = vpop.f32.mrb[6].mxu0  ;;  %v3976_v36 = vpop.f32.mrb[6].mxu1  ;;  %v1618_v37 = vmul.f32 0.5, %v1490_v15  ;;  %7010 = vst [vmem:[#allocation55_spill] sm:$0xff] %v5556_v14 }
 0x2c4   : > { %4291 = vtanh.f32 %v1555_v18  ;;  %v722_v38 = vpop.f32.mrb[7].mxu0  ;;  %v1042_v39 = vpop.f32.mrb[7].mxu1  ;;  %v1429_v41 = vadd.f32 %v3880_v35, %v5518_v30  ;;  %v1493_v49 = vadd.f32 %v3976_v36, %v5522_v31 }
 0x2c5   : > { %4293 = vtanh.f32 %v1554_v34  ;;  %v1428_v42 = vadd.f32 %v5518_v30, %v722_v38  ;;  %v1492_v58 = vadd.f32 %v5522_v31, %v1042_v39 }
 0x2c6   : > { %v4276_v43 = vpop.eup %4275  ;;  %4295 = vtanh.f32 %v1618_v37  ;;  %v1557_v63 = vmul.f32 0.5, %v1429_v41  ;;  %v1621_v36 = vmul.f32 0.5, %v1493_v49 }
 0x2c7   : > { %v4278_v47 = vpop.eup %4277  ;;  %v1807_v48 = vmul.f32 0.5, %v4276_v43  ;;  %v3883_v51 = vpop.f32.mrb[8].mxu0  ;;  %v1556_v57 = vmul.f32 0.5, %v1428_v42  ;;  %4297 = vtanh.f32 %v1619_v40  ;;  %v1620_v41 = vmul.f32 0.5, %v1492_v58 }
 0x2c8   : > { %v3979_v52 = vpop.f32.mrb[8].mxu1  ;;  %v4280_v53 = vpop.eup %4279  ;;  %v1871_v55 = vmul.f32 0.5, %v4278_v47  ;;  %v1431_v49 = vadd.f32 %v3883_v51, %v5518_v30 }
 0x2c9   : > { %v732_v59 = vpop.f32.mrb[9].mxu0  ;;  %v1052_v60 = vpop.f32.mrb[9].mxu1  ;;  %v1935_v62 = vadd.f32 0.5, %v1807_v48  ;;  %v1806_v0 = vmul.f32 0.5, %v4280_v53  ;;  %4299 = vtanh.f32 %v1556_v57 }
 0x2ca   : > { %v4282_v61 = vpop.eup %4281  ;;  %v1999_v2 = vadd.f32 0.5, %v1871_v55  ;;  %v1430_v42 = vadd.f32 %v5518_v30, %v732_v59  ;;  %4301 = vtanh.f32 %v1557_v63  ;;  %v1494_v51 = vadd.f32 %v5522_v31, %v1052_v60 }
 0x2cb   : > { %v4284_v1 = vpop.eup %4283  ;;  %v1870_v4 = vmul.f32 0.5, %v4282_v61  ;;  %v2070_v18 = vmul.f32 %v5551_v56, %v1935_v62  ;;  %v1934_v34 = vadd.f32 0.5, %v1806_v0  ;;  %v3886_v37 = vpop.f32.mrb[10].mxu0  ;;  %v1495_v0 = vadd.f32 %v3979_v52, %v5522_v31 }
 0x2cc   : > { %v4286_v15 = vpop.eup %4285  ;;  %v1809_v35 = vmul.f32 0.5, %v4284_v1  ;;  %v5559_v38 = vpop.f32.mrb[10].mxu1  ;;  %v2134_v40 = vmul.f32 %v5551_v56, %v1999_v2  ;;  %4303 = vtanh.f32 %v1620_v41  ;;  %v1558_v63 = vmul.f32 0.5, %v1430_v42 }
 0x2cd   : > { %v4288_v39 = vpop.eup %4287  ;;  %v742_v43 = vpop.f32.mrb[11].mxu0  ;;  %2199 = vadd.xlane.f32.xlu0 %v2070_v18  ;;  %v1998_v62 = vadd.f32 0.5, %v1870_v4  ;;  %v2069_v57 = vmul.f32 %v5551_v56, %v1934_v34  ;;  %4305 = vtanh.f32 %v1621_v36  ;;  %v1559_v52 = vmul.f32 0.5, %v1431_v49 }
 0x2ce   : > { %v5563_v47 = vpop.f32.mrb[11].mxu1  ;;  %v4290_v48 = vpop.eup %4289  ;;  %v1937_v53 = vadd.f32 0.5, %v1809_v35  ;;  %v1873_v55 = vmul.f32 0.5, %v4288_v39  ;;  %2327 = vadd.xlane.f32.xlu1 %v2134_v40  ;;  %v1808_v35 = vmul.f32 0.5, %v4286_v15  ;;  %v1623_v3 = vmul.f32 0.5, %v1495_v0 }
 0x2cf   : > { %v4292_v61 = vpop.eup %4291  ;;  %v1872_v2 = vmul.f32 0.5, %v4290_v48  ;;  %v5569_v14 = vpop.f32.mrb[12].mxu0  ;;  %v2133_v60 = vmul.f32 %v5551_v56, %v1998_v62  ;;  %4307 = vtanh.f32 %v1558_v63  ;;  %v1622_v49 = vmul.f32 0.5, %v1494_v51 }
 0x2d0   : > { %v4294_v1 = vpop.eup %4293  ;;  %v2072_v58 = vmul.f32 %v5551_v56, %v1937_v53  ;;  %v2001_v59 = vadd.f32 0.5, %v1873_v55  ;;  %v5571_v18 = vpop.f32.mrb[12].mxu1  ;;  %v1811_v41 = vmul.f32 0.5, %v4292_v61  ;;  %v1936_v36 = vadd.f32 0.5, %v1808_v35 }
 0x2d1   : > { %v5574_v39 = vpop.f32.mrb[13].mxu0  ;;  %v5576_v4 = vpop.f32.mrb[13].mxu1  ;;  %2197 = vadd.xlane.f32.xlu0 %v2069_v57  ;;  %v1810_v34 = vmul.f32 0.5, %v4294_v1  ;;  %v2000_v42 = vadd.f32 0.5, %v1872_v2  ;;  %v1432_v1 = vadd.f32 %v5518_v30, %v742_v43  ;;  %4309 = vtanh.f32 %v1559_v52 }
 0x2d2   : > { %v4296_v40 = vpop.eup %4295  ;;  %2203 = vadd.xlane.f32.xlu1 %v2072_v58  ;;  %v5578_v48 = vpop.permute.xlu1 %2554  ;;  %v2136_v53 = vmul.f32 %v5551_v56, %v2001_v59  ;;  %v1433_v62 = vadd.f32 %v3886_v37, %v5518_v30  ;;  %4311 = vtanh.f32 %v1623_v3  ;;  %v1497_v43 = vadd.f32 %v5559_v38, %v5522_v31 }
 0x2d3   : > { %7011 = vst [vmem:[#allocation56_spill] sm:$0xff] %v5578_v48  ;;  %v5581_v55 = vpop.permute.xlu0 %2558  ;;  %v4298_v15 = vpop.eup %4297  ;;  %v1938_v61 = vadd.f32 0.5, %v1810_v34  ;;  %v1874_v2 = vmul.f32 0.5, %v4296_v40  ;;  %v2135_v63 = vmul.f32 %v5551_v56, %v2000_v42  ;;  %v2071_v52 = vmul.f32 %v5551_v56, %v1936_v36 }
 0x2d4   : > { %7012 = vst [vmem:[#allocation57_spill] sm:$0xff] %v5581_v55  ;;  %v5584_v22 = vpop.f32.mrb[14].mxu0  ;;  %v5586_v57 = vpop.f32.mrb[14].mxu1  ;;  %v1939_v55 = vadd.f32 0.5, %v1811_v41  ;;  %v1875_v48 = vmul.f32 0.5, %v4298_v15  ;;  %4313 = vtanh.f32 %v1622_v49  ;;  %v1560_v37 = vmul.f32 0.5, %v1432_v1 }
 0x2d5   : > { %v5589_v58 = vpop.f32.mrb[15].mxu0  ;;  %v5591_v59 = vpop.f32.mrb[15].mxu1  ;;  %2325 = vadd.xlane.f32.xlu0 %v2133_v60  ;;  %v1496_v34 = vadd.f32 %v5522_v31, %v5563_v47  ;;  %v2073_v3 = vmul.f32 %v5551_v56, %v1938_v61  ;;  %v1561_v41 = vmul.f32 0.5, %v1433_v62  ;;  %v2002_v38 = vadd.f32 0.5, %v1874_v2 }
 0x2d6   : > { %v4300_v0 = vpop.eup %4299  ;;  %2331 = vadd.xlane.f32.xlu1 %v2136_v53  ;;  %v5609_v42 = vpop.permute.xlu1 %2562  ;;  %v2074_v36 = vmul.f32 %v5551_v56, %v1939_v55  ;;  %v2003_v1 = vadd.f32 0.5, %v1875_v48  ;;  %v1625_v33 = vmul.f32 0.5, %v1497_v43  ;;  %4315 = vtanh.f32 %v1560_v37 }
 0x2d7   : > { %v4302_v19 = vpop.eup %4301  ;;  %v5597_v35 = vpop.f32.mrb[16].mxu0  ;;  %v1812_v15 = vmul.f32 0.5, %v4300_v0  ;;  %7013 = vst [vmem:[#allocation58_spill] sm:$0xff] %v5609_v42  ;;  %v1624_v62 = vmul.f32 0.5, %v1496_v34  ;;  %v1434_v2 = vadd.f32 %v5518_v30, %v5574_v39  ;;  %4317 = vtanh.f32 %v1561_v41 }
 0x2d8   : > { %v5599_v51 = vpop.f32.mrb[16].mxu1  ;;  %v5604_v40 = vpop.f32.mrb[17].mxu0  ;;  %v1813_v47 = vmul.f32 0.5, %v4302_v19  ;;  %v2137_v19 = vmul.f32 %v5551_v56, %v2002_v38  ;;  %4319 = vtanh.f32 %v1625_v33  ;;  %v1498_v41 = vadd.f32 %v5522_v31, %v5576_v4 }
 0x2d9   : > { %v5606_v53 = vpop.f32.mrb[17].mxu1  ;;  %2329 = vadd.xlane.f32.xlu0 %v2135_v63  ;;  %v4304_v60 = vpop.eup %4303  ;;  %v1435_v63 = vadd.f32 %v5569_v14, %v5518_v30  ;;  %v1940_v48 = vadd.f32 0.5, %v1812_v15  ;;  %4321 = vtanh.f32 %v1624_v62  ;;  %v1348_v38 = vcombine.high %v5499_v54, %v5499_v54 }
 0x2da   : > { %2201 = vadd.xlane.f32.xlu1 %v2071_v52  ;;  %v5612_v49 = vpop.permute.xlu0 %2566  ;;  %v4306_v45 = vpop.eup %4305  ;;  %v1876_v43 = vmul.f32 0.5, %v4304_v60  ;;  %v2138_v52 = vmul.f32 %v5551_v56, %v2003_v1  ;;  %v1499_v1 = vadd.f32 %v5571_v18, %v5522_v31 }
 0x2db   : > { %7014 = vst [vmem:[#allocation59_spill] sm:$0xff] %v5612_v49  ;;  %v5616_v44 = vpop.f32.mrb[18].mxu0  ;;  %v5618_v61 = vpop.f32.mrb[18].mxu1  ;;  %v1941_v49 = vadd.f32 0.5, %v1813_v47  ;;  %v1877_v37 = vmul.f32 0.5, %v4306_v45  ;;  %v1563_v42 = vmul.f32 0.5, %v1435_v63  ;;  %v2075_v33 = vmul.f32 %v5551_v56, %v1940_v48 }
 0x2dc   : > { %v5622_v0 = vpop.f32.mrb[19].mxu0  ;;  %v5624_v55 = vpop.f32.mrb[19].mxu1  ;;  %v1349_v48 = vcombine.high %v5502_v25, %v5502_v25  ;;  %v1627_v25 = vmul.f32 0.5, %v1499_v1 }
 0x2dd   : > { %2205 = vadd.xlane.f32.xlu0 %v2073_v3  ;;  %v4308_v14 = vpop.eup %4307  ;;  %v1562_v3 = vmul.f32 0.5, %v1434_v2  ;;  %v5643_v62 = vpop.permute.xlu1 %2570  ;;  %v2076_v54 = vmul.f32 %v5551_v56, %v1941_v49  ;;  %v2005_v2 = vadd.f32 0.5, %v1877_v37  ;;  %4323 = vtanh.f32 %v1563_v42 }
 0x2de   : > { %2207 = vadd.xlane.f32.xlu1 %v2074_v36  ;;  %v4310_v34 = vpop.eup %4309  ;;  %v2004_v36 = vadd.f32 0.5, %v1876_v43  ;;  %v1814_v47 = vmul.f32 0.5, %v4308_v14  ;;  %7015 = vst [vmem:[#allocation60_spill] sm:$0xff] %v5643_v62  ;;  %v5645_v4 = vpop.permute.xlu0 %2574  ;;  %v1626_v14 = vmul.f32 0.5, %v1498_v41  ;;  %v5659_v49 = vrot.slane %v1348_v38, %v5492_v21 }
 0x2df   : > { %v5628_v39 = vpop.f32.mrb[20].mxu0  ;;  %v5630_v46 = vpop.f32.mrb[20].mxu1  ;;  %7016 = vst [vmem:[#allocation61_spill] sm:$0xff] %v5645_v4  ;;  %v1815_v20 = vmul.f32 0.5, %v4310_v34  ;;  %4325 = vtanh.f32 %v1562_v3  ;;  %v2140_v3 = vmul.f32 %v5551_v56, %v2005_v2  ;;  %v1501_v38 = vadd.f32 %v5586_v57, %v5522_v31 }
 0x2e0   : > { %v5636_v15 = vpop.f32.mrb[21].mxu0  ;;  %v5638_v60 = vpop.f32.mrb[21].mxu1  ;;  %7017 = vst [vmem:[#allocation62_spill] sm:$0xff] %v5659_v49  ;;  %v1942_v34 = vadd.f32 0.5, %v1814_v47  ;;  %v5670_v27 = vrot.slane %v1349_v48, %v5492_v21  ;;  %4327 = vtanh.f32 %v1626_v14  ;;  %v1500_v47 = vadd.f32 %v5522_v31, %v5591_v59 }
 0x2e1   : > { %v4312_v45 = vpop.eup %4311  ;;  %2333 = vadd.xlane.f32.xlu0 %v2137_v19  ;;  %v1437_v19 = vadd.f32 %v5584_v22, %v5518_v30  ;;  %v2139_v22 = vmul.f32 %v5551_v56, %v2004_v36  ;;  %v1943_v41 = vadd.f32 0.5, %v1815_v20  ;;  %v5680_v20 = vrot.slane %v5659_v49, %v5260_v50  ;;  %v5687_v48 = vpop.permute.xlu1 %2578 }
 0x2e2   : > { %v4314_v63 = vpop.eup %4313  ;;  %2335 = vadd.xlane.f32.xlu1 %v2138_v52  ;;  %v1436_v52 = vadd.f32 %v5518_v30, %v5589_v58  ;;  %v1879_v32 = vmul.f32 0.5, %v4312_v45  ;;  %7018 = vst [vmem:[#allocation63_spill] sm:$0xff] %v5670_v27  ;;  %4329 = vtanh.f32 %v1627_v25  ;;  %v2077_v21 = vmul.f32 %v5551_v56, %v1942_v34  ;;  %7019 = vst [vmem:[#allocation64_spill] sm:$0xff] %v5687_v48  ;;  %v5689_v14 = vpop.permute.xlu0 %2582 }
 0x2e3   : > { %v5652_v43 = vpop.f32.mrb[22].mxu0  ;;  %v5654_v18 = vpop.f32.mrb[22].mxu1  ;;  %v1878_v4 = vmul.f32 0.5, %v4314_v63  ;;  %v1565_v58 = vmul.f32 0.5, %v1437_v19  ;;  %7020 = vst [vmem:[#allocation65_spill] sm:$0xff] %v5689_v14  ;;  %v2078_v31 = vmul.f32 %v5551_v56, %v1943_v41  ;;  %v1629_v26 = vmul.f32 0.5, %v1501_v38 }
 0x2e4   : > { %v5661_v37 = vpop.f32.mrb[23].mxu0  ;;  %v5663_v42 = vpop.f32.mrb[23].mxu1  ;;  %v1564_v1 = vmul.f32 0.5, %v1436_v52  ;;  %v2007_v59 = vadd.f32 0.5, %v1879_v32  ;;  %v1438_v34 = vadd.f32 %v5680_v20, %v5604_v40  ;;  %v1439_v38 = vadd.f32 %v5597_v35, %v5680_v20 }
 0x2e5   : > { %2209 = vadd.xlane.f32.xlu0 %v2075_v33  ;;  %v4316_v62 = vpop.eup %4315  ;;  %4331 = vtanh.f32 %v1565_v58 }
 0x2e6   : > { %2211 = vadd.xlane.f32.xlu1 %v2076_v54  ;;  %v4318_v30 = vpop.eup %4317  ;;  %v2006_v54 = vadd.f32 0.5, %v1878_v4  ;;  %v1816_v2 = vmul.f32 0.5, %v4316_v62  ;;  %4333 = vtanh.f32 %v1564_v1  ;;  %v1628_v62 = vmul.f32 0.5, %v1500_v47  ;;  %v5725_v17 = vpop.permute.xlu0 %2593 }
 0x2e7   : > { %v5672_v33 = vpop.f32.mrb[24].mxu0  ;;  %v5674_v36 = vpop.f32.mrb[24].mxu1  ;;  %v1817_v52 = vmul.f32 0.5, %v4318_v30  ;;  %v2142_v1 = vmul.f32 %v5551_v56, %v2007_v59  ;;  %4335 = vtanh.f32 %v1629_v26  ;;  %v1567_v26 = vmul.f32 0.5, %v1439_v38  ;;  %7022 = vst [vmem:[#allocation67_spill] sm:$0xff] %v5725_v17 }
 0x2e8   : > { %v5682_v45 = vpop.f32.mrb[25].mxu0  ;;  %v5684_v63 = vpop.f32.mrb[25].mxu1  ;;  %v2141_v30 = vmul.f32 %v5551_v56, %v2006_v54  ;;  %v1944_v58 = vadd.f32 0.5, %v1816_v2  ;;  %4337 = vtanh.f32 %v1628_v62  ;;  %v1566_v54 = vmul.f32 0.5, %v1438_v34 }
 0x2e9   : > { %v4320_v57 = vpop.eup %4319  ;;  %2337 = vadd.xlane.f32.xlu0 %v2139_v22  ;;  %v5694_v22 = vrot.slane %v5670_v27, %v5260_v50  ;;  %v1945_v47 = vadd.f32 0.5, %v1817_v52  ;;  %v5723_v52 = vpop.permute.xlu1 %2586 }
 0x2ea   : > { %v4322_v19 = vpop.eup %4321  ;;  %2339 = vadd.xlane.f32.xlu1 %v2140_v3  ;;  %v1881_v24 = vmul.f32 0.5, %v4320_v57  ;;  %v2079_v57 = vmul.f32 %v5551_v56, %v1944_v58  ;;  %7021 = vst [vmem:[#allocation66_spill] sm:$0xff] %v5723_v52  ;;  %4339 = vtanh.f32 %v1566_v54 }
 0x2eb   : > { %v5696_v25 = vpop.f32.mrb[26].mxu0  ;;  %v5698_v4 = vpop.f32.mrb[26].mxu1  ;;  %v1880_v14 = vmul.f32 0.5, %v4322_v19  ;;  %v1503_v40 = vadd.f32 %v5599_v51, %v5694_v22  ;;  %v1502_v35 = vadd.f32 %v5694_v22, %v5606_v53  ;;  %v2080_v62 = vmul.f32 %v5551_v56, %v1945_v47 }
 0x2ec   : > { %v5702_v3 = vpop.f32.mrb[27].mxu0  ;;  %v5704_v41 = vpop.f32.mrb[27].mxu1  ;;  %v2009_v34 = vadd.f32 0.5, %v1881_v24  ;;  %4341 = vtanh.f32 %v1567_v26 }
 0x2ed   : > { %v4324_v32 = vpop.eup %4323  ;;  %2213 = vadd.xlane.f32.xlu0 %v2077_v21  ;;  %v1631_v13 = vmul.f32 0.5, %v1503_v40 }
 0x2ee   : > { %v4326_v48 = vpop.eup %4325  ;;  %2215 = vadd.xlane.f32.xlu1 %v2078_v31  ;;  %v2008_v31 = vadd.f32 0.5, %v1880_v14  ;;  %v1819_v53 = vmul.f32 0.5, %v4324_v32  ;;  %v1440_v14 = vadd.f32 %v5680_v20, %v5622_v0  ;;  %v2144_v52 = vmul.f32 %v5551_v56, %v2009_v34  ;;  %v5755_v34 = vpop.permute.xlu1 %2597 }
 0x2ef   : > { %v5712_v23 = vpop.f32.mrb[28].mxu0  ;;  %v5714_v21 = vpop.f32.mrb[28].mxu1  ;;  %v1818_v59 = vmul.f32 0.5, %v4326_v48  ;;  %v1630_v48 = vmul.f32 0.5, %v1502_v35  ;;  %4343 = vtanh.f32 %v1631_v13  ;;  %v1504_v0 = vadd.f32 %v5694_v22, %v5624_v55  ;;  %7023 = vst [vmem:[#allocation68_spill] sm:$0xff] %v5755_v34 }
 0x2f0   : > { %v5718_v2 = vpop.f32.mrb[29].mxu0  ;;  %v5720_v19 = vpop.f32.mrb[29].mxu1  ;;  %v2143_v32 = vmul.f32 %v5551_v56, %v2008_v31  ;;  %v1947_v54 = vadd.f32 0.5, %v1819_v53  ;;  %v1505_v13 = vadd.f32 %v5618_v61, %v5694_v22  ;;  %v1442_v61 = vadd.f32 %v5680_v20, %v5636_v15 }
 0x2f1   : > { %2341 = vadd.xlane.f32.xlu0 %v2141_v30  ;;  %v4328_v51 = vpop.eup %4327  ;;  %v1441_v30 = vadd.f32 %v5616_v44, %v5680_v20  ;;  %v1946_v47 = vadd.f32 0.5, %v1818_v59  ;;  %4345 = vtanh.f32 %v1630_v48  ;;  %v5757_v53 = vpop.permute.xlu0 %2601  ;;  %v1632_v9 = vmul.f32 0.5, %v1504_v0 }
 0x2f2   : > { %2343 = vadd.xlane.f32.xlu1 %v2142_v1  ;;  %v4330_v16 = vpop.eup %4329  ;;  %v1882_v44 = vmul.f32 0.5, %v4328_v51  ;;  %7024 = vst [vmem:[#allocation69_spill] sm:$0xff] %v5757_v53  ;;  %v1507_v15 = vadd.f32 %v5630_v46, %v5694_v22 }
 0x2f3   : > { %v5730_v12 = vpop.f32.mrb[30].mxu0  ;;  %v5732_v58 = vpop.f32.mrb[30].mxu1  ;;  %v1883_v35 = vmul.f32 0.5, %v4330_v16  ;;  %v1569_v17 = vmul.f32 0.5, %v1441_v30  ;;  %v2081_v51 = vmul.f32 %v5551_v56, %v1946_v47  ;;  %v2082_v30 = vmul.f32 %v5551_v56, %v1947_v54 }
 0x2f4   : > { %v5736_v38 = vpop.f32.mrb[31].mxu0  ;;  %v5738_v1 = vpop.f32.mrb[31].mxu1  ;;  %v2010_v16 = vadd.f32 0.5, %v1882_v44  ;;  %v1635_v49 = vmul.f32 0.5, %v1507_v15 }
 0x2f5   : > { %v4332_v24 = vpop.eup %4331  ;;  %2217 = vadd.xlane.f32.xlu0 %v2079_v57  ;;  %v1568_v57 = vmul.f32 0.5, %v1440_v14  ;;  %v2011_v48 = vadd.f32 0.5, %v1883_v35  ;;  %4347 = vtanh.f32 %v1569_v17  ;;  %v1633_v17 = vmul.f32 0.5, %v1505_v13 }
 0x2f6   : > { %v4334_v40 = vpop.eup %4333  ;;  %2219 = vadd.xlane.f32.xlu1 %v2080_v62  ;;  %v1821_v14 = vmul.f32 0.5, %v4332_v24  ;;  %v2145_v24 = vmul.f32 %v5551_v56, %v2010_v16  ;;  %v1570_v16 = vmul.f32 0.5, %v1442_v61  ;;  %v1506_v13 = vadd.f32 %v5694_v22, %v5638_v60 }
 0x2f7   : > { %v5744_v11 = vpop.f32.mrb[32].mxu0  ;;  %v5746_v10 = vpop.f32.mrb[32].mxu1  ;;  %v1820_v62 = vmul.f32 0.5, %v4334_v40  ;;  %4349 = vtanh.f32 %v1568_v57 }
 0x2f8   : > { %v5748_v26 = vpop.f32.mrb[33].mxu0  ;;  %v5750_v31 = vpop.f32.mrb[33].mxu1  ;;  %v1949_v53 = vadd.f32 0.5, %v1821_v14  ;;  %4351 = vtanh.f32 %v1632_v9 }
 0x2f9   : > { %v4336_v59 = vpop.eup %4335  ;;  %2345 = vadd.xlane.f32.xlu0 %v2143_v32  ;;  %v1443_v32 = vadd.f32 %v5628_v39, %v5680_v20  ;;  %v1948_v54 = vadd.f32 0.5, %v1820_v62  ;;  %v2146_v39 = vmul.f32 %v5551_v56, %v2011_v48  ;;  %4353 = vtanh.f32 %v1633_v17  ;;  %v5787_v14 = vpop.permute.xlu1 %2605 }
 0x2fa   : > { %v4338_v55 = vpop.eup %4337  ;;  %2347 = vadd.xlane.f32.xlu1 %v2144_v52  ;;  %v1885_v34 = vmul.f32 0.5, %v4336_v59  ;;  %7025 = vst [vmem:[#allocation70_spill] sm:$0xff] %v5787_v14  ;;  %v2084_v61 = vmul.f32 %v5551_v56, %v1949_v53  ;;  %v1634_v17 = vmul.f32 0.5, %v1506_v13 }
 0x2fb   : > { %v5762_v47 = vpop.f32.mrb[34].mxu0  ;;  %v5764_v44 = vpop.f32.mrb[34].mxu1  ;;  %v1884_v35 = vmul.f32 0.5, %v4338_v55  ;;  %v1571_v27 = vmul.f32 0.5, %v1443_v32  ;;  %v2083_v9 = vmul.f32 %v5551_v56, %v1948_v54  ;;  %v1444_v54 = vadd.f32 %v5680_v20, %v5661_v37 }
 0x2fc   : > { %v5768_v40 = vpop.f32.mrb[35].mxu0  ;;  %v5770_v52 = vpop.f32.mrb[35].mxu1  ;;  %v2013_v60 = vadd.f32 0.5, %v1885_v34  ;;  %v1509_v37 = vadd.f32 %v5654_v18, %v5694_v22 }
 0x2fd   : > { %2221 = vadd.xlane.f32.xlu0 %v2081_v51  ;;  %v4340_v0 = vpop.eup %4339  ;;  %v2012_v59 = vadd.f32 0.5, %v1884_v35  ;;  %v5789_v32 = vpop.permute.xlu0 %2609  ;;  %4355 = vtanh.f32 %v1571_v27  ;;  %v1445_v27 = vadd.f32 %v5652_v43, %v5680_v20  ;;  %v1508_v43 = vadd.f32 %v5694_v22, %v5663_v42 }
 0x2fe   : > { %2223 = vadd.xlane.f32.xlu1 %v2082_v30  ;;  %v4342_v57 = vpop.eup %4341  ;;  %v1822_v48 = vmul.f32 0.5, %v4340_v0  ;;  %7026 = vst [vmem:[#allocation71_spill] sm:$0xff] %v5789_v32  ;;  %4357 = vtanh.f32 %v1570_v16  ;;  %v2148_v16 = vmul.f32 %v5551_v56, %v2013_v60  ;;  %v5819_v60 = vpop.permute.xlu1 %2613 }
 0x2ff   : > { %v5776_v6 = vpop.f32.mrb[36].mxu0  ;;  %v5778_v51 = vpop.f32.mrb[36].mxu1  ;;  %v1823_v8 = vmul.f32 0.5, %v4342_v57  ;;  %v2147_v34 = vmul.f32 %v5551_v56, %v2012_v59  ;;  %4359 = vtanh.f32 %v1635_v49  ;;  %v1572_v59 = vmul.f32 0.5, %v1444_v54  ;;  %7031 = vst [vmem:[#allocation76_spill] sm:$0xff] %v5819_v60 }
 0x300   : > { %v5782_v62 = vpop.f32.mrb[37].mxu0  ;;  %v5784_v55 = vpop.f32.mrb[37].mxu1  ;;  %v1950_v53 = vadd.f32 0.5, %v1822_v48  ;;  %4361 = vtanh.f32 %v1634_v17  ;;  %v1573_v49 = vmul.f32 0.5, %v1445_v27  ;;  %v1446_v27 = vadd.f32 %v5680_v20, %v5682_v45 }
 0x301   : > { %v4344_v30 = vpop.eup %4343  ;;  %2349 = vadd.xlane.f32.xlu0 %v2145_v24  ;;  %v1951_v13 = vadd.f32 0.5, %v1823_v8  ;;  %v5821_v5 = vpop.permute.xlu0 %2617  ;;  %4363 = vtanh.f32 %v1572_v59 }
 0x302   : > { %v4346_v46 = vpop.eup %4345  ;;  %2351 = vadd.xlane.f32.xlu1 %v2146_v39  ;;  %v1887_v32 = vmul.f32 0.5, %v4344_v30  ;;  %v2085_v8 = vmul.f32 %v5551_v56, %v1950_v53  ;;  %7032 = vst [vmem:[#allocation77_spill] sm:$0xff] %v5821_v5  ;;  %v1636_v53 = vmul.f32 0.5, %v1508_v43  ;;  %4365 = vtanh.f32 %v1573_v49 }
 0x303   : > { %v5792_v7 = vpop.f32.mrb[38].mxu0  ;;  %v5794_v24 = vpop.f32.mrb[38].mxu1  ;;  %v1886_v57 = vmul.f32 0.5, %v4346_v46  ;;  %v2086_v54 = vmul.f32 %v5551_v56, %v1951_v13  ;;  %v1447_v13 = vadd.f32 %v5672_v33, %v5680_v20  ;;  %v1510_v49 = vadd.f32 %v5694_v22, %v5684_v63 }
 0x304   : > { %v5798_v35 = vpop.f32.mrb[39].mxu0  ;;  %v5800_v0 = vpop.f32.mrb[39].mxu1  ;;  %v2015_v42 = vadd.f32 0.5, %v1887_v32 }
 0x305   : > { %v4348_v39 = vpop.eup %4347  ;;  %2225 = vadd.xlane.f32.xlu0 %v2083_v9  ;;  %v2014_v30 = vadd.f32 0.5, %v1886_v57 }
 0x306   : > { %v4350_v15 = vpop.eup %4349  ;;  %2227 = vadd.xlane.f32.xlu1 %v2084_v61  ;;  %v1825_v17 = vmul.f32 0.5, %v4348_v39  ;;  %v2150_v43 = vmul.f32 %v5551_v56, %v2015_v42 }
 0x307   : > { %v5808_v14 = vpop.f32.mrb[40].mxu0  ;;  %v5810_v9 = vpop.f32.mrb[40].mxu1  ;;  %v1824_v18 = vmul.f32 0.5, %v4350_v15  ;;  %v2149_v32 = vmul.f32 %v5551_v56, %v2014_v30 }
 0x308   : > { %7027 = vst [vmem:[#allocation72_spill] sm:$0xff] %v5808_v14  ;;  %7028 = vst [vmem:[#allocation73_spill] sm:$0xff] %v5810_v9  ;;  %v5814_v48 = vpop.f32.mrb[41].mxu0  ;;  %v5816_v46 = vpop.f32.mrb[41].mxu1 }
 0x309   : > { %7029 = vst [vmem:[#allocation74_spill] sm:$0xff] %v5814_v48  ;;  %7030 = vst [vmem:[#allocation75_spill] sm:$0xff] %v5816_v46  ;;  %v4352_v61 = vpop.eup %4351  ;;  %2353 = vadd.xlane.f32.xlu0 %v2147_v34  ;;  %v1637_v48 = vmul.f32 0.5, %v1509_v37 }
 0x30a   : > { %2355 = vadd.xlane.f32.xlu1 %v2148_v16  ;;  %v4354_v9 = vpop.eup %4353  ;;  %v1888_v34 = vmul.f32 0.5, %v4352_v61  ;;  %v1952_v16 = vadd.f32 0.5, %v1824_v18  ;;  %v1953_v61 = vadd.f32 0.5, %v1825_v17 }
 0x30b   : > { %v5824_v14 = vpop.f32.mrb[42].mxu0  ;;  %v5826_v46 = vpop.f32.mrb[42].mxu1  ;;  %v1889_v59 = vmul.f32 0.5, %v4354_v9  ;;  %4367 = vtanh.f32 %v1637_v48  ;;  %v1575_v48 = vmul.f32 0.5, %v1447_v13  ;;  %v1638_v13 = vmul.f32 0.5, %v1510_v49 }
 0x30c   : > { %v5830_v57 = vpop.f32.mrb[43].mxu0  ;;  %v5832_v15 = vpop.f32.mrb[43].mxu1  ;;  %v2016_v60 = vadd.f32 0.5, %v1888_v34  ;;  %4369 = vtanh.f32 %v1636_v53  ;;  %v2087_v17 = vmul.f32 %v5551_v56, %v1952_v16 }
 0x30d   : > { %v4356_v39 = vpop.eup %4355  ;;  %2229 = vadd.xlane.f32.xlu0 %v2085_v8  ;;  %v1574_v8 = vmul.f32 0.5, %v1446_v27  ;;  %v5851_v34 = vpop.permute.xlu1 %2621  ;;  %v2017_v27 = vadd.f32 0.5, %v1889_v59 }
 0x30e   : > { %v4358_v37 = vpop.eup %4357  ;;  %2231 = vadd.xlane.f32.xlu1 %v2086_v54  ;;  %v1511_v54 = vadd.f32 %v5674_v36, %v5694_v22  ;;  %7035 = vst [vmem:[#allocation80_spill] sm:$0xff] %v5851_v34  ;;  %v5853_v53 = vpop.permute.xlu0 %2625  ;;  %v1827_v63 = vmul.f32 0.5, %v4356_v39  ;;  %v2151_v36 = vmul.f32 %v5551_v56, %v2016_v60  ;;  %v1448_v34 = vadd.f32 %v5680_v20, %v5702_v3 }
 0x30f   : > { %v5838_v45 = vpop.f32.mrb[44].mxu0  ;;  %v5840_v5 = vpop.f32.mrb[44].mxu1  ;;  %v1826_v9 = vmul.f32 0.5, %v4358_v37  ;;  %7036 = vst [vmem:[#allocation81_spill] sm:$0xff] %v5853_v53  ;;  %v1449_v37 = vadd.f32 %v5696_v25, %v5680_v20  ;;  %4371 = vtanh.f32 %v1574_v8  ;;  %v2152_v8 = vmul.f32 %v5551_v56, %v2017_v27 }
 0x310   : > { %7033 = vst [vmem:[#allocation78_spill] sm:$0xff] %v5840_v5  ;;  %v5844_v30 = vpop.f32.mrb[45].mxu0  ;;  %v5846_v33 = vpop.f32.mrb[45].mxu1  ;;  %v2088_v5 = vmul.f32 %v5551_v56, %v1953_v61  ;;  %4373 = vtanh.f32 %v1575_v48  ;;  %v1639_v25 = vmul.f32 0.5, %v1511_v54  ;;  %v1513_v3 = vadd.f32 %v5698_v4, %v5694_v22 }
 0x311   : > { %7034 = vst [vmem:[#allocation79_spill] sm:$0xff] %v5846_v33  ;;  %v4360_v18 = vpop.eup %4359  ;;  %2357 = vadd.xlane.f32.xlu0 %v2149_v32  ;;  %v1954_v59 = vadd.f32 0.5, %v1826_v9  ;;  %v1577_v49 = vmul.f32 0.5, %v1449_v37  ;;  %4375 = vtanh.f32 %v1638_v13  ;;  %v1576_v9 = vmul.f32 0.5, %v1448_v34 }
 0x312   : > { %v4362_v42 = vpop.eup %4361  ;;  %2359 = vadd.xlane.f32.xlu1 %v2150_v43  ;;  %v1891_v33 = vmul.f32 0.5, %v4360_v18  ;;  %4377 = vtanh.f32 %v1639_v25  ;;  %v5885_v37 = vpop.permute.xlu0 %2633 }
 0x313   : > { %v5858_v32 = vpop.f32.mrb[46].mxu0  ;;  %v5860_v16 = vpop.f32.mrb[46].mxu1  ;;  %v1890_v61 = vmul.f32 0.5, %v4362_v42  ;;  %v2089_v4 = vmul.f32 %v5551_v56, %v1954_v59  ;;  %7043 = vst [vmem:[#allocation88_spill] sm:$0xff] %v5885_v37  ;;  %4379 = vtanh.f32 %v1577_v49  ;;  %v1450_v59 = vadd.f32 %v5680_v20, %v5718_v2 }
 0x314   : > { %7037 = vst [vmem:[#allocation82_spill] sm:$0xff] %v5858_v32  ;;  %7038 = vst [vmem:[#allocation83_spill] sm:$0xff] %v5860_v16  ;;  %v5865_v53 = vpop.f32.mrb[47].mxu0  ;;  %v5867_v39 = vpop.f32.mrb[47].mxu1  ;;  %v1955_v32 = vadd.f32 0.5, %v1827_v63  ;;  %v2019_v34 = vadd.f32 0.5, %v1891_v33  ;;  %4381 = vtanh.f32 %v1576_v9  ;;  %v1514_v2 = vadd.f32 %v5694_v22, %v5720_v19 }
 0x315   : > { %7039 = vst [vmem:[#allocation84_spill] sm:$0xff] %v5865_v53  ;;  %2233 = vadd.xlane.f32.xlu0 %v2087_v17  ;;  %v4364_v43 = vpop.eup %4363  ;;  %v1512_v17 = vadd.f32 %v5694_v22, %v5704_v41  ;;  %v2018_v54 = vadd.f32 0.5, %v1890_v61  ;;  %v5883_v63 = vpop.permute.xlu1 %2629 }
 0x316   : > { %2235 = vadd.xlane.f32.xlu1 %v2088_v5  ;;  %v4366_v60 = vpop.eup %4365  ;;  %v1828_v42 = vmul.f32 0.5, %v4364_v43  ;;  %7042 = vst [vmem:[#allocation87_spill] sm:$0xff] %v5883_v63  ;;  %v2090_v41 = vmul.f32 %v5551_v56, %v1955_v32  ;;  %v2154_v9 = vmul.f32 %v5551_v56, %v2019_v34 }
 0x317   : > { %v5872_v16 = vpop.f32.mrb[48].mxu0  ;;  %v5874_v53 = vpop.f32.mrb[48].mxu1  ;;  %v1829_v13 = vmul.f32 0.5, %v4366_v60  ;;  %v2153_v32 = vmul.f32 %v5551_v56, %v2018_v54  ;;  %v1578_v54 = vmul.f32 0.5, %v1450_v59 }
 0x318   : > { %7040 = vst [vmem:[#allocation85_spill] sm:$0xff] %v5874_v53  ;;  %v5878_v48 = vpop.f32.mrb[49].mxu0  ;;  %v5880_v18 = vpop.f32.mrb[49].mxu1  ;;  %v1641_v53 = vmul.f32 0.5, %v1513_v3  ;;  %v1956_v33 = vadd.f32 0.5, %v1828_v42 }
 0x319   : > { %7041 = vst [vmem:[#allocation86_spill] sm:$0xff] %v5880_v18  ;;  %v4368_v5 = vpop.eup %4367  ;;  %2361 = vadd.xlane.f32.xlu0 %v2151_v36  ;;  %v1640_v36 = vmul.f32 0.5, %v1512_v17  ;;  %v1957_v3 = vadd.f32 0.5, %v1829_v13 }
 0x31a   : > { %v4370_v27 = vpop.eup %4369  ;;  %2363 = vadd.xlane.f32.xlu1 %v2152_v8  ;;  %v1451_v8 = vadd.f32 %v5712_v23, %v5680_v20  ;;  %v1893_v37 = vmul.f32 0.5, %v4368_v5  ;;  %4383 = vtanh.f32 %v1641_v53  ;;  %v1515_v23 = vadd.f32 %v5714_v21, %v5694_v22 }
 0x31b   : > { %v5888_v18 = vpop.f32.mrb[50].mxu0  ;;  %v5890_v61 = vpop.f32.mrb[50].mxu1  ;;  %v1892_v60 = vmul.f32 0.5, %v4370_v27  ;;  %4385 = vtanh.f32 %v1640_v36  ;;  %v2091_v53 = vmul.f32 %v5551_v56, %v1956_v33  ;;  %v2092_v21 = vmul.f32 %v5551_v56, %v1957_v3 }
 0x31c   : > { %v5894_v25 = vpop.f32.mrb[51].mxu0  ;;  %v5896_v43 = vpop.f32.mrb[51].mxu1  ;;  %v1579_v13 = vmul.f32 0.5, %v1451_v8  ;;  %v2021_v36 = vadd.f32 0.5, %v1893_v37  ;;  %4387 = vtanh.f32 %v1578_v54  ;;  %v1453_v37 = vadd.f32 %v5730_v12, %v5680_v20  ;;  %v5935_v54 = vld [vmem:[#allocation12] ss:$0 sm:$0xff] }
 0x31d   : > { %2237 = vadd.xlane.f32.xlu0 %v2089_v4  ;;  %v4372_v49 = vpop.eup %4371  ;;  %v2020_v27 = vadd.f32 0.5, %v1892_v60  ;;  %v1642_v60 = vmul.f32 0.5, %v1514_v2 }
 0x31e   : > { %2239 = vadd.xlane.f32.xlu1 %v2090_v41  ;;  %v4374_v17 = vpop.eup %4373  ;;  %v1830_v34 = vmul.f32 0.5, %v4372_v49  ;;  %v5915_v41 = vpop.permute.xlu1 %2637  ;;  %v1643_v49 = vmul.f32 0.5, %v1515_v23  ;;  %4389 = vtanh.f32 %v1579_v13  ;;  %v2156_v23 = vmul.f32 %v5935_v54, %v2021_v36 }
 0x31f   : > { %v5904_v63 = vpop.f32.mrb[52].mxu0  ;;  %v5906_v42 = vpop.f32.mrb[52].mxu1  ;;  %7047 = vst [vmem:[#allocation92_spill] sm:$0xff] %v5915_v41  ;;  %v1831_v59 = vmul.f32 0.5, %v4374_v17  ;;  %4391 = vtanh.f32 %v1642_v60 }
 0x320   : > { %7044 = vst [vmem:[#allocation89_spill] sm:$0xff] %v5904_v63  ;;  %7045 = vst [vmem:[#allocation90_spill] sm:$0xff] %v5906_v42  ;;  %v5910_v4 = vpop.f32.mrb[53].mxu0  ;;  %v5912_v5 = vpop.f32.mrb[53].mxu1  ;;  %v1378_v42 = vcombine.high %v5510_v28, %v5510_v28  ;;  %v1958_v28 = vadd.f32 0.5, %v1830_v34  ;;  %v1517_v34 = vadd.f32 %v5732_v58, %v5694_v22  ;;  %4393 = vtanh.f32 %v1643_v49 }
 0x321   : > { %7046 = vst [vmem:[#allocation91_spill] sm:$0xff] %v5912_v5  ;;  %2365 = vadd.xlane.f32.xlu0 %v2153_v32  ;;  %v4376_v19 = vpop.eup %4375  ;;  %v5917_v63 = vpop.permute.xlu0 %2641  ;;  %v1452_v32 = vadd.f32 %v5680_v20, %v5736_v38  ;;  %v2155_v38 = vmul.f32 %v5551_v56, %v2020_v27  ;;  %v1959_v41 = vadd.f32 0.5, %v1831_v59 }
 0x322   : > { %7048 = vst [vmem:[#allocation93_spill] sm:$0xff] %v5917_v63  ;;  %2367 = vadd.xlane.f32.xlu1 %v2154_v9  ;;  %v4378_v5 = vpop.eup %4377  ;;  %v1894_v63 = vmul.f32 0.5, %v4376_v19  ;;  %v5939_v12 = vrot.slane %v1378_v42, %v5260_v50  ;;  %v2093_v58 = vmul.f32 %v5935_v54, %v1958_v28  ;;  %v5956_v60 = vpop.permute.xlu1 %2645 }
 0x323   : > { %v5924_v33 = vpop.f32.mrb[54].mxu0  ;;  %v5926_v8 = vpop.f32.mrb[54].mxu1  ;;  %v1580_v20 = vmul.f32 0.5, %v1452_v32  ;;  %7051 = vst [vmem:[#allocation96_spill] sm:$0xff] %v5956_v60 }
 0x324   : > { %7049 = vst [vmem:[#allocation94_spill] sm:$0xff] %v5924_v33  ;;  %v5930_v9 = vpop.f32.mrb[55].mxu0  ;;  %v5932_v3 = vpop.f32.mrb[55].mxu1  ;;  %v1895_v33 = vmul.f32 0.5, %v4378_v5  ;;  %v1516_v5 = vadd.f32 %v5694_v22, %v5738_v1  ;;  %v2022_v36 = vadd.f32 0.5, %v1894_v63  ;;  %v2094_v22 = vmul.f32 %v5935_v54, %v1959_v41 }
 0x325   : > { %v4380_v17 = vpop.eup %4379  ;;  %2241 = vadd.xlane.f32.xlu0 %v2091_v53  ;;  %v1379_v53 = vcombine.high %v5514_v29, %v5514_v29  ;;  %v5958_v32 = vpop.permute.xlu0 %2649  ;;  %4395 = vtanh.f32 %v1580_v20  ;;  %v1645_v1 = vmul.f32 0.5, %v1517_v34  ;;  %v1455_v63 = vadd.f32 %v5744_v11, %v5939_v12 }
 0x326   : > { %v4382_v2 = vpop.eup %4381  ;;  %2243 = vadd.xlane.f32.xlu1 %v2092_v21  ;;  %v1581_v21 = vmul.f32 0.5, %v1453_v37  ;;  %7052 = vst [vmem:[#allocation97_spill] sm:$0xff] %v5958_v32  ;;  %v2023_v49 = vadd.f32 0.5, %v1895_v33  ;;  %v1454_v33 = vadd.f32 %v5939_v12, %v5748_v26  ;;  %v2157_v11 = vmul.f32 %v5935_v54, %v2022_v36 }
 0x327   : > { %v5945_v56 = vpop.f32.mrb[56].mxu0  ;;  %v5947_v27 = vpop.f32.mrb[56].mxu1  ;;  %v1832_v59 = vmul.f32 0.5, %v4382_v2  ;;  %v1644_v2 = vmul.f32 0.5, %v1516_v5 }
 0x328   : > { %7050 = vst [vmem:[#allocation95_spill] sm:$0xff] %v5947_v27  ;;  %v5951_v13 = vpop.f32.mrb[57].mxu0  ;;  %v5953_v42 = vpop.f32.mrb[57].mxu1  ;;  %v1833_v27 = vmul.f32 0.5, %v4380_v17  ;;  %4397 = vtanh.f32 %v1581_v21  ;;  %v2158_v60 = vmul.f32 %v5935_v54, %v2023_v49 }
 0x329   : > { %v4384_v19 = vpop.eup %4383  ;;  %2369 = vadd.xlane.f32.xlu0 %v2155_v38  ;;  %v5964_v38 = vrot.slane %v1379_v53, %v5260_v50  ;;  %v1960_v41 = vadd.f32 0.5, %v1832_v59  ;;  %4399 = vtanh.f32 %v1645_v1  ;;  %v5991_v1 = vpop.permute.xlu1 %2653 }
 0x32a   : > { %v4386_v29 = vpop.eup %4385  ;;  %2371 = vadd.xlane.f32.xlu1 %v2156_v23  ;;  %v1961_v53 = vadd.f32 0.5, %v1833_v27  ;;  %v1897_v32 = vmul.f32 0.5, %v4384_v19  ;;  %4401 = vtanh.f32 %v1644_v2  ;;  %7057 = vst [vmem:[#allocation102_spill] sm:$0xff] %v5991_v1 }
 0x32b   : > { %v5966_v28 = vpop.f32.mrb[58].mxu0  ;;  %v5968_v37 = vpop.f32.mrb[58].mxu1  ;;  %v1896_v20 = vmul.f32 0.5, %v4386_v29  ;;  %v1518_v26 = vadd.f32 %v5964_v38, %v5750_v31  ;;  %v2095_v49 = vmul.f32 %v5935_v54, %v1960_v41 }
 0x32c   : > { %7053 = vst [vmem:[#allocation98_spill] sm:$0xff] %v5966_v28  ;;  %7054 = vst [vmem:[#allocation99_spill] sm:$0xff] %v5968_v37  ;;  %v5972_v17 = vpop.f32.mrb[59].mxu0  ;;  %v5974_v23 = vpop.f32.mrb[59].mxu1  ;;  %v1583_v37 = vmul.f32 0.5, %v1455_v63  ;;  %v2025_v2 = vadd.f32 0.5, %v1897_v32 }
 0x32d   : > { %2245 = vadd.xlane.f32.xlu0 %v2093_v58  ;;  %v4388_v34 = vpop.eup %4387  ;;  %v1582_v58 = vmul.f32 0.5, %v1454_v33  ;;  %v2024_v19 = vadd.f32 0.5, %v1896_v20  ;;  %v5993_v63 = vpop.permute.xlu0 %2660 }
 0x32e   : > { %2247 = vadd.xlane.f32.xlu1 %v2094_v22  ;;  %v4390_v5 = vpop.eup %4389  ;;  %v1834_v29 = vmul.f32 0.5, %v4388_v34  ;;  %v1519_v22 = vadd.f32 %v5746_v10, %v5964_v38  ;;  %7058 = vst [vmem:[#allocation103_spill] sm:$0xff] %v5993_v63  ;;  %4403 = vtanh.f32 %v1583_v37  ;;  %v1456_v10 = vadd.f32 %v5939_v12, %v5768_v40 }
 0x32f   : > { %v5980_v28 = vpop.f32.mrb[60].mxu0  ;;  %v5982_v59 = vpop.f32.mrb[60].mxu1  ;;  %v1835_v33 = vmul.f32 0.5, %v4390_v5  ;;  %4405 = vtanh.f32 %v1582_v58  ;;  %v1457_v37 = vadd.f32 %v5762_v47, %v5939_v12  ;;  %v2160_v58 = vmul.f32 %v5935_v54, %v2025_v2 }
 0x330   : > { %7055 = vst [vmem:[#allocation100_spill] sm:$0xff] %v5982_v59  ;;  %v5984_v21 = vpop.f32.mrb[61].mxu0  ;;  %v5986_v36 = vpop.f32.mrb[61].mxu1  ;;  %v2096_v59 = vmul.f32 %v5935_v54, %v1961_v53  ;;  %v1962_v63 = vadd.f32 0.5, %v1834_v29  ;;  %v1647_v32 = vmul.f32 0.5, %v1519_v22 }
 0x331   : > { %7056 = vst [vmem:[#allocation101_spill] sm:$0xff] %v5986_v36  ;;  %v4392_v27 = vpop.eup %4391  ;;  %2373 = vadd.xlane.f32.xlu0 %v2157_v11  ;;  %v1646_v36 = vmul.f32 0.5, %v1518_v26  ;;  %v1963_v5 = vadd.f32 0.5, %v1835_v33  ;;  %v6010_v40 = vpop.permute.xlu0 %2668 }
 0x332   : > { %v4394_v31 = vpop.eup %4393  ;;  %2375 = vadd.xlane.f32.xlu1 %v2158_v60  ;;  %v1898_v41 = vmul.f32 0.5, %v4392_v27  ;;  %v2159_v60 = vmul.f32 %v5935_v54, %v2024_v19  ;;  %v1520_v19 = vadd.f32 %v5964_v38, %v5770_v52  ;;  %v2097_v47 = vmul.f32 %v5935_v54, %v1962_v63 }
 0x333   : > { %v5996_v20 = vpop.f32.mrb[62].mxu0  ;;  %v5998_v11 = vpop.f32.mrb[62].mxu1  ;;  %v1899_v26 = vmul.f32 0.5, %v4394_v31  ;;  %4407 = vtanh.f32 %v1646_v36  ;;  %v1521_v31 = vadd.f32 %v5764_v44, %v5964_v38  ;;  %v1458_v52 = vadd.f32 %v5939_v12, %v5782_v62 }
 0x334   : > { %7059 = vst [vmem:[#allocation104_spill] sm:$0xff] %v5996_v20  ;;  %7060 = vst [vmem:[#allocation105_spill] sm:$0xff] %v5998_v11  ;;  %v6002_v34 = vpop.f32.mrb[63].mxu0  ;;  %v4396_v1 = vpop.eup %4395  ;;  %v2026_v11 = vadd.f32 0.5, %v1898_v41  ;;  %4409 = vtanh.f32 %v1647_v32  ;;  %v1459_v44 = vadd.f32 %v5776_v6, %v5939_v12  ;;  %v1522_v6 = vadd.f32 %v5964_v38, %v5784_v55 }
 0x335   : > { %2249 = vadd.xlane.f32.xlu0 %v2095_v49  ;;  %v6007_v53 = vpop.f32.mrb[63].mxu1  ;;  %v4398_v27 = vpop.eup %4397  ;;  %v1836_v29 = vmul.f32 0.5, %v4396_v1  ;;  %v1584_v49 = vmul.f32 0.5, %v1456_v10  ;;  %v2027_v2 = vadd.f32 0.5, %v1899_v26  ;;  %v2098_v1 = vmul.f32 %v5935_v54, %v1963_v5 }
 0x336   : > { %2251 = vadd.xlane.f32.xlu1 %v2096_v59  ;;  %v4400_v22 = vpop.eup %4399  ;;  %v6014_v20 = vpop.permute.xlu1 %2664  ;;  %v1585_v59 = vmul.f32 0.5, %v1457_v37  ;;  %v1837_v33 = vmul.f32 0.5, %v4398_v27  ;;  %v2161_v10 = vmul.f32 %v5935_v54, %v2026_v11  ;;  %v1649_v37 = vmul.f32 0.5, %v1521_v31 }
 0x337   : > { %v4402_v36 = vpop.eup %4401  ;;  %v1964_v41 = vadd.f32 0.5, %v1836_v29  ;;  %4411 = vtanh.f32 %v1584_v49  ;;  %v1901_v27 = vmul.f32 0.5, %v4400_v22  ;;  %v2162_v62 = vmul.f32 %v5935_v54, %v2027_v2 }
 0x338   : > { %v4404_v32 = vpop.eup %4403  ;;  %v1900_v63 = vmul.f32 0.5, %v4402_v36  ;;  %4413 = vtanh.f32 %v1585_v59  ;;  %v1965_v5 = vadd.f32 0.5, %v1837_v33  ;;  %v1586_v11 = vmul.f32 0.5, %v1458_v52 }
 0x339   : > { %2377 = vadd.xlane.f32.xlu0 %v2159_v60  ;;  %v1648_v60 = vmul.f32 0.5, %v1520_v19  ;;  %v4406_v26 = vpop.eup %4405  ;;  %v1523_v49 = vadd.f32 %v5778_v51, %v5964_v38  ;;  %v1839_v19 = vmul.f32 0.5, %v4404_v32  ;;  %v1587_v22 = vmul.f32 0.5, %v1459_v44 }
 0x33a   : > { %2379 = vadd.xlane.f32.xlu1 %v2160_v58  ;;  %v6025_v58 = vpop.permute.xlu0 %2676  ;;  %v6028_v29 = vpop.permute.xlu1 %2672  ;;  %v2028_v31 = vadd.f32 0.5, %v1900_v63  ;;  %v1838_v36 = vmul.f32 0.5, %v4406_v26  ;;  %v2029_v2 = vadd.f32 0.5, %v1901_v27  ;;  %v2100_v33 = vmul.f32 %v5935_v54, %v1965_v5 }
 0x33b   : > { %4415 = vtanh.f32 %v1648_v60  ;;  %v1461_v51 = vadd.f32 %v5792_v7, %v5939_v12  ;;  %v1651_v52 = vmul.f32 0.5, %v1523_v49  ;;  %v1650_v32 = vmul.f32 0.5, %v1522_v6 }
 0x33c   : > { %4417 = vtanh.f32 %v1649_v37  ;;  %v1967_v63 = vadd.f32 0.5, %v1839_v19  ;;  %v1966_v37 = vadd.f32 0.5, %v1838_v36  ;;  %v2163_v44 = vmul.f32 %v5935_v54, %v2028_v31  ;;  %v7061_v31 = vld [vmem:[#allocation72_spill] sm:$0xff] }
 0x33d   : > { %2253 = vadd.xlane.f32.xlu0 %v2097_v47  ;;  %v2099_v47 = vmul.f32 %v5935_v54, %v1964_v41  ;;  %v4408_v59 = vpop.eup %4407  ;;  %4419 = vtanh.f32 %v1586_v11  ;;  %v1460_v41 = vadd.f32 %v5939_v12, %v5798_v35  ;;  %v2164_v5 = vmul.f32 %v5935_v54, %v2029_v2 }
 0x33e   : > { %2255 = vadd.xlane.f32.xlu1 %v2098_v1  ;;  %v4410_v1 = vpop.eup %4409  ;;  %v6040_v55 = vpop.permute.xlu0 %2684  ;;  %v1902_v60 = vmul.f32 0.5, %v4408_v59  ;;  %4421 = vtanh.f32 %v1587_v22  ;;  %v1589_v27 = vmul.f32 0.5, %v1461_v51  ;;  %v1525_v35 = vadd.f32 %v5794_v24, %v5964_v38 }
 0x33f   : > { %v1903_v7 = vmul.f32 0.5, %v4410_v1  ;;  %4423 = vtanh.f32 %v1651_v52  ;;  %v1588_v11 = vmul.f32 0.5, %v1460_v41  ;;  %v1524_v49 = vadd.f32 %v5964_v38, %v5800_v0  ;;  %v7063_v41 = vld [vmem:[#allocation74_spill] sm:$0xff] }
 0x340   : > { %v2030_v19 = vadd.f32 0.5, %v1902_v60  ;;  %4425 = vtanh.f32 %v1650_v32  ;;  %v2102_v6 = vmul.f32 %v5935_v54, %v1967_v63  ;;  %v2101_v59 = vmul.f32 %v5935_v54, %v1966_v37  ;;  %v7064_v63 = vld [vmem:[#allocation73_spill] sm:$0xff] }
 0x341   : > { %2381 = vadd.xlane.f32.xlu0 %v2161_v10  ;;  %v6042_v10 = vpop.permute.xlu1 %2680  ;;  %v4412_v26 = vpop.eup %4411  ;;  %v1463_v36 = vadd.f32 %v7061_v31, %v5939_v12  ;;  %v2031_v24 = vadd.f32 0.5, %v1903_v7  ;;  %4427 = vtanh.f32 %v1589_v27  ;;  %v1653_v51 = vmul.f32 0.5, %v1525_v35  ;;  %v7065_v27 = vld [vmem:[#allocation75_spill] sm:$0xff] }
 0x342   : > { %2383 = vadd.xlane.f32.xlu1 %v2162_v62  ;;  %v4414_v62 = vpop.eup %4413  ;;  %v6054_v2 = vpop.permute.xlu0 %2692  ;;  %4429 = vtanh.f32 %v1588_v11  ;;  %v1652_v52 = vmul.f32 0.5, %v1524_v49  ;;  %v1462_v60 = vadd.f32 %v5939_v12, %v7063_v41  ;;  %v2165_v32 = vmul.f32 %v5935_v54, %v2030_v19 }
 0x343   : > { %7062 = vst [vmem:[#allocation72_spill] sm:$0xff] %v6054_v2  ;;  %v1527_v37 = vadd.f32 %v7064_v63, %v5964_v38  ;;  %v1526_v35 = vadd.f32 %v5964_v38, %v7065_v27  ;;  %v2166_v11 = vmul.f32 %v5935_v54, %v2031_v24  ;;  %4431 = vtanh.f32 %v1653_v51 }
 0x344   : > { %4433 = vtanh.f32 %v1652_v52  ;;  %v1590_v19 = vmul.f32 0.5, %v1462_v60  ;;  %v1465_v52 = vadd.f32 %v5824_v14, %v5939_v12  ;;  %v1529_v14 = vadd.f32 %v5826_v46, %v5964_v38 }
 0x345   : > { %2257 = vadd.xlane.f32.xlu0 %v2099_v47  ;;  %v1840_v47 = vmul.f32 0.5, %v4412_v26  ;;  %v4416_v22 = vpop.eup %4415  ;;  %v6056_v1 = vpop.permute.xlu1 %2688  ;;  %v1655_v2 = vmul.f32 0.5, %v1527_v37 }
 0x346   : > { %2259 = vadd.xlane.f32.xlu1 %v2100_v33  ;;  %v1841_v33 = vmul.f32 0.5, %v4414_v62  ;;  %v4418_v0 = vpop.eup %4417  ;;  %v1904_v7 = vmul.f32 0.5, %v4416_v22  ;;  %v6066_v41 = vpop.permute.xlu0 %2700 }
 0x347   : > { %v1968_v26 = vadd.f32 0.5, %v1840_v47  ;;  %v1905_v31 = vmul.f32 0.5, %v4418_v0 }
 0x348   : > { %v1969_v62 = vadd.f32 0.5, %v1841_v33  ;;  %v1654_v33 = vmul.f32 0.5, %v1526_v35 }
 0x349   : > { %2385 = vadd.xlane.f32.xlu0 %v2163_v44  ;;  %v4420_v44 = vpop.eup %4419  ;;  %v6068_v22 = vpop.permute.xlu1 %2696  ;;  %v2033_v0 = vadd.f32 0.5, %v1905_v31  ;;  %v1593_v31 = vmul.f32 0.5, %v1465_v52 }
 0x34a   : > { %2387 = vadd.xlane.f32.xlu1 %v2164_v5  ;;  %v1591_v5 = vmul.f32 0.5, %v1463_v36  ;;  %v4422_v49 = vpop.eup %4421  ;;  %v1842_v63 = vmul.f32 0.5, %v4420_v44  ;;  %v2103_v36 = vmul.f32 %v5935_v54, %v1968_v26  ;;  %v2104_v51 = vmul.f32 %v5935_v54, %v1969_v62  ;;  %v6077_v27 = vpop.permute.xlu0 %2708 }
 0x34b   : > { %v4424_v47 = vpop.eup %4423  ;;  %v1843_v24 = vmul.f32 0.5, %v4422_v49  ;;  %7066 = vst [vmem:[#allocation74_spill] sm:$0xff] %v6077_v27  ;;  %v2168_v62 = vmul.f32 %v5935_v54, %v2033_v0  ;;  %v1657_v0 = vmul.f32 0.5, %v1529_v14 }
 0x34c   : > { %4435 = vtanh.f32 %v1591_v5  ;;  %v1970_v37 = vadd.f32 0.5, %v1842_v63  ;;  %v1907_v26 = vmul.f32 0.5, %v4424_v47 }
 0x34d   : > { %2261 = vadd.xlane.f32.xlu0 %v2101_v59  ;;  %v2032_v59 = vadd.f32 0.5, %v1904_v7  ;;  %4437 = vtanh.f32 %v1590_v19  ;;  %v1971_v35 = vadd.f32 0.5, %v1843_v24  ;;  %v1467_v24 = vadd.f32 %v5838_v45, %v5939_v12 }
 0x34e   : > { %2263 = vadd.xlane.f32.xlu1 %v2102_v6  ;;  %v4426_v6 = vpop.eup %4425  ;;  %4439 = vtanh.f32 %v1655_v2  ;;  %v6082_v2 = vpop.permute.xlu1 %2704 }
 0x34f   : > { %v4428_v60 = vpop.eup %4427  ;;  %v1906_v7 = vmul.f32 0.5, %v4426_v6  ;;  %v2167_v5 = vmul.f32 %v5935_v54, %v2032_v59  ;;  %4441 = vtanh.f32 %v1654_v33  ;;  %7067 = vst [vmem:[#allocation73_spill] sm:$0xff] %v6082_v2  ;;  %v2035_v59 = vadd.f32 0.5, %v1907_v26 }
 0x350   : > { %v4430_v44 = vpop.eup %4429  ;;  %v1845_v49 = vmul.f32 0.5, %v4428_v60  ;;  %v2105_v33 = vmul.f32 %v5935_v54, %v1970_v37  ;;  %v2106_v46 = vmul.f32 %v5935_v54, %v1971_v35  ;;  %4443 = vtanh.f32 %v1593_v31 }
 0x351   : > { %2389 = vadd.xlane.f32.xlu0 %v2165_v32  ;;  %v1464_v32 = vadd.f32 %v5939_v12, %v5830_v57  ;;  %v1528_v57 = vadd.f32 %v5964_v38, %v5832_v15  ;;  %v1844_v19 = vmul.f32 0.5, %v4430_v44  ;;  %v1466_v15 = vadd.f32 %v5939_v12, %v5844_v30 }
 0x352   : > { %2391 = vadd.xlane.f32.xlu1 %v2166_v11  ;;  %v4432_v11 = vpop.eup %4431  ;;  %v1973_v44 = vadd.f32 0.5, %v1845_v49  ;;  %v1595_v31 = vmul.f32 0.5, %v1467_v24  ;;  %v4533_v24 = vld [vmem:[%s5238_s24] sm:$0xff] }
 0x353   : > { %v1592_v63 = vmul.f32 0.5, %v1464_v32  ;;  %v4434_v47 = vpop.eup %4433  ;;  %v1909_v52 = vmul.f32 0.5, %v4432_v11  ;;  %v1656_v32 = vmul.f32 0.5, %v1528_v57  ;;  %v1972_v26 = vadd.f32 0.5, %v1844_v19 }
 0x354   : > { %v1908_v37 = vmul.f32 0.5, %v4434_v47  ;;  %v1594_v57 = vmul.f32 0.5, %v1466_v15 }
 0x355   : > { %2265 = vadd.xlane.f32.xlu0 %v2103_v36  ;;  %v2034_v36 = vadd.f32 0.5, %v1906_v7  ;;  %4445 = vtanh.f32 %v1592_v63  ;;  %v2037_v19 = vadd.f32 0.5, %v1909_v52  ;;  %v7070_v63 = vld [vmem:[#allocation35_spill] sm:$0xff]  ;;  %v7072_v52 = vld [vmem:[#allocation78_spill] sm:$0xff] }
 0x356   : > { %2267 = vadd.xlane.f32.xlu1 %v2104_v51  ;;  %v4436_v51 = vpop.eup %4435  ;;  %4447 = vtanh.f32 %v1657_v0  ;;  %v4532_v0 = vld [vmem:[%s5238_s24 + $0x8] sm:$0xff] }
 0x357   : > { %v4438_v7 = vpop.eup %4437  ;;  %v2169_v45 = vmul.f32 %v5935_v54, %v2034_v36  ;;  %v1847_v30 = vmul.f32 0.5, %v4436_v51  ;;  %4449 = vtanh.f32 %v1656_v32  ;;  %v2108_v51 = vmul.f32 %v5935_v54, %v1973_v44 }
 0x358   : > { %v4440_v14 = vpop.eup %4439  ;;  %v1846_v36 = vmul.f32 0.5, %v4438_v7  ;;  %4451 = vtanh.f32 %v1594_v57  ;;  %v2172_v57 = vmul.f32 %v5935_v54, %v2037_v19  ;;  %v1532_v19 = vadd.f32 %v5964_v38, %v5867_v39 }
 0x359   : > { %2393 = vadd.xlane.f32.xlu0 %v2167_v5  ;;  %v7069_v5 = vld [vmem:[#allocation33_spill] sm:$0xff]  ;;  %v4442_v49 = vpop.eup %4441  ;;  %4453 = vtanh.f32 %v1595_v31 }
 0x35a   : > { %2395 = vadd.xlane.f32.xlu1 %v2168_v62  ;;  %v2200_v6 = vpop.xlane.xlu0 %2199  ;;  %v2170_v62 = vmul.f32 %v5935_v54, %v2035_v59  ;;  %v1910_v32 = vmul.f32 0.5, %v4442_v49 }
 0x35b   : > { %v6092_v60 = vpop.xlane.xlu1 %2327  ;;  %v2991_v35 = vmul.f32 %v7069_v5, %v2200_v6  ;;  %v2036_v6 = vadd.f32 0.5, %v1908_v37  ;;  %v1911_v5 = vmul.f32 0.5, %v4440_v14  ;;  %v7074_v37 = vld [vmem:[#allocation82_spill] sm:$0xff] }
 0x35c   : > { %7068 = vst [vmem:[#allocation75_spill] sm:$0xff] %v6092_v60  ;;  %v1469_v44 = vadd.f32 %v7074_v37, %v5939_v12  ;;  %v7079_v37 = vld [vmem:[#allocation83_spill] sm:$0xff] }
 0x35d   : > { %2269 = vadd.xlane.f32.xlu0 %v2105_v33  ;;  %v7071_v33 = vld [vmem:[#allocation79_spill] sm:$0xff]  ;;  %v3120_v27 = vmul.f32 %v4532_v0, %v2991_v35  ;;  %v7076_v35 = vld [vmem:[#allocation84_spill] sm:$0xff]  ;;  %v1974_v0 = vadd.f32 0.5, %v1846_v36  ;;  %v2171_v49 = vmul.f32 %v5935_v54, %v2036_v6  ;;  %v1533_v36 = vadd.f32 %v7079_v37, %v5964_v38 }
 0x35e   : > { %2271 = vadd.xlane.f32.xlu1 %v2106_v46  ;;  %v2198_v11 = vpop.xlane.xlu0 %2197  ;;  %v1530_v59 = vadd.f32 %v5964_v38, %v7071_v33  ;;  %v2107_v46 = vmul.f32 %v5935_v54, %v1972_v26 }
 0x35f   : > { %v2990_v47 = vmul.f32 %v7070_v63, %v2198_v11  ;;  %v2204_v60 = vpop.xlane.xlu1 %2203  ;;  %v1531_v11 = vadd.f32 %v7072_v52, %v5964_v38  ;;  %v1975_v63 = vadd.f32 0.5, %v1847_v30  ;;  %v4444_v30 = vpop.eup %4443  ;;  %v1597_v52 = vmul.f32 0.5, %v1469_v44  ;;  %v7082_v44 = vld [vmem:[#allocation63_spill] sm:$0xff]  ;;  %v4534_v38 = vld [vmem:[%s5238_s24 + $0x10] sm:$0xff] }
 0x360   : > { %v1658_v14 = vmul.f32 0.5, %v1530_v59 }
 0x361   : > { %v3119_v15 = vmul.f32 %v4533_v24, %v2990_v47  ;;  %2397 = vadd.xlane.f32.xlu0 %v2169_v45  ;;  %v1468_v47 = vadd.f32 %v5939_v12, %v7076_v35  ;;  %v7077_v45 = vld [vmem:[#allocation62_spill] sm:$0xff]  ;;  %v1659_v24 = vmul.f32 0.5, %v1531_v11  ;;  %v2110_v12 = vmul.f32 %v5935_v54, %v1975_v63 }
 0x362   : > { %2399 = vadd.xlane.f32.xlu1 %v2170_v62  ;;  %v6106_v2 = vpop.xlane.xlu0 %2325  ;;  %v1380_v33 = vcombine.high %v7077_v45, %v7077_v45  ;;  %v2039_v62 = vadd.f32 0.5, %v1911_v5  ;;  %4455 = vtanh.f32 %v1658_v14  ;;  %v2109_v63 = vmul.f32 %v5935_v54, %v1974_v0 }
 0x363   : > { %7073 = vst [vmem:[#allocation33_spill] sm:$0xff] %v6106_v2  ;;  %v3247_v7 = vadd.f32 %v3120_v27, %v3119_v15  ;;  %v6110_v26 = vpop.xlane.xlu1 %2331  ;;  %v4446_v27 = vpop.eup %4445  ;;  %v2038_v15 = vadd.f32 0.5, %v1910_v32  ;;  %v7081_v32 = vld [vmem:[#allocation34_spill] sm:$0xff]  ;;  %v1381_v45 = vcombine.high %v7082_v44, %v7082_v44  ;;  %4457 = vtanh.f32 %v1659_v24 }
 0x364   : > { %7075 = vst [vmem:[#allocation35_spill] sm:$0xff] %v6110_v26  ;;  %v6126_v6 = vrot.slane %v1380_v33, %v5260_v50  ;;  %v4448_v5 = vpop.eup %4447  ;;  %v1849_v26 = vmul.f32 0.5, %v4444_v30  ;;  %v1848_v14 = vmul.f32 0.5, %v4446_v27  ;;  %v2174_v39 = vmul.f32 %v5935_v54, %v2039_v62  ;;  %v4535_v27 = vld [vmem:[%s5238_s24 + $0x18] sm:$0xff] }
 0x365   : > { %2273 = vadd.xlane.f32.xlu0 %v2107_v46  ;;  %v1596_v46 = vmul.f32 0.5, %v1468_v47  ;;  %v4450_v37 = vpop.eup %4449  ;;  %4459 = vtanh.f32 %v1597_v52  ;;  %v1661_v0 = vmul.f32 0.5, %v1533_v36  ;;  %v1660_v30 = vmul.f32 0.5, %v1532_v19  ;;  %v4536_v36 = vld [vmem:[%s5238_s24 + $0x20] sm:$0xff] }
 0x366   : > { %2275 = vadd.xlane.f32.xlu1 %v2108_v51  ;;  %v6118_v59 = vpop.xlane.xlu0 %2329  ;;  %v7080_v51 = vld [vmem:[#allocation36_spill] sm:$0xff]  ;;  %v4452_v24 = vpop.eup %4451  ;;  %v6142_v52 = vrot.slane %v1381_v45, %v5260_v50 }
 0x367   : > { %7078 = vst [vmem:[#allocation79_spill] sm:$0xff] %v6118_v59  ;;  %v2202_v31 = vpop.xlane.xlu1 %2201  ;;  %v2993_v11 = vmul.f32 %v7080_v51, %v2204_v60  ;;  %v2173_v60 = vmul.f32 %v5935_v54, %v2038_v15  ;;  %v7083_v51 = vld [vmem:[#allocation37_spill] sm:$0xff]  ;;  %4461 = vtanh.f32 %v1596_v46  ;;  %v1912_v15 = vmul.f32 0.5, %v4450_v37  ;;  %v4454_v19 = vpop.eup %4453  ;;  %v4537_v45 = vld [vmem:[%s5238_s24 + $0x28] sm:$0xff] }
 0x368   : > { %v2992_v35 = vmul.f32 %v7081_v32, %v2202_v31  ;;  %v1471_v46 = vadd.f32 %v5872_v16, %v6126_v6  ;;  %4463 = vtanh.f32 %v1661_v0 }
 0x369   : > { %2401 = vadd.xlane.f32.xlu0 %v2171_v49  ;;  %v1470_v49 = vadd.f32 %v6126_v6, %v5878_v48  ;;  %v3122_v62 = vmul.f32 %v4535_v27, %v2993_v11  ;;  %v1977_v48 = vadd.f32 0.5, %v1849_v26  ;;  %v1850_v11 = vmul.f32 0.5, %v4452_v24 }
 0x36a   : > { %v3121_v47 = vmul.f32 %v4534_v38, %v2992_v35  ;;  %2403 = vadd.xlane.f32.xlu1 %v2172_v57  ;;  %v2206_v33 = vpop.xlane.xlu0 %2205  ;;  %v7084_v35 = vld [vmem:[#allocation38_spill] sm:$0xff]  ;;  %v1976_v38 = vadd.f32 0.5, %v1848_v14  ;;  %4465 = vtanh.f32 %v1660_v30  ;;  %v1851_v27 = vmul.f32 0.5, %v4454_v19  ;;  %v7090_v19 = vld [vmem:[#allocation40_spill] sm:$0xff] }
 0x36b   : > { %v2208_v31 = vpop.xlane.xlu1 %2207  ;;  %v2994_v32 = vmul.f32 %v7083_v51, %v2206_v33  ;;  %v1913_v33 = vmul.f32 0.5, %v4448_v5  ;;  %v7088_v5 = vld [vmem:[#allocation85_spill] sm:$0xff] }
 0x36c   : > { %v3248_v44 = vadd.f32 %v3247_v7, %v3121_v47  ;;  %v2995_v57 = vmul.f32 %v7084_v35, %v2208_v31  ;;  %v1598_v47 = vmul.f32 0.5, %v1470_v49  ;;  %v4456_v16 = vpop.eup %4455  ;;  %v2111_v26 = vmul.f32 %v5935_v54, %v1976_v38 }
 0x36d   : > { %v3123_v59 = vmul.f32 %v4536_v36, %v2994_v32  ;;  %2277 = vadd.xlane.f32.xlu0 %v2109_v63  ;;  %v7087_v63 = vld [vmem:[#allocation86_spill] sm:$0xff]  ;;  %v2040_v32 = vadd.f32 0.5, %v1912_v15  ;;  %v1535_v0 = vadd.f32 %v7088_v5, %v6142_v52  ;;  %v2041_v24 = vadd.f32 0.5, %v1913_v33  ;;  %v4458_v49 = vpop.eup %4457 }
 0x36e   : > { %v3249_v51 = vadd.f32 %v3248_v44, %v3122_v62  ;;  %2279 = vadd.xlane.f32.xlu1 %v2110_v12  ;;  %v6147_v7 = vpop.xlane.xlu0 %2333  ;;  %v3124_v37 = vmul.f32 %v4537_v45, %v2995_v57  ;;  %v1534_v31 = vadd.f32 %v6142_v52, %v7087_v63  ;;  %v1599_v12 = vmul.f32 0.5, %v1471_v46  ;;  %v7089_v57 = vld [vmem:[#allocation39_spill] sm:$0xff] }
 0x36f   : > { %7085 = vst [vmem:[#allocation78_spill] sm:$0xff] %v6147_v7  ;;  %v6149_v50 = vpop.xlane.xlu1 %2335  ;;  %v1978_v44 = vadd.f32 0.5, %v1850_v11  ;;  %v1472_v38 = vadd.f32 %v6126_v6, %v5894_v25  ;;  %v4460_v36 = vpop.eup %4459  ;;  %v1914_v46 = vmul.f32 0.5, %v4456_v16  ;;  %4467 = vtanh.f32 %v1598_v47  ;;  %v4539_v16 = vld [vmem:[%s5238_s24 + $0x38] sm:$0xff] }
 0x370   : > { %7086 = vst [vmem:[#allocation82_spill] sm:$0xff] %v6149_v50  ;;  %v3250_v14 = vadd.f32 %v3249_v51, %v3123_v59  ;;  %v2112_v59 = vmul.f32 %v5935_v54, %v1977_v48  ;;  %v1662_v33 = vmul.f32 0.5, %v1534_v31  ;;  %v4538_v48 = vld [vmem:[%s5238_s24 + $0x30] sm:$0xff]  ;;  %4469 = vtanh.f32 %v1599_v12 }
 0x371   : > { %2405 = vadd.xlane.f32.xlu0 %v2173_v60  ;;  %v1473_v60 = vadd.f32 %v5888_v18, %v6126_v6  ;;  %v4462_v51 = vpop.eup %4461  ;;  %v2175_v11 = vmul.f32 %v5935_v54, %v2040_v32  ;;  %v1915_v18 = vmul.f32 0.5, %v4458_v49  ;;  %v2176_v25 = vmul.f32 %v5935_v54, %v2041_v24 }
 0x372   : > { %2407 = vadd.xlane.f32.xlu1 %v2174_v39  ;;  %v3251_v30 = vadd.f32 %v3250_v14, %v3124_v37  ;;  %v2210_v62 = vpop.xlane.xlu0 %2209  ;;  %v1663_v37 = vmul.f32 0.5, %v1535_v0  ;;  %v1979_v14 = vadd.f32 0.5, %v1851_v27  ;;  %v2113_v31 = vmul.f32 %v5935_v54, %v1978_v44 }
 0x373   : > { %v2212_v35 = vpop.xlane.xlu1 %2211  ;;  %v2996_v15 = vmul.f32 %v7089_v57, %v2210_v62  ;;  %v2042_v12 = vadd.f32 0.5, %v1914_v46  ;;  %4471 = vtanh.f32 %v1662_v33  ;;  %v1600_v32 = vmul.f32 0.5, %v1472_v38  ;;  %v7093_v46 = vld [vmem:[#allocation41_spill] sm:$0xff] }
 0x374   : > { %v2997_v39 = vmul.f32 %v7090_v19, %v2212_v35  ;;  %v1601_v35 = vmul.f32 0.5, %v1473_v60  ;;  %v1536_v0 = vadd.f32 %v6142_v52, %v5896_v43  ;;  %4473 = vtanh.f32 %v1663_v37 }
 0x375   : > { %v3125_v45 = vmul.f32 %v4538_v48, %v2996_v15  ;;  %2281 = vadd.xlane.f32.xlu0 %v2111_v26  ;;  %v4464_v26 = vpop.eup %4463  ;;  %v2043_v49 = vadd.f32 0.5, %v1915_v18  ;;  %v1853_v57 = vmul.f32 0.5, %v4460_v36  ;;  %v2114_v15 = vmul.f32 %v5935_v54, %v1979_v14 }
 0x376   : > { %2283 = vadd.xlane.f32.xlu1 %v2112_v59  ;;  %v6166_v63 = vpop.xlane.xlu0 %2337  ;;  %v3126_v5 = vmul.f32 %v4539_v16, %v2997_v39  ;;  %v4466_v27 = vpop.eup %4465  ;;  %v1852_v59 = vmul.f32 0.5, %v4462_v51  ;;  %v1474_v60 = vadd.f32 %v6126_v6, %v5910_v4  ;;  %v1917_v38 = vmul.f32 0.5, %v4464_v26  ;;  %v7094_v39 = vld [vmem:[#allocation89_spill] sm:$0xff]  ;;  %v4541_v26 = vld [vmem:[%s5238_s24 + $0x48] sm:$0xff] }
 0x377   : > { %7091 = vst [vmem:[#allocation84_spill] sm:$0xff] %v6166_v63  ;;  %v3252_v62 = vadd.f32 %v3251_v30, %v3125_v45  ;;  %v6170_v47 = vpop.xlane.xlu1 %2339  ;;  %v1537_v30 = vadd.f32 %v5890_v61, %v6142_v52  ;;  %4475 = vtanh.f32 %v1601_v35  ;;  %v1475_v33 = vadd.f32 %v7094_v39, %v6126_v6  ;;  %v7095_v61 = vld [vmem:[#allocation42_spill] sm:$0xff] }
 0x378   : > { %7092 = vst [vmem:[#allocation62_spill] sm:$0xff] %v6170_v47  ;;  %v1916_v51 = vmul.f32 0.5, %v4466_v27  ;;  %4477 = vtanh.f32 %v1600_v32  ;;  %v1664_v36 = vmul.f32 0.5, %v1536_v0  ;;  %v1980_v45 = vadd.f32 0.5, %v1852_v59  ;;  %v7161_v47 = vld [vmem:[#allocation67_spill] sm:$0xff] }
 0x379   : > { %2409 = vadd.xlane.f32.xlu0 %v2175_v11  ;;  %v3253_v24 = vadd.f32 %v3252_v62, %v3126_v5  ;;  %v4540_v11 = vld [vmem:[%s5238_s24 + $0x40] sm:$0xff]  ;;  %v2177_v4 = vmul.f32 %v5935_v54, %v2042_v12  ;;  %v1665_v14 = vmul.f32 0.5, %v1537_v30  ;;  %v4468_v18 = vpop.eup %4467  ;;  %v2178_v5 = vmul.f32 %v5935_v54, %v2043_v49 }
 0x37a   : > { %2411 = vadd.xlane.f32.xlu1 %v2176_v25  ;;  %v2214_v44 = vpop.xlane.xlu0 %2213  ;;  %v1981_v25 = vadd.f32 0.5, %v1853_v57  ;;  %v1602_v62 = vmul.f32 0.5, %v1474_v60  ;;  %v4470_v35 = vpop.eup %4469  ;;  %v1603_v59 = vmul.f32 0.5, %v1475_v33  ;;  %v2045_v12 = vadd.f32 0.5, %v1917_v38  ;;  %v7099_v57 = vld [vmem:[#allocation90_spill] sm:$0xff] }
 0x37b   : > { %v2216_v43 = vpop.xlane.xlu1 %2215  ;;  %v2998_v19 = vmul.f32 %v7093_v46, %v2214_v44  ;;  %v7098_v44 = vld [vmem:[#allocation91_spill] sm:$0xff]  ;;  %v2044_v30 = vadd.f32 0.5, %v1916_v51  ;;  %4479 = vtanh.f32 %v1664_v36  ;;  %v2115_v60 = vmul.f32 %v5935_v54, %v1980_v45 }
 0x37c   : > { %v2999_v48 = vmul.f32 %v7095_v61, %v2216_v43  ;;  %v1854_v43 = vmul.f32 0.5, %v4468_v18  ;;  %4481 = vtanh.f32 %v1665_v14  ;;  %v2116_v39 = vmul.f32 %v5935_v54, %v1981_v25  ;;  %v7100_v61 = vld [vmem:[#allocation43_spill] sm:$0xff] }
 0x37d   : > { %v3127_v37 = vmul.f32 %v4540_v11, %v2998_v19  ;;  %2285 = vadd.xlane.f32.xlu0 %v2113_v31  ;;  %v1538_v31 = vadd.f32 %v6142_v52, %v7098_v44  ;;  %v4472_v46 = vpop.eup %4471  ;;  %4483 = vtanh.f32 %v1602_v62  ;;  %v1476_v38 = vadd.f32 %v6126_v6, %v5930_v9  ;;  %v7101_v11 = vld [vmem:[#allocation44_spill] sm:$0xff] }
 0x37e   : > { %2287 = vadd.xlane.f32.xlu1 %v2114_v15  ;;  %v6186_v16 = vpop.xlane.xlu0 %2341  ;;  %v3128_v27 = vmul.f32 %v4541_v26, %v2999_v48  ;;  %v1539_v15 = vadd.f32 %v7099_v57, %v6142_v52  ;;  %v4474_v33 = vpop.eup %4473  ;;  %4485 = vtanh.f32 %v1603_v59  ;;  %v1540_v18 = vadd.f32 %v6142_v52, %v5932_v3  ;;  %v4542_v9 = vld [vmem:[%s5238_s24 + $0x50] sm:$0xff] }
 0x37f   : > { %7096 = vst [vmem:[#allocation83_spill] sm:$0xff] %v6186_v16  ;;  %v3254_v32 = vadd.f32 %v3253_v24, %v3127_v37  ;;  %v6190_v0 = vpop.xlane.xlu1 %2343  ;;  %v1855_v24 = vmul.f32 0.5, %v4470_v35  ;;  %v1666_v36 = vmul.f32 0.5, %v1538_v31  ;;  %v1918_v62 = vmul.f32 0.5, %v4472_v46 }
 0x380   : > { %7097 = vst [vmem:[#allocation36_spill] sm:$0xff] %v6190_v0  ;;  %v1667_v45 = vmul.f32 0.5, %v1539_v15  ;;  %v2179_v26 = vmul.f32 %v5935_v54, %v2044_v30  ;;  %v1919_v59 = vmul.f32 0.5, %v4474_v33  ;;  %v2180_v31 = vmul.f32 %v5935_v54, %v2045_v12  ;;  %v4543_v15 = vld [vmem:[%s5238_s24 + $0x58] sm:$0xff]  ;;  %v7159_v0 = vld [vmem:[#allocation51_spill] sm:$0xff] }
 0x381   : > { %2413 = vadd.xlane.f32.xlu0 %v2177_v4  ;;  %v3255_v49 = vadd.f32 %v3254_v32, %v3128_v27  ;;  %v7102_v4 = vld [vmem:[#allocation94_spill] sm:$0xff]  ;;  %v4476_v25 = vpop.eup %4475  ;;  %v1983_v32 = vadd.f32 0.5, %v1855_v24  ;;  %v1604_v57 = vmul.f32 0.5, %v1476_v38  ;;  %4487 = vtanh.f32 %v1666_v36 }
 0x382   : > { %2415 = vadd.xlane.f32.xlu1 %v2178_v5  ;;  %v2218_v19 = vpop.xlane.xlu0 %2217  ;;  %v1477_v14 = vadd.f32 %v7102_v4, %v6126_v6  ;;  %v1982_v5 = vadd.f32 0.5, %v1854_v43  ;;  %v4478_v27 = vpop.eup %4477  ;;  %v1541_v43 = vadd.f32 %v5926_v8, %v6142_v52  ;;  %4489 = vtanh.f32 %v1667_v45 }
 0x383   : > { %v2220_v51 = vpop.xlane.xlu1 %2219  ;;  %v3000_v48 = vmul.f32 %v7100_v61, %v2218_v19  ;;  %v1668_v46 = vmul.f32 0.5, %v1540_v18  ;;  %v2046_v24 = vadd.f32 0.5, %v1918_v62  ;;  %v2047_v61 = vadd.f32 0.5, %v1919_v59 }
 0x384   : > { %v3001_v37 = vmul.f32 %v7101_v11, %v2220_v51  ;;  %v1605_v30 = vmul.f32 0.5, %v1477_v14  ;;  %v2117_v12 = vmul.f32 %v5935_v54, %v1982_v5  ;;  %4491 = vtanh.f32 %v1604_v57 }
 0x385   : > { %v3129_v35 = vmul.f32 %v4542_v9, %v3000_v48  ;;  %2289 = vadd.xlane.f32.xlu0 %v2115_v60  ;;  %v1857_v60 = vmul.f32 0.5, %v4476_v25  ;;  %v4480_v38 = vpop.eup %4479  ;;  %v2118_v48 = vmul.f32 %v5935_v54, %v1983_v32  ;;  %v1479_v8 = vadd.f32 %v5945_v56, %v6126_v6  ;;  %v7106_v25 = vld [vmem:[#allocation46_spill] sm:$0xff]  ;;  %v6225_v56 = vld [vmem:[#allocation12] ss:$0 sm:$0xff] }
 0x386   : > { %2291 = vadd.xlane.f32.xlu1 %v2116_v39  ;;  %v6208_v44 = vpop.xlane.xlu0 %2345  ;;  %v3130_v19 = vmul.f32 %v4543_v15, %v3001_v37  ;;  %v1856_v39 = vmul.f32 0.5, %v4478_v27  ;;  %v4482_v36 = vpop.eup %4481  ;;  %v7105_v37 = vld [vmem:[#allocation45_spill] sm:$0xff]  ;;  %v1669_v4 = vmul.f32 0.5, %v1541_v43  ;;  %4493 = vtanh.f32 %v1605_v30 }
 0x387   : > { %7103 = vst [vmem:[#allocation34_spill] sm:$0xff] %v6208_v44  ;;  %v3256_v3 = vadd.f32 %v3255_v49, %v3129_v35  ;;  %v6212_v51 = vpop.xlane.xlu1 %2347  ;;  %v4484_v14 = vpop.eup %4483  ;;  %v1985_v18 = vadd.f32 0.5, %v1857_v60  ;;  %v1478_v62 = vadd.f32 %v6126_v6, %v5951_v13  ;;  %v1920_v35 = vmul.f32 0.5, %v4480_v38 }
 0x388   : > { %7104 = vst [vmem:[#allocation63_spill] sm:$0xff] %v6212_v51  ;;  %v4486_v9 = vpop.eup %4485  ;;  %v1984_v54 = vadd.f32 0.5, %v1856_v39  ;;  %v2181_v32 = vmul.f32 %v6225_v56, %v2046_v24  ;;  %v1921_v59 = vmul.f32 0.5, %v4482_v36  ;;  %v2182_v57 = vmul.f32 %v6225_v56, %v2047_v61 }
 0x389   : > { %2417 = vadd.xlane.f32.xlu0 %v2179_v26  ;;  %v3257_v33 = vadd.f32 %v3256_v3, %v3130_v19  ;;  %v4544_v26 = vld [vmem:[%s5238_s24 + $0x60] sm:$0xff]  ;;  %4495 = vtanh.f32 %v1668_v46  ;;  %v1607_v15 = vmul.f32 0.5, %v1479_v8  ;;  %v1858_v13 = vmul.f32 0.5, %v4484_v14  ;;  %v4546_v19 = vld [vmem:[%s5238_s24 + $0x68] sm:$0xff] }
 0x38a   : > { %2419 = vadd.xlane.f32.xlu1 %v2180_v31  ;;  %v2222_v49 = vpop.xlane.xlu0 %2221  ;;  %v1542_v30 = vadd.f32 %v6142_v52, %v5953_v42  ;;  %4497 = vtanh.f32 %v1669_v4  ;;  %v1606_v39 = vmul.f32 0.5, %v1478_v62  ;;  %v7109_v46 = vld [vmem:[#allocation95_spill] sm:$0xff]  ;;  %v2049_v8 = vadd.f32 0.5, %v1921_v59  ;;  %v7111_v62 = vld [vmem:[#allocation48_spill] sm:$0xff] }
 0x38b   : > { %v2224_v11 = vpop.xlane.xlu1 %2223  ;;  %v3002_v45 = vmul.f32 %v7105_v37, %v2222_v49  ;;  %v4488_v24 = vpop.eup %4487  ;;  %v2119_v49 = vmul.f32 %v6225_v56, %v1984_v54  ;;  %v1543_v61 = vadd.f32 %v7109_v46, %v6142_v52  ;;  %v1986_v42 = vadd.f32 0.5, %v1858_v13 }
 0x38c   : > { %v3003_v5 = vmul.f32 %v7106_v25, %v2224_v11  ;;  %v2120_v11 = vmul.f32 %v6225_v56, %v1985_v18  ;;  %4499 = vtanh.f32 %v1607_v15  ;;  %v1670_v14 = vmul.f32 0.5, %v1542_v30  ;;  %v4548_v30 = vld [vmem:[%s5238_s24 + $0x78] sm:$0xff] }
 0x38d   : > { %v3131_v27 = vmul.f32 %v4544_v26, %v3002_v45  ;;  %2293 = vadd.xlane.f32.xlu0 %v2117_v12  ;;  %v2048_v12 = vadd.f32 0.5, %v1920_v35  ;;  %v7110_v45 = vld [vmem:[#allocation47_spill] sm:$0xff]  ;;  %4501 = vtanh.f32 %v1606_v39  ;;  %v1480_v35 = vadd.f32 %v6126_v6, %v5972_v17 }
 0x38e   : > { %2295 = vadd.xlane.f32.xlu1 %v2118_v48  ;;  %v6228_v31 = vpop.xlane.xlu0 %2349  ;;  %v3132_v3 = vmul.f32 %v4546_v19, %v3003_v5  ;;  %v4490_v48 = vpop.eup %4489  ;;  %v1922_v5 = vmul.f32 0.5, %v4488_v24  ;;  %4503 = vtanh.f32 %v1670_v14  ;;  %v2121_v46 = vmul.f32 %v6225_v56, %v1986_v42 }
 0x38f   : > { %7107 = vst [vmem:[#allocation37_spill] sm:$0xff] %v6228_v31  ;;  %v3258_v43 = vadd.f32 %v3257_v33, %v3131_v27  ;;  %v6232_v60 = vpop.xlane.xlu1 %2351  ;;  %v1859_v33 = vmul.f32 0.5, %v4486_v9  ;;  %v4492_v25 = vpop.eup %4491  ;;  %v4547_v9 = vld [vmem:[%s5238_s24 + $0x70] sm:$0xff]  ;;  %v2183_v18 = vmul.f32 %v6225_v56, %v2048_v12  ;;  %v1671_v27 = vmul.f32 0.5, %v1543_v61 }
 0x390   : > { %7108 = vst [vmem:[#allocation38_spill] sm:$0xff] %v6232_v60  ;;  %v1923_v13 = vmul.f32 0.5, %v4490_v48  ;;  %v1608_v61 = vmul.f32 0.5, %v1480_v35  ;;  %v1544_v48 = vadd.f32 %v6142_v52, %v5974_v23 }
 0x391   : > { %2421 = vadd.xlane.f32.xlu0 %v2181_v32  ;;  %v3259_v38 = vadd.f32 %v3258_v43, %v3132_v3  ;;  %v7112_v32 = vld [vmem:[#allocation98_spill] sm:$0xff]  ;;  %v1987_v15 = vadd.f32 0.5, %v1859_v33  ;;  %v2184_v3 = vmul.f32 %v6225_v56, %v2049_v8  ;;  %v1860_v43 = vmul.f32 0.5, %v4492_v25 }
 0x392   : > { %2423 = vadd.xlane.f32.xlu1 %v2182_v57  ;;  %v2226_v36 = vpop.xlane.xlu0 %2225  ;;  %v1481_v59 = vadd.f32 %v7112_v32, %v6126_v6  ;;  %v4494_v57 = vpop.eup %4493  ;;  %4505 = vtanh.f32 %v1671_v27 }
 0x393   : > { %v2228_v37 = vpop.xlane.xlu1 %2227  ;;  %v3004_v4 = vmul.f32 %v7110_v45, %v2226_v36  ;;  %v4496_v12 = vpop.eup %4495  ;;  %v7115_v36 = vld [vmem:[#allocation99_spill] sm:$0xff]  ;;  %v1861_v45 = vmul.f32 0.5, %v4494_v57  ;;  %v2122_v42 = vmul.f32 %v6225_v56, %v1987_v15  ;;  %v1988_v14 = vadd.f32 0.5, %v1860_v43 }
 0x394   : > { %v3005_v54 = vmul.f32 %v7111_v62, %v2228_v37  ;;  %v1609_v8 = vmul.f32 0.5, %v1481_v59  ;;  %v2051_v37 = vadd.f32 0.5, %v1923_v13  ;;  %v1924_v23 = vmul.f32 0.5, %v4496_v12 }
 0x395   : > { %v3133_v26 = vmul.f32 %v4547_v9, %v3004_v4  ;;  %2297 = vadd.xlane.f32.xlu0 %v2119_v49  ;;  %v2050_v49 = vadd.f32 0.5, %v1922_v5  ;;  %4507 = vtanh.f32 %v1608_v61  ;;  %v1672_v5 = vmul.f32 0.5, %v1544_v48 }
 0x396   : > { %2299 = vadd.xlane.f32.xlu1 %v2120_v11  ;;  %v6248_v19 = vpop.xlane.xlu0 %2353  ;;  %v3134_v17 = vmul.f32 %v4548_v30, %v3005_v54  ;;  %v1545_v11 = vadd.f32 %v7115_v36, %v6142_v52  ;;  %v1482_v62 = vadd.f32 %v6126_v6, %v5984_v21  ;;  %4509 = vtanh.f32 %v1609_v8  ;;  %v7118_v21 = vld [vmem:[#allocation100_spill] sm:$0xff]  ;;  %v7119_v30 = vld [vmem:[#allocation101_spill] sm:$0xff] }
 0x397   : > { %7113 = vst [vmem:[#allocation86_spill] sm:$0xff] %v6248_v19  ;;  %v3260_v39 = vadd.f32 %v3259_v38, %v3133_v26  ;;  %v6252_v24 = vpop.xlane.xlu1 %2355  ;;  %v4498_v38 = vpop.eup %4497  ;;  %v2185_v35 = vmul.f32 %v6225_v56, %v2050_v49  ;;  %v1483_v26 = vadd.f32 %v5980_v28, %v6126_v6  ;;  %v1989_v27 = vadd.f32 0.5, %v1861_v45 }
 0x398   : > { %7114 = vst [vmem:[#allocation85_spill] sm:$0xff] %v6252_v24  ;;  %v4500_v54 = vpop.eup %4499  ;;  %v1673_v9 = vmul.f32 0.5, %v1545_v11  ;;  %v1925_v32 = vmul.f32 0.5, %v4498_v38  ;;  %v2186_v57 = vmul.f32 %v6225_v56, %v2051_v37  ;;  %v1547_v13 = vadd.f32 %v7118_v21, %v6142_v52 }
 0x399   : > { %v6257_v33 = vadd.f32 %v3260_v39, %v3134_v17  ;;  %2425 = vadd.xlane.f32.xlu0 %v2183_v18  ;;  %v4502_v18 = vpop.eup %4501  ;;  %4511 = vtanh.f32 %v1672_v5  ;;  %v1610_v43 = vmul.f32 0.5, %v1482_v62  ;;  %v1546_v17 = vadd.f32 %v6142_v52, %v7119_v30  ;;  %v7120_v5 = vld [vmem:[#allocation104_spill] sm:$0xff] }
 0x39a   : > { %2427 = vadd.xlane.f32.xlu1 %v2184_v3  ;;  %v6261_v4 = vpop.xlane.xlu0 %2229  ;;  %v2052_v3 = vadd.f32 0.5, %v1924_v23  ;;  %v4504_v28 = vpop.eup %4503  ;;  %v1862_v39 = vmul.f32 0.5, %v4502_v18  ;;  %4513 = vtanh.f32 %v1673_v9  ;;  %v2123_v12 = vmul.f32 %v6225_v56, %v1988_v14 }
 0x39b   : > { %v6264_v25 = vpop.xlane.xlu1 %2231  ;;  %v1611_v49 = vmul.f32 0.5, %v1483_v26  ;;  %v1863_v61 = vmul.f32 0.5, %v4500_v54  ;;  %v2124_v8 = vmul.f32 %v6225_v56, %v1989_v27  ;;  %v1675_v38 = vmul.f32 0.5, %v1547_v13 }
 0x39c   : > { %v4506_v36 = vpop.eup %4505  ;;  %v1926_v37 = vmul.f32 0.5, %v4504_v28  ;;  %4515 = vtanh.f32 %v1610_v43  ;;  %v1674_v45 = vmul.f32 0.5, %v1546_v17  ;;  %v1990_v23 = vadd.f32 0.5, %v1862_v39  ;;  %v7123_v43 = vld [vmem:[#allocation105_spill] sm:$0xff] }
 0x39d   : > { %2301 = vadd.xlane.f32.xlu0 %v2121_v46  ;;  %v2053_v46 = vadd.f32 0.5, %v1925_v32  ;;  %4517 = vtanh.f32 %v1611_v49  ;;  %v2187_v14 = vmul.f32 %v6225_v56, %v2052_v3  ;;  %v1485_v62 = vadd.f32 %v7120_v5, %v6126_v6 }
 0x39e   : > { %2303 = vadd.xlane.f32.xlu1 %v2122_v42  ;;  %v6271_v59 = vpop.xlane.xlu0 %2357  ;;  %v1484_v42 = vadd.f32 %v6126_v6, %v6002_v34  ;;  %v1927_v9 = vmul.f32 0.5, %v4506_v36  ;;  %4519 = vtanh.f32 %v1675_v38  ;;  %v2054_v34 = vadd.f32 0.5, %v1926_v37 }
 0x39f   : > { %7116 = vst [vmem:[#allocation39_spill] sm:$0xff] %v6271_v59  ;;  %v6274_v15 = vpop.xlane.xlu1 %2359  ;;  %v4508_v54 = vpop.eup %4507  ;;  %v2188_v18 = vmul.f32 %v6225_v56, %v2053_v46  ;;  %4521 = vtanh.f32 %v1674_v45  ;;  %v1548_v21 = vadd.f32 %v6142_v52, %v6007_v53  ;;  %v2125_v6 = vmul.f32 %v6225_v56, %v1990_v23 }
 0x3a0   : > { %7117 = vst [vmem:[#allocation40_spill] sm:$0xff] %v6274_v15  ;;  %v4510_v27 = vpop.eup %4509  ;;  %v1864_v13 = vmul.f32 0.5, %v4508_v54  ;;  %v1613_v3 = vmul.f32 0.5, %v1485_v62  ;;  %v1549_v30 = vadd.f32 %v7123_v43, %v6142_v52  ;;  %v2055_v28 = vadd.f32 0.5, %v1927_v9 }
 0x3a1   : > { %2429 = vadd.xlane.f32.xlu0 %v2185_v35  ;;  %v1991_v35 = vadd.f32 0.5, %v1863_v61  ;;  %v1865_v39 = vmul.f32 0.5, %v4510_v27  ;;  %v2189_v53 = vmul.f32 %v6225_v56, %v2054_v34 }
 0x3a2   : > { %2431 = vadd.xlane.f32.xlu1 %v2186_v57  ;;  %v6281_v48 = vpop.xlane.xlu0 %2233  ;;  %v1612_v57 = vmul.f32 0.5, %v1484_v42  ;;  %v1992_v36 = vadd.f32 0.5, %v1864_v13  ;;  %v1677_v52 = vmul.f32 0.5, %v1549_v30 }
 0x3a3   : > { %v6284_v11 = vpop.xlane.xlu1 %2235  ;;  %v4512_v17 = vpop.eup %4511  ;;  %v2126_v49 = vmul.f32 %v6225_v56, %v1991_v35  ;;  %v1993_v45 = vadd.f32 0.5, %v1865_v39  ;;  %v3008_v16 = vmul.f32 %v7159_v0, %v6281_v48 }
 0x3a4   : > { %v4514_v46 = vpop.eup %4513  ;;  %4523 = vtanh.f32 %v1612_v57  ;;  %v1928_v38 = vmul.f32 0.5, %v4512_v17 }
 0x3a5   : > { %2305 = vadd.xlane.f32.xlu0 %v2123_v12  ;;  %4525 = vtanh.f32 %v1613_v3  ;;  %v1929_v42 = vmul.f32 0.5, %v4514_v46  ;;  %v2128_v13 = vmul.f32 %v6225_v56, %v1993_v45 }
 0x3a6   : > { %2307 = vadd.xlane.f32.xlu1 %v2124_v8  ;;  %v6291_v26 = vpop.xlane.xlu0 %2361  ;;  %v1676_v8 = vmul.f32 0.5, %v1548_v21  ;;  %v4516_v37 = vpop.eup %4515  ;;  %v2056_v35 = vadd.f32 0.5, %v1928_v38 }
 0x3a7   : > { %7121 = vst [vmem:[#allocation41_spill] sm:$0xff] %v6291_v26  ;;  %v6294_v32 = vpop.xlane.xlu1 %2363  ;;  %v4518_v5 = vpop.eup %4517  ;;  %v1866_v9 = vmul.f32 0.5, %v4516_v37  ;;  %v2057_v34 = vadd.f32 0.5, %v1929_v42  ;;  %v7156_v26 = vld [vmem:[#allocation49_spill] sm:$0xff] }
 0x3a8   : > { %7122 = vst [vmem:[#allocation89_spill] sm:$0xff] %v6294_v32  ;;  %4527 = vtanh.f32 %v1676_v8  ;;  %v4520_v54 = vpop.eup %4519  ;;  %v1867_v57 = vmul.f32 0.5, %v4518_v5  ;;  %v2191_v30 = vmul.f32 %v6225_v56, %v2056_v35 }
 0x3a9   : > { %2433 = vadd.xlane.f32.xlu0 %v2187_v14  ;;  %v2190_v14 = vmul.f32 %v6225_v56, %v2055_v28  ;;  %4529 = vtanh.f32 %v1677_v52  ;;  %v4522_v27 = vpop.eup %4521  ;;  %v1994_v3 = vadd.f32 0.5, %v1866_v9  ;;  %v1931_v39 = vmul.f32 0.5, %v4520_v54 }
 0x3aa   : > { %2435 = vadd.xlane.f32.xlu1 %v2188_v18  ;;  %v6301_v12 = vpop.xlane.xlu0 %2237  ;;  %v2127_v18 = vmul.f32 %v6225_v56, %v1992_v36  ;;  %v1930_v43 = vmul.f32 0.5, %v4522_v27  ;;  %v1995_v28 = vadd.f32 0.5, %v1867_v57  ;;  %v2192_v46 = vmul.f32 %v6225_v56, %v2057_v34 }
 0x3ab   : > { %v6304_v61 = vpop.xlane.xlu1 %2239  ;;  %v2129_v52 = vmul.f32 %v6225_v56, %v1994_v3  ;;  %v2059_v45 = vadd.f32 0.5, %v1931_v39 }
 0x3ac   : > { %v2058_v36 = vadd.f32 0.5, %v1930_v43  ;;  %v2130_v5 = vmul.f32 %v6225_v56, %v1995_v28 }
 0x3ad   : > { %2309 = vadd.xlane.f32.xlu0 %v2125_v6  ;;  %v2194_v3 = vmul.f32 %v6225_v56, %v2059_v45 }
 0x3ae   : > { %2311 = vadd.xlane.f32.xlu1 %v2126_v49  ;;  %v6307_v23 = vpop.xlane.xlu0 %2365  ;;  %v4524_v17 = vpop.eup %4523  ;;  %v2193_v27 = vmul.f32 %v6225_v56, %v2058_v36 }
 0x3af   : > { %7124 = vst [vmem:[#allocation42_spill] sm:$0xff] %v6307_v23  ;;  %v6310_v62 = vpop.xlane.xlu1 %2367  ;;  %v1868_v38 = vmul.f32 0.5, %v4524_v17 }
 0x3b0   : > { %7125 = vst [vmem:[#allocation91_spill] sm:$0xff] %v6310_v62 }
 0x3b1   : > { %2437 = vadd.xlane.f32.xlu0 %v2189_v53  ;;  %v4526_v53 = vpop.eup %4525  ;;  %v1996_v9 = vadd.f32 0.5, %v1868_v38 }
 0x3b2   : > { %2439 = vadd.xlane.f32.xlu1 %v2190_v14  ;;  %v6313_v21 = vpop.xlane.xlu0 %2241  ;;  %v4528_v37 = vpop.eup %4527  ;;  %v1869_v42 = vmul.f32 0.5, %v4526_v53 }
 0x3b3   : > { %v6316_v6 = vpop.xlane.xlu1 %2243  ;;  %v4530_v54 = vpop.eup %4529  ;;  %v2131_v17 = vmul.f32 %v6225_v56, %v1996_v9 }
 0x3b4   : > { %v1997_v34 = vadd.f32 0.5, %v1869_v42  ;;  %v1933_v57 = vmul.f32 0.5, %v4530_v54 }
 0x3b5   : > { %2313 = vadd.xlane.f32.xlu0 %v2127_v18  ;;  %v1932_v18 = vmul.f32 0.5, %v4528_v37 }
 0x3b6   : > { %2315 = vadd.xlane.f32.xlu1 %v2128_v13  ;;  %v6319_v49 = vpop.xlane.xlu0 %2369  ;;  %v2061_v28 = vadd.f32 0.5, %v1933_v57 }
 0x3b7   : > { %7126 = vst [vmem:[#allocation90_spill] sm:$0xff] %v6319_v49  ;;  %v6322_v8 = vpop.xlane.xlu1 %2371 }
 0x3b8   : > { %7127 = vst [vmem:[#allocation43_spill] sm:$0xff] %v6322_v8 }
 0x3b9   : > { %2441 = vadd.xlane.f32.xlu0 %v2191_v30  ;;  %v2060_v30 = vadd.f32 0.5, %v1932_v18 }
 0x3ba   : > { %2443 = vadd.xlane.f32.xlu1 %v2192_v46  ;;  %v6325_v14 = vpop.xlane.xlu0 %2245  ;;  %v2132_v46 = vmul.f32 %v6225_v56, %v1997_v34 }
 0x3bb   : > { %v6328_v35 = vpop.xlane.xlu1 %2247  ;;  %v2195_v36 = vmul.f32 %v6225_v56, %v2060_v30  ;;  %v7137_v30 = vld [vmem:[#allocation31_spill] sm:$0xff] }
 0x3bc   : > { %v2791_v60 = vsub.s32 5, %v7137_v30  ;;  %v2858_v51 = vsub.s32 6, %v7137_v30  ;;  %v2925_v8 = vsub.s32 7, %v7137_v30 }
 0x3bd   : > { %2317 = vadd.xlane.f32.xlu0 %v2129_v52  ;;  %v2196_v52 = vmul.f32 %v6225_v56, %v2061_v28 }
 0x3be   : > { %2319 = vadd.xlane.f32.xlu1 %v2130_v5  ;;  %v6331_v13 = vpop.xlane.xlu0 %2373 }
 0x3bf   : > { %7128 = vst [vmem:[#allocation44_spill] sm:$0xff] %v6331_v13  ;;  %v6334_v43 = vpop.xlane.xlu1 %2375 }
 0x3c0   : > { %7129 = vst [vmem:[#allocation94_spill] sm:$0xff] %v6334_v43 }
 0x3c1   : > { %2445 = vadd.xlane.f32.xlu0 %v2193_v27 }
 0x3c2   : > { %2447 = vadd.xlane.f32.xlu1 %v2194_v3  ;;  %v6337_v39 = vpop.xlane.xlu0 %2249  ;;  %v7136_v3 = vld [vmem:[#allocation32_spill] sm:$0xff] }
 0x3c3   : > { %v6340_v53 = vpop.xlane.xlu1 %2251 }
 0x3c5   : > { %2321 = vadd.xlane.f32.xlu0 %v2131_v17  ;;  %v2724_v17 = vsub.s32 4, %v7137_v30 }
 0x3c6   : > { %2323 = vadd.xlane.f32.xlu1 %v2132_v46  ;;  %v6343_v38 = vpop.xlane.xlu0 %2377 }
 0x3c7   : > { %7130 = vst [vmem:[#allocation45_spill] sm:$0xff] %v6343_v38  ;;  %v6346_v37 = vpop.xlane.xlu1 %2379 }
 0x3c8   : > { %7131 = vst [vmem:[#allocation46_spill] sm:$0xff] %v6346_v37 }
 0x3c9   : > { %2449 = vadd.xlane.f32.xlu0 %v2195_v36  ;;  %v4549_v36 = vld [vmem:[%s342_s12] sm:$0xff] }
 0x3ca   : > { %2451 = vadd.xlane.f32.xlu1 %v2196_v52  ;;  %v6348_v45 = vpop.xlane.xlu0 %2253  ;;  %v6378_v52 = vrot.slane %v4549_v36, %v2724_v17  ;;  %v6411_v38 = vrot.slane %v4549_v36, %v2791_v60  ;;  %v6420_v13 = vrot.slane %v4549_v36, %v2858_v51  ;;  %v6429_v60 = vrot.slane %v4549_v36, %v2925_v8 }
 0x3cb   : > { %v6350_v42 = vpop.xlane.xlu1 %2255 }
 0x3ce   : > { %v6352_v5 = vpop.xlane.xlu0 %2381 }
 0x3cf   : > { %7132 = vst [vmem:[#allocation95_spill] sm:$0xff] %v6352_v5  ;;  %v6354_v54 = vpop.xlane.xlu1 %2383 }
 0x3d0   : > { %7133 = vst [vmem:[#allocation47_spill] sm:$0xff] %v6354_v54 }
 0x3d2   : > { %v6356_v9 = vpop.xlane.xlu0 %2257 }
 0x3d3   : > { %v6358_v18 = vpop.xlane.xlu1 %2259 }
 0x3d6   : > { %v6360_v27 = vpop.xlane.xlu0 %2385 }
 0x3d7   : > { %7134 = vst [vmem:[#allocation48_spill] sm:$0xff] %v6360_v27  ;;  %v6362_v56 = vpop.xlane.xlu1 %2387 }
 0x3d8   : > { %7135 = vst [vmem:[#allocation98_spill] sm:$0xff] %v6362_v56 }
 0x3da   : > { %v6364_v34 = vpop.xlane.xlu0 %2261 }
 0x3db   : > { %v6366_v57 = vpop.xlane.xlu1 %2263  ;;  %2712 = vbcast.lane.b32.xlu1 %v7136_v3, 360  ;;  %v3022_v50 = vmul.f32 %v7161_v47, %v6364_v34 }
 0x3de   : > { %v6370_v28 = vpop.xlane.xlu0 %2389 }
 0x3df   : > { %7138 = vst [vmem:[#allocation99_spill] sm:$0xff] %v6370_v28  ;;  %v6372_v46 = vpop.xlane.xlu1 %2391  ;;  %2716 = vbcast.lane.b32.xlu0 %v7136_v3, 368  ;;  %2720 = vbcast.lane.b32.xlu1 %v7136_v3, 376  ;;  %v3006_v28 = vmul.f32 %v7156_v26, %v6261_v4  ;;  %v4553_v4 = vld [vmem:[%s5238_s24 + $0x80] sm:$0xff] }
 0x3e0   : > { %7139 = vst [vmem:[#allocation100_spill] sm:$0xff] %v6372_v46 }
 0x3e1   : > { %v3135_v26 = vmul.f32 %v4553_v4, %v3006_v28  ;;  %v4557_v4 = vld [vmem:[%s5238_s24 + $0x100] sm:$0xff] }
 0x3e2   : > { %v6380_v56 = vpop.xlane.xlu0 %2265  ;;  %v3151_v7 = vmul.f32 %v4557_v4, %v3022_v50  ;;  %v7168_v4 = vld [vmem:[#allocation55_spill] sm:$0xff] }
 0x3e3   : > { %v6382_v24 = vpop.xlane.xlu1 %2267  ;;  %2727 = vbcast.lane.b32.xlu0 %v6378_v52, 256  ;;  %2731 = vbcast.lane.b32.xlu1 %v6378_v52, 264 }
 0x3e6   : > { %v6386_v27 = vpop.xlane.xlu0 %2393 }
 0x3e7   : > { %7140 = vst [vmem:[#allocation101_spill] sm:$0xff] %v6386_v27  ;;  %v6388_v54 = vpop.xlane.xlu1 %2395  ;;  %2735 = vbcast.lane.b32.xlu0 %v6378_v52, 272  ;;  %2739 = vbcast.lane.b32.xlu1 %v6378_v52, 280  ;;  %v7154_v27 = vld [vmem:[#allocation103_spill] sm:$0xff] }
 0x3e8   : > { %7141 = vst [vmem:[#allocation104_spill] sm:$0xff] %v6388_v54 }
 0x3ea   : > { %v6392_v3 = vpop.xlane.xlu0 %2269 }
 0x3eb   : > { %v6394_v17 = vpop.xlane.xlu1 %2271  ;;  %2743 = vbcast.lane.b32.xlu0 %v6378_v52, 288  ;;  %2747 = vbcast.lane.b32.xlu1 %v6378_v52, 296 }
 0x3ee   : > { %v6398_v19 = vpop.xlane.xlu0 %2397 }
 0x3ef   : > { %7142 = vst [vmem:[#allocation105_spill] sm:$0xff] %v6398_v19  ;;  %v6400_v5 = vpop.xlane.xlu1 %2399  ;;  %2751 = vbcast.lane.b32.xlu0 %v6378_v52, 304  ;;  %2755 = vbcast.lane.b32.xlu1 %v6378_v52, 312 }
 0x3f0   : > { %7143 = vst [vmem:[#allocation32_spill] sm:$0xff] %v6400_v5 }
 0x3f2   : > { %v6405_v37 = vpop.xlane.xlu0 %2273 }
 0x3f3   : > { %v6407_v31 = vpop.xlane.xlu1 %2275  ;;  %2759 = vbcast.lane.b32.xlu0 %v6378_v52, 320  ;;  %2763 = vbcast.lane.b32.xlu1 %v6378_v52, 328 }
 0x3f6   : > { %v6414_v44 = vpop.xlane.xlu0 %2401 }
 0x3f7   : > { %7144 = vst [vmem:[#allocation31_spill] sm:$0xff] %v6414_v44  ;;  %v6416_v43 = vpop.xlane.xlu1 %2403  ;;  %2794 = vbcast.lane.b32.xlu0 %v6411_v38, 256  ;;  %2798 = vbcast.lane.b32.xlu1 %v6411_v38, 264 }
 0x3f8   : > { %7145 = vst [vmem:[#allocation106_spill] sm:$0xff] %v6416_v43 }
 0x3fa   : > { %v6423_v49 = vpop.xlane.xlu0 %2277 }
 0x3fb   : > { %v6425_v5 = vpop.xlane.xlu1 %2279  ;;  %2861 = vbcast.lane.b32.xlu0 %v6420_v13, 256  ;;  %2865 = vbcast.lane.b32.xlu1 %v6420_v13, 264 }
 0x3fe   : > { %v6431_v44 = vpop.xlane.xlu0 %2405 }
 0x3ff   : > { %7146 = vst [vmem:[#allocation107_spill] sm:$0xff] %v6431_v44  ;;  %v6433_v43 = vpop.xlane.xlu1 %2407  ;;  %2802 = vbcast.lane.b32.xlu0 %v6411_v38, 272  ;;  %2928 = vbcast.lane.b32.xlu1 %v6429_v60, 256 }
 0x400   : > { %7147 = vst [vmem:[#allocation108_spill] sm:$0xff] %v6433_v43 }
 0x402   : > { %v6437_v51 = vpop.xlane.xlu0 %2281 }
 0x403   : > { %v6439_v30 = vpop.xlane.xlu1 %2283  ;;  %2932 = vbcast.lane.b32.xlu0 %v6429_v60, 264  ;;  %2869 = vbcast.lane.b32.xlu1 %v6420_v13, 272 }
 0x406   : > { %v6443_v62 = vpop.xlane.xlu0 %2409 }
 0x407   : > { %7148 = vst [vmem:[#allocation109_spill] sm:$0xff] %v6443_v62  ;;  %v6445_v8 = vpop.xlane.xlu1 %2411  ;;  %2806 = vbcast.lane.b32.xlu0 %v6411_v38, 280  ;;  %2936 = vbcast.lane.b32.xlu1 %v6429_v60, 272 }
 0x408   : > { %7149 = vst [vmem:[#allocation110_spill] sm:$0xff] %v6445_v8 }
 0x40a   : > { %v6449_v36 = vpop.xlane.xlu0 %2285 }
 0x40b   : > { %v6451_v43 = vpop.xlane.xlu1 %2287  ;;  %2873 = vbcast.lane.b32.xlu0 %v6420_v13, 280  ;;  %2810 = vbcast.lane.b32.xlu1 %v6411_v38, 288 }
 0x40e   : > { %v6455_v44 = vpop.xlane.xlu0 %2413 }
 0x40f   : > { %7150 = vst [vmem:[#allocation111_spill] sm:$0xff] %v6455_v44  ;;  %v6457_v19 = vpop.xlane.xlu1 %2415  ;;  %2940 = vbcast.lane.b32.xlu0 %v6429_v60, 280  ;;  %2877 = vbcast.lane.b32.xlu1 %v6420_v13, 288 }
 0x410   : > { %7151 = vst [vmem:[#allocation112_spill] sm:$0xff] %v6457_v19 }
 0x412   : > { %v6461_v8 = vpop.xlane.xlu0 %2289 }
 0x413   : > { %v6463_v62 = vpop.xlane.xlu1 %2291  ;;  %2814 = vbcast.lane.b32.xlu0 %v6411_v38, 296  ;;  %2944 = vbcast.lane.b32.xlu1 %v6429_v60, 288 }
 0x416   : > { %v6467_v23 = vpop.xlane.xlu0 %2417 }
 0x417   : > { %7152 = vst [vmem:[#allocation113_spill] sm:$0xff] %v6467_v23  ;;  %v6469_v54 = vpop.xlane.xlu1 %2419  ;;  %2881 = vbcast.lane.b32.xlu0 %v6420_v13, 296  ;;  %2818 = vbcast.lane.b32.xlu1 %v6411_v38, 304 }
 0x418   : > { %7153 = vst [vmem:[#allocation114_spill] sm:$0xff] %v6469_v54  ;;  %v7155_v54 = vld [vmem:[#allocation50_spill] sm:$0xff] }
 0x419   : > { %v3007_v46 = vmul.f32 %v7155_v54, %v6264_v25  ;;  %v4552_v25 = vld [vmem:[%s5238_s24 + $0x88] sm:$0xff] }
 0x41a   : > { %v2294_v19 = vpop.xlane.xlu0 %2293 }
 0x41b   : > { %v2296_v44 = vpop.xlane.xlu1 %2295  ;;  %2948 = vbcast.lane.b32.xlu0 %v6429_v60, 296  ;;  %2885 = vbcast.lane.b32.xlu1 %v6420_v13, 304  ;;  %v3038_v23 = vmul.f32 %v7154_v27, %v2294_v19  ;;  %v4551_v19 = vld [vmem:[%s5238_s24 + $0x180] sm:$0xff]  ;;  %v3136_v54 = vmul.f32 %v4552_v25, %v3007_v46 }
 0x41c   : > { %v3039_v32 = vmul.f32 %v6014_v20, %v2296_v44  ;;  %v4550_v20 = vld [vmem:[%s5238_s24 + $0x188] sm:$0xff] }
 0x41d   : > { %v3167_v27 = vmul.f32 %v4551_v19, %v3038_v23  ;;  %v3268_v34 = vadd.f32 %v3136_v54, %v3135_v26  ;;  %v7163_v19 = vld [vmem:[#allocation52_spill] sm:$0xff] }
 0x41e   : > { %v6481_v15 = vpop.xlane.xlu0 %2421  ;;  %v3168_v44 = vmul.f32 %v4550_v20, %v3039_v32  ;;  %v7162_v32 = vld [vmem:[#allocation69_spill] sm:$0xff] }
 0x41f   : > { %7157 = vst [vmem:[#allocation103_spill] sm:$0xff] %v6481_v15  ;;  %v6483_v59 = vpop.xlane.xlu1 %2423  ;;  %2822 = vbcast.lane.b32.xlu0 %v6411_v38, 312  ;;  %2952 = vbcast.lane.b32.xlu1 %v6429_v60, 304  ;;  %v7160_v15 = vld [vmem:[#allocation68_spill] sm:$0xff]  ;;  %v3024_v23 = vmul.f32 %v7162_v32, %v6380_v56  ;;  %v7164_v56 = vld [vmem:[#allocation53_spill] sm:$0xff] }
 0x420   : > { %7158 = vst [vmem:[#allocation50_spill] sm:$0xff] %v6483_v59  ;;  %v3023_v59 = vmul.f32 %v7160_v15, %v6366_v57  ;;  %v4554_v15 = vld [vmem:[%s5238_s24 + $0x90] sm:$0xff]  ;;  %v3310_v46 = vadd.f32 %v3168_v44, %v3167_v27 }
 0x421   : > { %v3137_v57 = vmul.f32 %v4554_v15, %v3008_v16  ;;  %v4555_v20 = vld [vmem:[%s5238_s24 + $0x190] sm:$0xff] }
 0x422   : > { %v2298_v63 = vpop.xlane.xlu0 %2297 }
 0x423   : > { %v2300_v0 = vpop.xlane.xlu1 %2299  ;;  %v3040_v48 = vmul.f32 %v6010_v40, %v2298_v63  ;;  %2889 = vbcast.lane.b32.xlu0 %v6420_v13, 312  ;;  %2826 = vbcast.lane.b32.xlu1 %v6411_v38, 320  ;;  %v3009_v40 = vmul.f32 %v7163_v19, %v6284_v11  ;;  %v4556_v63 = vld [vmem:[%s5238_s24 + $0x108] sm:$0xff]  ;;  %v4559_v11 = vld [vmem:[%s5238_s24 + $0x110] sm:$0xff]  ;;  %v3269_v54 = vadd.f32 %v3268_v34, %v3137_v57 }
 0x424   : > { %v3041_v28 = vmul.f32 %v6028_v29, %v2300_v0  ;;  %v3152_v25 = vmul.f32 %v4556_v63, %v3023_v59  ;;  %v3010_v29 = vmul.f32 %v7164_v56, %v6301_v12  ;;  %v4558_v0 = vld [vmem:[%s5238_s24 + $0x198] sm:$0xff]  ;;  %v3153_v59 = vmul.f32 %v4559_v11, %v3024_v23  ;;  %v7166_v12 = vld [vmem:[#allocation71_spill] sm:$0xff] }
 0x425   : > { %v3169_v47 = vmul.f32 %v4555_v20, %v3040_v48  ;;  %v7165_v48 = vld [vmem:[#allocation70_spill] sm:$0xff]  ;;  %v3026_v15 = vmul.f32 %v7166_v12, %v6392_v3  ;;  %v3012_v56 = vmul.f32 %v7168_v4, %v6313_v21 }
 0x426   : > { %v6509_v2 = vpop.xlane.xlu0 %2425  ;;  %v3170_v16 = vmul.f32 %v4558_v0, %v3041_v28  ;;  %v3289_v26 = vadd.f32 %v3152_v25, %v3151_v7  ;;  %v3025_v32 = vmul.f32 %v7165_v48, %v6382_v24  ;;  %v7167_v3 = vld [vmem:[#allocation54_spill] sm:$0xff] }
 0x427   : > { %v3311_v44 = vadd.f32 %v3310_v46, %v3169_v47  ;;  %v6514_v27 = vpop.xlane.xlu1 %2427  ;;  %2956 = vbcast.lane.b32.xlu0 %v6429_v60, 312  ;;  %2893 = vbcast.lane.b32.xlu1 %v6420_v13, 320  ;;  %v4560_v46 = vld [vmem:[%s5238_s24 + $0x98] sm:$0xff]  ;;  %v4561_v47 = vld [vmem:[%s5238_s24 + $0xa0] sm:$0xff]  ;;  %v3011_v57 = vmul.f32 %v7167_v3, %v6304_v61  ;;  %v7169_v61 = vld [vmem:[#allocation76_spill] sm:$0xff] }
 0x428   : > { %v3138_v20 = vmul.f32 %v4560_v46, %v3009_v40  ;;  %v3139_v19 = vmul.f32 %v4561_v47, %v3010_v29  ;;  %v3290_v7 = vadd.f32 %v3289_v26, %v3153_v59  ;;  %v4562_v25 = vld [vmem:[%s5238_s24 + $0x1a0] sm:$0xff]  ;;  %v4563_v29 = vld [vmem:[%s5238_s24 + $0x118] sm:$0xff]  ;;  %v4565_v59 = vld [vmem:[%s5238_s24 + $0x1a8] sm:$0xff]  ;;  %v3027_v21 = vmul.f32 %v7169_v61, %v6394_v17 }
 0x429   : > { %v3312_v50 = vadd.f32 %v3311_v44, %v3170_v16  ;;  %v4564_v0 = vld [vmem:[%s5238_s24 + $0x120] sm:$0xff]  ;;  %v7171_v17 = vld [vmem:[#allocation56_spill] sm:$0xff]  ;;  %v4572_v61 = vld [vmem:[%s5238_s24 + $0xb8] sm:$0xff] }
 0x42a   : > { %v2302_v28 = vpop.xlane.xlu0 %2301  ;;  %v3270_v34 = vadd.f32 %v3269_v54, %v3138_v20  ;;  %v3155_v16 = vmul.f32 %v4564_v0, %v3026_v15  ;;  %v7170_v15 = vld [vmem:[#allocation77_spill] sm:$0xff] }
 0x42b   : > { %v2304_v63 = vpop.xlane.xlu1 %2303  ;;  %v3042_v23 = vmul.f32 %v6025_v58, %v2302_v28  ;;  %2830 = vbcast.lane.b32.xlu0 %v6411_v38, 328  ;;  %2960 = vbcast.lane.b32.xlu1 %v6429_v60, 320  ;;  %v3154_v58 = vmul.f32 %v4563_v29, %v3025_v32  ;;  %v4566_v32 = vld [vmem:[%s5238_s24 + $0xa8] sm:$0xff]  ;;  %v3028_v28 = vmul.f32 %v7170_v15, %v6405_v37  ;;  %v4567_v20 = vld [vmem:[%s5238_s24 + $0xb0] sm:$0xff]  ;;  %v7175_v15 = vld [vmem:[#allocation58_spill] sm:$0xff] }
 0x42c   : > { %v3043_v24 = vmul.f32 %v6042_v10, %v2304_v63  ;;  %v3271_v11 = vadd.f32 %v3270_v34, %v3139_v19  ;;  %v3140_v12 = vmul.f32 %v4566_v32, %v3011_v57  ;;  %v7172_v37 = vld [vmem:[#allocation57_spill] sm:$0xff]  ;;  %v4568_v57 = vld [vmem:[%s5238_s24 + $0x128] sm:$0xff] }
 0x42d   : > { %v3171_v40 = vmul.f32 %v4562_v25, %v3042_v23  ;;  %v3291_v54 = vadd.f32 %v3290_v7, %v3154_v58  ;;  %v3013_v7 = vmul.f32 %v7171_v17, %v6316_v6  ;;  %v3014_v3 = vmul.f32 %v7172_v37, %v6325_v14  ;;  %v7173_v58 = vld [vmem:[#allocation80_spill] sm:$0xff]  ;;  %v7174_v6 = vld [vmem:[#allocation81_spill] sm:$0xff] }
 0x42e   : > { %v6536_v44 = vpop.xlane.xlu0 %2429  ;;  %v3172_v10 = vmul.f32 %v4565_v59, %v3043_v24  ;;  %v3272_v63 = vadd.f32 %v3271_v11, %v3140_v12  ;;  %v3156_v34 = vmul.f32 %v4568_v57, %v3027_v21  ;;  %v3029_v0 = vmul.f32 %v7173_v58, %v6407_v31  ;;  %v4571_v59 = vld [vmem:[%s5238_s24 + $0x1b8] sm:$0xff]  ;;  %v4573_v31 = vld [vmem:[%s5238_s24 + $0xc0] sm:$0xff]  ;;  %v7177_v17 = vld [vmem:[#allocation72_spill] sm:$0xff] }
 0x42f   : > { %v3313_v26 = vadd.f32 %v3312_v50, %v3171_v40  ;;  %v6539_v48 = vpop.xlane.xlu1 %2431  ;;  %2767 = vbcast.lane.b32.xlu0 %v6378_v52, 336  ;;  %2897 = vbcast.lane.b32.xlu1 %v6420_v13, 328  ;;  %v3141_v50 = vmul.f32 %v4567_v20, %v3012_v56  ;;  %v3292_v47 = vadd.f32 %v3291_v54, %v3155_v16  ;;  %v4569_v40 = vld [vmem:[%s5238_s24 + $0x130] sm:$0xff]  ;;  %v7176_v20 = vld [vmem:[#allocation59_spill] sm:$0xff] }
 0x430   : > { %v3157_v4 = vmul.f32 %v4569_v40, %v3028_v28  ;;  %v3030_v14 = vmul.f32 %v7174_v6, %v6423_v49  ;;  %v3142_v21 = vmul.f32 %v4572_v61, %v3013_v7  ;;  %v3143_v54 = vmul.f32 %v4573_v31, %v3014_v3  ;;  %v4576_v40 = vld [vmem:[%s5238_s24 + $0x1c0] sm:$0xff]  ;;  %v4579_v6 = vld [vmem:[%s5238_s24 + $0x1c8] sm:$0xff] }
 0x431   : > { %v3314_v46 = vadd.f32 %v3313_v26, %v3172_v10  ;;  %v3273_v29 = vadd.f32 %v3272_v63, %v3141_v50  ;;  %v3293_v16 = vadd.f32 %v3292_v47, %v3156_v34  ;;  %v3015_v49 = vmul.f32 %v7175_v15, %v6328_v35  ;;  %v4574_v47 = vld [vmem:[%s5238_s24 + $0x138] sm:$0xff]  ;;  %v4575_v63 = vld [vmem:[%s5238_s24 + $0x140] sm:$0xff]  ;;  %v7179_v34 = vld [vmem:[#allocation88_spill] sm:$0xff] }
 0x432   : > { %v2306_v19 = vpop.xlane.xlu0 %2305 }
 0x433   : > { %v2308_v23 = vpop.xlane.xlu1 %2307  ;;  %v3044_v24 = vmul.f32 %v6040_v55, %v2306_v19  ;;  %2834 = vbcast.lane.b32.xlu0 %v6411_v38, 336  ;;  %2964 = vbcast.lane.b32.xlu1 %v6429_v60, 328  ;;  %v4570_v55 = vld [vmem:[%s5238_s24 + $0x1b0] sm:$0xff]  ;;  %v3294_v32 = vadd.f32 %v3293_v16, %v3157_v4  ;;  %v3274_v28 = vadd.f32 %v3273_v29, %v3142_v21  ;;  %v4580_v21 = vld [vmem:[%s5238_s24 + $0x148] sm:$0xff] }
 0x434   : > { %v3045_v25 = vmul.f32 %v6056_v1, %v2308_v23  ;;  %v3158_v19 = vmul.f32 %v4574_v47, %v3029_v0  ;;  %v3159_v23 = vmul.f32 %v4575_v63, %v3030_v14  ;;  %v4578_v29 = vld [vmem:[%s5238_s24 + $0xd0] sm:$0xff] }
 0x435   : > { %v3173_v56 = vmul.f32 %v4570_v55, %v3044_v24  ;;  %v3275_v35 = vadd.f32 %v3274_v28, %v3143_v54  ;;  %v4577_v55 = vld [vmem:[%s5238_s24 + $0xc8] sm:$0xff]  ;;  %v4581_v54 = vld [vmem:[%s5238_s24 + $0x150] sm:$0xff] }
 0x436   : > { %v6562_v11 = vpop.xlane.xlu0 %2433  ;;  %v3174_v10 = vmul.f32 %v4571_v59, %v3045_v25  ;;  %v3295_v57 = vadd.f32 %v3294_v32, %v3158_v19  ;;  %v3032_v25 = vmul.f32 %v7179_v34, %v6437_v51  ;;  %v4582_v19 = vld [vmem:[%s5238_s24 + $0xd8] sm:$0xff] }
 0x437   : > { %v3315_v1 = vadd.f32 %v3314_v46, %v3173_v56  ;;  %v6567_v26 = vpop.xlane.xlu1 %2435  ;;  %2771 = vbcast.lane.b32.xlu0 %v6378_v52, 344  ;;  %2901 = vbcast.lane.b32.xlu1 %v6420_v13, 336  ;;  %v3016_v46 = vmul.f32 %v7176_v20, %v6337_v39  ;;  %v7178_v39 = vld [vmem:[#allocation87_spill] sm:$0xff]  ;;  %v3144_v56 = vmul.f32 %v4577_v55, %v3015_v49  ;;  %v7182_v49 = vld [vmem:[#allocation92_spill] sm:$0xff]  ;;  %v4585_v34 = vld [vmem:[%s5238_s24 + $0x158] sm:$0xff] }
 0x438   : > { %v3031_v3 = vmul.f32 %v7178_v39, %v6425_v5  ;;  %v3296_v16 = vadd.f32 %v3295_v57, %v3159_v23  ;;  %v7180_v5 = vld [vmem:[#allocation60_spill] sm:$0xff]  ;;  %v3161_v32 = vmul.f32 %v4581_v54, %v3032_v25  ;;  %v3033_v28 = vmul.f32 %v7182_v49, %v6439_v30  ;;  %v4583_v23 = vld [vmem:[%s5238_s24 + $0xe0] sm:$0xff]  ;;  %v7184_v30 = vld [vmem:[#allocation73_spill] sm:$0xff] }
 0x439   : > { %v3316_v12 = vadd.f32 %v3315_v1, %v3174_v10  ;;  %v3145_v58 = vmul.f32 %v4578_v29, %v3016_v46  ;;  %v3017_v51 = vmul.f32 %v7180_v5, %v6340_v53  ;;  %v3276_v10 = vadd.f32 %v3275_v35, %v3144_v56  ;;  %v7181_v1 = vld [vmem:[#allocation61_spill] sm:$0xff]  ;;  %v7190_v49 = vld [vmem:[#allocation66_spill] sm:$0xff] }
 0x43a   : > { %v2310_v50 = vpop.xlane.xlu0 %2309  ;;  %v3018_v61 = vmul.f32 %v7181_v1, %v6348_v45  ;;  %v3160_v31 = vmul.f32 %v4580_v21, %v3031_v3  ;;  %v7183_v53 = vld [vmem:[#allocation93_spill] sm:$0xff]  ;;  %v3162_v25 = vmul.f32 %v4585_v34, %v3033_v28  ;;  %v4590_v28 = vld [vmem:[%s5238_s24 + $0x168] sm:$0xff] }
 0x43b   : > { %v2312_v24 = vpop.xlane.xlu1 %2311  ;;  %v3046_v7 = vmul.f32 %v7177_v17, %v2310_v50  ;;  %2838 = vbcast.lane.b32.xlu0 %v6411_v38, 344  ;;  %2968 = vbcast.lane.b32.xlu1 %v6429_v60, 336  ;;  %v3277_v15 = vadd.f32 %v3276_v10, %v3145_v58  ;;  %v3034_v50 = vmul.f32 %v7183_v53, %v6449_v36  ;;  %v4584_v35 = vld [vmem:[%s5238_s24 + $0x1d0] sm:$0xff]  ;;  %v4587_v56 = vld [vmem:[%s5238_s24 + $0x1d8] sm:$0xff]  ;;  %v4588_v10 = vld [vmem:[%s5238_s24 + $0xe8] sm:$0xff] }
 0x43c   : > { %v3047_v37 = vmul.f32 %v6068_v22, %v2312_v24  ;;  %v3297_v46 = vadd.f32 %v3296_v16, %v3160_v31  ;;  %v3146_v63 = vmul.f32 %v4582_v19, %v3017_v51  ;;  %v3147_v24 = vmul.f32 %v4583_v23, %v3018_v61  ;;  %v7185_v36 = vld [vmem:[#allocation64_spill] sm:$0xff] }
 0x43d   : > { %v3175_v4 = vmul.f32 %v4576_v40, %v3046_v7  ;;  %v3019_v39 = vmul.f32 %v7185_v36, %v6350_v42  ;;  %v4589_v61 = vld [vmem:[%s5238_s24 + $0xf0] sm:$0xff] }
 0x43e   : > { %v6590_v0 = vpop.xlane.xlu0 %2437  ;;  %v3176_v22 = vmul.f32 %v4579_v6, %v3047_v37  ;;  %v3298_v7 = vadd.f32 %v3297_v46, %v3161_v32  ;;  %v3278_v3 = vadd.f32 %v3277_v15, %v3146_v63  ;;  %v4591_v46 = vld [vmem:[%s5238_s24 + $0x170] sm:$0xff]  ;;  %v7191_v63 = vld [vmem:[#allocation102_spill] sm:$0xff] }
 0x43f   : > { %v3317_v14 = vadd.f32 %v3316_v12, %v3175_v4  ;;  %v6593_v59 = vpop.xlane.xlu1 %2439  ;;  %2775 = vbcast.lane.b32.xlu0 %v6378_v52, 352  ;;  %2905 = vbcast.lane.b32.xlu1 %v6420_v13, 344  ;;  %v4586_v4 = vld [vmem:[%s5238_s24 + $0x160] sm:$0xff]  ;;  %v3148_v1 = vmul.f32 %v4588_v10, %v3019_v39  ;;  %v3037_v23 = vmul.f32 %v7191_v63, %v6463_v62  ;;  %v4594_v39 = vld [vmem:[%s5238_s24 + $0x178] sm:$0xff] }
 0x440   : > { %v3163_v55 = vmul.f32 %v4586_v4, %v3034_v50  ;;  %v3279_v42 = vadd.f32 %v3278_v3, %v3147_v24  ;;  %v4592_v50 = vld [vmem:[%s5238_s24 + $0x1e0] sm:$0xff]  ;;  %v3262_v4 = vrot.slane %v6257_v33, 4 }
 0x441   : > { %v3318_v12 = vadd.f32 %v3317_v14, %v3176_v22  ;;  %v3299_v22 = vadd.f32 %v3298_v7, %v3162_v25  ;;  %v7188_v14 = vld [vmem:[#allocation97_spill] sm:$0xff]  ;;  %v3166_v3 = vmul.f32 %v4594_v39, %v3037_v23  ;;  %v4598_v63 = vld [vmem:[%s5238_s24 + $0x200] sm:$0xff] }
 0x442   : > { %v2314_v20 = vpop.xlane.xlu0 %2313  ;;  %v3036_v5 = vmul.f32 %v7188_v14, %v6461_v8  ;;  %v3021_v8 = vmul.f32 %v7190_v49, %v6358_v18  ;;  %v4593_v18 = vld [vmem:[%s5238_s24 + $0xf8] sm:$0xff] }
 0x443   : > { %v2316_v47 = vpop.xlane.xlu1 %2315  ;;  %v3048_v45 = vmul.f32 %v6066_v41, %v2314_v20  ;;  %2842 = vbcast.lane.b32.xlu0 %v6411_v38, 352  ;;  %2972 = vbcast.lane.b32.xlu1 %v6429_v60, 344  ;;  %v7186_v41 = vld [vmem:[#allocation65_spill] sm:$0xff]  ;;  %v3300_v54 = vadd.f32 %v3299_v22, %v3163_v55 }
 0x444   : > { %v3049_v17 = vmul.f32 %v7184_v30, %v2316_v47  ;;  %v3020_v57 = vmul.f32 %v7186_v41, %v6356_v9  ;;  %v7187_v9 = vld [vmem:[#allocation96_spill] sm:$0xff]  ;;  %v3165_v53 = vmul.f32 %v4591_v46, %v3036_v5  ;;  %v3150_v7 = vmul.f32 %v4593_v18, %v3021_v8  ;;  %v7194_v46 = vld [vmem:[#allocation75_spill] sm:$0xff] }
 0x445   : > { %v3177_v37 = vmul.f32 %v4584_v35, %v3048_v45  ;;  %v3035_v6 = vmul.f32 %v7187_v9, %v6451_v43  ;;  %v3280_v43 = vadd.f32 %v3279_v42, %v3148_v1 }
 0x446   : > { %v6619_v40 = vpop.xlane.xlu0 %2441  ;;  %v3178_v29 = vmul.f32 %v4587_v56, %v3049_v17  ;;  %v3149_v21 = vmul.f32 %v4589_v61, %v3020_v57  ;;  %v4596_v61 = vld [vmem:[%s5238_s24 + $0x1f0] sm:$0xff] }
 0x447   : > { %v3319_v58 = vadd.f32 %v3318_v12, %v3177_v37  ;;  %v6623_v16 = vpop.xlane.xlu1 %2443  ;;  %2779 = vbcast.lane.b32.xlu0 %v6378_v52, 360  ;;  %2909 = vbcast.lane.b32.xlu1 %v6420_v13, 352  ;;  %v7189_v12 = vld [vmem:[#allocation74_spill] sm:$0xff]  ;;  %v3164_v20 = vmul.f32 %v4590_v28, %v3035_v6  ;;  %v3263_v6 = vadd.f32 %v3262_v4, %v6257_v33 }
 0x448   : > { %v3281_v45 = vadd.f32 %v3280_v43, %v3149_v21 }
 0x449   : > { %v3320_v51 = vadd.f32 %v3319_v58, %v3178_v29  ;;  %v3301_v24 = vadd.f32 %v3300_v54, %v3164_v20 }
 0x44a   : > { %v2318_v31 = vpop.xlane.xlu0 %2317  ;;  %v3282_v36 = vadd.f32 %v3281_v45, %v3150_v7 }
 0x44b   : > { %v2320_v32 = vpop.xlane.xlu1 %2319  ;;  %v3050_v15 = vmul.f32 %v7189_v12, %v2318_v31  ;;  %2846 = vbcast.lane.b32.xlu0 %v6411_v38, 360  ;;  %2976 = vbcast.lane.b32.xlu1 %v6429_v60, 352  ;;  %v3302_v35 = vadd.f32 %v3301_v24, %v3165_v53  ;;  %v3264_v31 = vrot.slane %v3263_v6, 2  ;;  %v4599_v24 = vld [vmem:[%s5238_s24 + $0x208] sm:$0xff] }
 0x44c   : > { %v3283_v34 = vrot.slane %v3282_v36, 4 }
 0x44d   : > { %v3179_v47 = vmul.f32 %v4592_v50, %v3050_v15  ;;  %v3303_v62 = vadd.f32 %v3302_v35, %v3166_v3  ;;  %v7192_v15 = vld [vmem:[#allocation33_spill] sm:$0xff]  ;;  %v3265_v50 = vadd.f32 %v3264_v31, %v3263_v6 }
 0x44e   : > { %v6641_v19 = vpop.xlane.xlu0 %2445  ;;  %v3284_v29 = vadd.f32 %v3283_v34, %v3282_v36  ;;  %v4600_v35 = vld [vmem:[%s5238_s24 + $0x210] sm:$0xff]  ;;  %v7196_v34 = vld [vmem:[#allocation78_spill] sm:$0xff] }
 0x44f   : > { %v3321_v30 = vadd.f32 %v3320_v51, %v3179_v47  ;;  %v6645_v17 = vpop.xlane.xlu1 %2447  ;;  %2783 = vbcast.lane.b32.xlu0 %v6378_v52, 368  ;;  %2913 = vbcast.lane.b32.xlu1 %v6420_v13, 360  ;;  %v3304_v55 = vrot.slane %v3303_v62, 4 }
 0x450   : > { %v3285_v51 = vrot.slane %v3284_v29, 2 }
 0x451   : > { %v3305_v22 = vadd.f32 %v3304_v55, %v3303_v62  ;;  %v3266_v55 = vrot.slane %v3265_v50, 1 }
 0x452   : > { %v2322_v37 = vpop.xlane.xlu0 %2321  ;;  %v3286_v8 = vadd.f32 %v3285_v51, %v3284_v29 }
 0x453   : > { %v2324_v41 = vpop.xlane.xlu1 %2323  ;;  %2850 = vbcast.lane.b32.xlu0 %v6411_v38, 368  ;;  %2980 = vbcast.lane.b32.xlu1 %v6429_v60, 360  ;;  %v3306_v54 = vrot.slane %v3305_v22, 2  ;;  %v3267_v31 = vadd.f32 %v3266_v55, %v3265_v50  ;;  %v7200_v50 = vld [vmem:[#allocation83_spill] sm:$0xff] }
 0x454   : > { %v3287_v7 = vrot.slane %v3286_v8, 1 }
 0x455   : > { %v3307_v47 = vadd.f32 %v3306_v54, %v3305_v22 }
 0x456   : > { %v6653_v57 = vpop.xlane.xlu0 %2449  ;;  %v3288_v22 = vadd.f32 %v3287_v7, %v3286_v8  ;;  %v4604_v8 = vld [vmem:[%s5238_s24 + $0x230] sm:$0xff] }
 0x457   : > { %v6655_v25 = vpop.xlane.xlu1 %2451  ;;  %2787 = vbcast.lane.b32.xlu0 %v6378_v52, 376  ;;  %2917 = vbcast.lane.b32.xlu1 %v6420_v13, 368  ;;  %v4595_v52 = vld [vmem:[%s5238_s24 + $0x1e8] sm:$0xff] }
 0x45a   : > { %v2717_v56 = vpop.permute.xlu0 %2716 }
 0x45b   : > { %v2713_v58 = vpop.permute.xlu1 %2712  ;;  %v3052_v42 = vmul.f32 %v2717_v56, %v2322_v37  ;;  %2854 = vbcast.lane.b32.xlu0 %v6411_v38, 376  ;;  %2984 = vbcast.lane.b32.xlu1 %v6429_v60, 368  ;;  %v3308_v56 = vrot.slane %v3307_v47, 1 }
 0x45c   : > { %v3051_v9 = vmul.f32 %v2713_v58, %v2320_v32  ;;  %v4597_v32 = vld [vmem:[%s5238_s24 + $0x1f8] sm:$0xff] }
 0x45d   : > { %v3181_v21 = vmul.f32 %v4596_v61, %v3052_v42  ;;  %v4601_v42 = vld [vmem:[%s5238_s24 + $0x218] sm:$0xff]  ;;  %v3309_v54 = vadd.f32 %v3308_v56, %v3307_v47 }
 0x45e   : > { %v3180_v14 = vmul.f32 %v4595_v52, %v3051_v9  ;;  %v2728_v5 = vpop.permute.xlu0 %2727 }
 0x45f   : > { %v2721_v10 = vpop.permute.xlu1 %2720  ;;  %2921 = vbcast.lane.b32.xlu0 %v6420_v13, 376  ;;  %2988 = vbcast.lane.b32.xlu1 %v6429_v60, 376  ;;  %v3054_v43 = vmul.f32 %v2728_v5, %v7192_v15  ;;  %v7193_v13 = vld [vmem:[#allocation79_spill] sm:$0xff] }
 0x460   : > { %v3322_v1 = vadd.f32 %v3321_v30, %v3180_v14  ;;  %v3053_v38 = vmul.f32 %v2721_v10, %v2324_v41  ;;  %v7195_v41 = vld [vmem:[#allocation35_spill] sm:$0xff]  ;;  %v7197_v14 = vld [vmem:[#allocation84_spill] sm:$0xff] }
 0x461   : > { %v3183_v23 = vmul.f32 %v4598_v63, %v3054_v43 }
 0x462   : > { %v3323_v33 = vadd.f32 %v3322_v1, %v3181_v21  ;;  %v3182_v12 = vmul.f32 %v4597_v32, %v3053_v38  ;;  %v2736_v49 = vpop.permute.xlu0 %2735  ;;  %v4602_v1 = vld [vmem:[%s5238_s24 + $0x220] sm:$0xff] }
 0x463   : > { %v2732_v28 = vpop.permute.xlu1 %2731  ;;  %v3056_v20 = vmul.f32 %v2736_v49, %v7193_v13  ;;  %v7198_v21 = vld [vmem:[#allocation82_spill] sm:$0xff]  ;;  %v3424_v49 = vsel %vm3423_vm1, %v3288_v22, %v3267_v31  ;;  %v7206_v31 = vld [vmem:[#allocation100_spill] sm:$0xff] }
 0x464   : > { %v3324_v60 = vadd.f32 %v3323_v33, %v3182_v12  ;;  %v3055_v53 = vmul.f32 %v2732_v28, %v7194_v46  ;;  %v4603_v12 = vld [vmem:[%s5238_s24 + $0x228] sm:$0xff]  ;;  %v7199_v46 = vld [vmem:[#allocation62_spill] sm:$0xff] }
 0x465   : > { %v3185_v37 = vmul.f32 %v4600_v35, %v3056_v20 }
 0x466   : > { %v3325_v45 = vrot.slane %v3324_v60, 4  ;;  %v3184_v30 = vmul.f32 %v4599_v24, %v3055_v53  ;;  %v2744_v18 = vpop.permute.xlu0 %2743  ;;  %v4605_v24 = vld [vmem:[%s5238_s24 + $0x238] sm:$0xff] }
 0x467   : > { %v2740_v36 = vpop.permute.xlu1 %2739  ;;  %v3058_v4 = vmul.f32 %v2744_v18, %v7196_v34 }
 0x468   : > { %v3326_v39 = vadd.f32 %v3325_v45, %v3324_v60  ;;  %v3331_v3 = vadd.f32 %v3184_v30, %v3183_v23  ;;  %v3057_v62 = vmul.f32 %v2740_v36, %v7195_v41  ;;  %v3426_v45 = vsel %vm3425_vm2, %v3309_v54, %v3424_v49 }
 0x469   : > { %v3187_v61 = vmul.f32 %v4602_v1, %v3058_v4  ;;  %v7202_v4 = vld [vmem:[#allocation39_spill] sm:$0xff] }
 0x46a   : > { %v3327_v29 = vrot.slane %v3326_v39, 2  ;;  %v3332_v58 = vadd.f32 %v3331_v3, %v3185_v37  ;;  %v3186_v9 = vmul.f32 %v4601_v42, %v3057_v62  ;;  %v2752_v6 = vpop.permute.xlu0 %2751  ;;  %v4606_v37 = vld [vmem:[%s5238_s24 + $0x240] sm:$0xff]  ;;  %v4607_v62 = vld [vmem:[%s5238_s24 + $0x248] sm:$0xff] }
 0x46b   : > { %v2748_v52 = vpop.permute.xlu1 %2747  ;;  %v3060_v5 = vmul.f32 %v2752_v6, %v7197_v14  ;;  %v7203_v42 = vld [vmem:[#allocation40_spill] sm:$0xff]  ;;  %v4608_v6 = vld [vmem:[%s5238_s24 + $0x280] sm:$0xff] }
 0x46c   : > { %v3328_v51 = vadd.f32 %v3327_v29, %v3326_v39  ;;  %v3333_v10 = vadd.f32 %v3332_v58, %v3186_v9  ;;  %v3059_v38 = vmul.f32 %v2748_v52, %v7198_v21  ;;  %v7201_v39 = vld [vmem:[#allocation36_spill] sm:$0xff] }
 0x46d   : > { %v3189_v28 = vmul.f32 %v4604_v8, %v3060_v5  ;;  %v4609_v52 = vld [vmem:[%s5238_s24 + $0x288] sm:$0xff] }
 0x46e   : > { %v3329_v33 = vrot.slane %v3328_v51, 1  ;;  %v3334_v32 = vadd.f32 %v3333_v10, %v3187_v61  ;;  %v3188_v15 = vmul.f32 %v4603_v12, %v3059_v38  ;;  %v2760_v43 = vpop.permute.xlu0 %2759  ;;  %v7204_v5 = vld [vmem:[#allocation99_spill] sm:$0xff]  ;;  %v7205_v61 = vld [vmem:[#allocation41_spill] sm:$0xff] }
 0x46f   : > { %v2756_v13 = vpop.permute.xlu1 %2755  ;;  %v3062_v47 = vmul.f32 %v2760_v43, %v7200_v50  ;;  %v4611_v12 = vld [vmem:[%s5238_s24 + $0x300] sm:$0xff]  ;;  %v4612_v43 = vld [vmem:[%s5238_s24 + $0x308] sm:$0xff] }
 0x470   : > { %v3330_v20 = vadd.f32 %v3329_v33, %v3328_v51  ;;  %v3335_v60 = vadd.f32 %v3334_v32, %v3188_v15  ;;  %v3061_v53 = vmul.f32 %v2756_v13, %v7199_v46  ;;  %v4610_v33 = vld [vmem:[%s5238_s24 + $0x290] sm:$0xff] }
 0x471   : > { %v3191_v36 = vmul.f32 %v4606_v37, %v3062_v47  ;;  %v4613_v47 = vld [vmem:[%s5238_s24 + $0x388] sm:$0xff] }
 0x472   : > { %v6685_v63 = vsel %vm3427_vm3, %v3330_v20, %v3426_v45  ;;  %v3336_v23 = vadd.f32 %v3335_v60, %v3189_v28  ;;  %v3190_v30 = vmul.f32 %v4605_v24, %v3061_v53  ;;  %v2795_v18 = vpop.permute.xlu0 %2794  ;;  %v7207_v20 = vld [vmem:[#allocation50_spill] sm:$0xff]  ;;  %v7208_v53 = vld [vmem:[#allocation103_spill] sm:$0xff] }
 0x473   : > { %v2764_v7 = vpop.permute.xlu1 %2763  ;;  %v3070_v55 = vmul.f32 %v2795_v18, %v7202_v4 }
 0x474   : > { %v3337_v35 = vadd.f32 %v3336_v23, %v3190_v30  ;;  %v3063_v3 = vmul.f32 %v2764_v7, %v7201_v39  ;;  %v4614_v23 = vld [vmem:[%s5238_s24 + $0x380] sm:$0xff] }
 0x475   : > { %v3199_v22 = vmul.f32 %v4608_v6, %v3070_v55 }
 0x476   : > { %v3338_v41 = vadd.f32 %v3337_v35, %v3191_v36  ;;  %v3192_v34 = vmul.f32 %v4607_v62, %v3063_v3  ;;  %v2862_v56 = vpop.permute.xlu0 %2861  ;;  %v7209_v35 = vld [vmem:[#allocation101_spill] sm:$0xff] }
 0x477   : > { %v2799_v29 = vpop.permute.xlu1 %2798  ;;  %v3086_v51 = vmul.f32 %v2862_v56, %v7204_v5  ;;  %v4615_v36 = vld [vmem:[%s5238_s24 + $0x310] sm:$0xff] }
 0x478   : > { %v6692_v58 = vadd.f32 %v3338_v41, %v3192_v34  ;;  %v3071_v9 = vmul.f32 %v2799_v29, %v7203_v42 }
 0x479   : > { %v3215_v15 = vmul.f32 %v4611_v12, %v3086_v51 }
 0x47a   : > { %v3200_v14 = vmul.f32 %v4609_v52, %v3071_v9  ;;  %v2803_v10 = vpop.permute.xlu0 %2802 }
 0x47b   : > { %v2866_v1 = vpop.permute.xlu1 %2865  ;;  %v3072_v21 = vmul.f32 %v2803_v10, %v7205_v61 }
 0x47c   : > { %v3352_v38 = vadd.f32 %v3200_v14, %v3199_v22  ;;  %v3087_v54 = vmul.f32 %v2866_v1, %v7206_v31 }
 0x47d   : > { %v3201_v32 = vmul.f32 %v4610_v33, %v3072_v21 }
 0x47e   : > { %v3216_v49 = vmul.f32 %v4612_v43, %v3087_v54  ;;  %v2933_v8 = vpop.permute.xlu0 %2932  ;;  %v7210_v43 = vld [vmem:[#allocation89_spill] sm:$0xff] }
 0x47f   : > { %v6703_v28 = vadd.f32 %v3352_v38, %v3201_v32  ;;  %v2929_v13 = vpop.permute.xlu1 %2928  ;;  %v3103_v60 = vmul.f32 %v2933_v8, %v7207_v20 }
 0x480   : > { %v3373_v46 = vadd.f32 %v3216_v49, %v3215_v15  ;;  %v3102_v50 = vmul.f32 %v2929_v13, %v7208_v53  ;;  %v7211_v13 = vld [vmem:[#allocation104_spill] sm:$0xff] }
 0x481   : > { %v3232_v45 = vmul.f32 %v4613_v47, %v3103_v60  ;;  %v7212_v60 = vld [vmem:[#allocation42_spill] sm:$0xff]  ;;  %v7213_v47 = vld [vmem:[#allocation105_spill] sm:$0xff] }
 0x482   : > { %v3231_v24 = vmul.f32 %v4614_v23, %v3102_v50  ;;  %v2807_v30 = vpop.permute.xlu0 %2806 }
 0x483   : > { %v2870_v18 = vpop.permute.xlu1 %2869  ;;  %v3073_v49 = vmul.f32 %v2807_v30, %v7210_v43  ;;  %v7214_v30 = vld [vmem:[#allocation91_spill] sm:$0xff] }
 0x484   : > { %v6709_v7 = vadd.f32 %v3232_v45, %v3231_v24  ;;  %v3088_v37 = vmul.f32 %v2870_v18, %v7209_v35  ;;  %v4616_v24 = vld [vmem:[%s5238_s24 + $0x298] sm:$0xff] }
 0x485   : > { %v3202_v18 = vmul.f32 %v4616_v24, %v3073_v49 }
 0x486   : > { %v3217_v39 = vmul.f32 %v4615_v36, %v3088_v37  ;;  %v2874_v3 = vpop.permute.xlu0 %2873  ;;  %v4617_v37 = vld [vmem:[%s5238_s24 + $0x390] sm:$0xff]  ;;  %v4618_v36 = vld [vmem:[%s5238_s24 + $0x318] sm:$0xff] }
 0x487   : > { %v2937_v41 = vpop.permute.xlu1 %2936  ;;  %v3089_v20 = vmul.f32 %v2874_v3, %v7211_v13  ;;  %v7215_v3 = vld [vmem:[#allocation32_spill] sm:$0xff] }
 0x488   : > { %v3374_v62 = vadd.f32 %v3373_v46, %v3217_v39  ;;  %v3104_v8 = vmul.f32 %v2937_v41, %v6509_v2 }
 0x489   : > { %v3218_v39 = vmul.f32 %v4618_v36, %v3089_v20  ;;  %v4623_v36 = vld [vmem:[%s5238_s24 + $0x328] sm:$0xff] }
 0x48a   : > { %v2941_v34 = vpop.permute.xlu0 %2940  ;;  %v3233_v2 = vmul.f32 %v4617_v37, %v3104_v8  ;;  %v7217_v8 = vld [vmem:[#allocation31_spill] sm:$0xff] }
 0x48b   : > { %v2811_v4 = vpop.permute.xlu1 %2810  ;;  %v3105_v50 = vmul.f32 %v2941_v34, %v6514_v27  ;;  %v7216_v34 = vld [vmem:[#allocation90_spill] sm:$0xff] }
 0x48c   : > { %v3074_v46 = vmul.f32 %v2811_v4, %v7212_v60  ;;  %v4619_v4 = vld [vmem:[%s5238_s24 + $0x2a0] sm:$0xff]  ;;  %v4620_v60 = vld [vmem:[%s5238_s24 + $0x398] sm:$0xff]  ;;  %v3395_v37 = vadd.f32 %v6709_v7, %v3233_v2 }
 0x48d   : > { %v3234_v49 = vmul.f32 %v4620_v60, %v3105_v50  ;;  %v3375_v50 = vadd.f32 %v3374_v62, %v3218_v39  ;;  %v7220_v62 = vld [vmem:[#allocation44_spill] sm:$0xff] }
 0x48e   : > { %v2815_v55 = vpop.permute.xlu0 %2814  ;;  %v3203_v43 = vmul.f32 %v4619_v4, %v3074_v46  ;;  %v4622_v46 = vld [vmem:[%s5238_s24 + $0x2a8] sm:$0xff] }
 0x48f   : > { %v2878_v56 = vpop.permute.xlu1 %2877  ;;  %v3075_v35 = vmul.f32 %v2815_v55, %v7214_v30  ;;  %v4621_v55 = vld [vmem:[%s5238_s24 + $0x320] sm:$0xff] }
 0x490   : > { %v3090_v45 = vmul.f32 %v2878_v56, %v7213_v47 }
 0x491   : > { %v3204_v30 = vmul.f32 %v4622_v46, %v3075_v35  ;;  %v3396_v35 = vadd.f32 %v3395_v37, %v3234_v49  ;;  %v7223_v37 = vld [vmem:[#allocation107_spill] sm:$0xff] }
 0x492   : > { %v2882_v29 = vpop.permute.xlu0 %2881  ;;  %v3219_v47 = vmul.f32 %v4621_v55, %v3090_v45  ;;  %v7219_v45 = vld [vmem:[#allocation106_spill] sm:$0xff]  ;;  %v4626_v55 = vld [vmem:[%s5238_s24 + $0x330] sm:$0xff] }
 0x493   : > { %v2945_v42 = vpop.permute.xlu1 %2944  ;;  %v3091_v41 = vmul.f32 %v2882_v29, %v7215_v3  ;;  %v3354_v29 = vadd.f32 %v6703_v28, %v3202_v18  ;;  %v4625_v28 = vld [vmem:[%s5238_s24 + $0x2b0] sm:$0xff] }
 0x494   : > { %v3106_v27 = vmul.f32 %v2945_v42, %v6536_v44  ;;  %v7218_v42 = vld [vmem:[#allocation43_spill] sm:$0xff] }
 0x495   : > { %v3220_v3 = vmul.f32 %v4623_v36, %v3091_v41  ;;  %v4627_v41 = vld [vmem:[%s5238_s24 + $0x3a8] sm:$0xff] }
 0x496   : > { %v2949_v9 = vpop.permute.xlu0 %2948 }
 0x497   : > { %v2819_v6 = vpop.permute.xlu1 %2818  ;;  %v3107_v44 = vmul.f32 %v2949_v9, %v6539_v48 }
 0x498   : > { %v3076_v56 = vmul.f32 %v2819_v6, %v7216_v34  ;;  %v4624_v34 = vld [vmem:[%s5238_s24 + $0x3a0] sm:$0xff] }
 0x499   : > { %v3235_v60 = vmul.f32 %v4624_v34, %v3106_v27  ;;  %v4628_v27 = vld [vmem:[%s5238_s24 + $0x2b8] sm:$0xff] }
 0x49a   : > { %v2823_v22 = vpop.permute.xlu0 %2822  ;;  %v3205_v18 = vmul.f32 %v4625_v28, %v3076_v56 }
 0x49b   : > { %v2886_v52 = vpop.permute.xlu1 %2885  ;;  %v3077_v6 = vmul.f32 %v2823_v22, %v7218_v42  ;;  %v3376_v22 = vadd.f32 %v3375_v50, %v3219_v47  ;;  %v7221_v47 = vld [vmem:[#allocation94_spill] sm:$0xff]  ;;  %v3397_v46 = vadd.f32 %v3396_v35, %v3235_v60  ;;  %v7225_v60 = vld [vmem:[#allocation45_spill] sm:$0xff] }
 0x49c   : > { %v3092_v24 = vmul.f32 %v2886_v52, %v7217_v8  ;;  %v3355_v52 = vadd.f32 %v3354_v29, %v3203_v43  ;;  %v3236_v43 = vmul.f32 %v4627_v41, %v3107_v44  ;;  %v7222_v29 = vld [vmem:[#allocation34_spill] sm:$0xff]  ;;  %v4630_v44 = vld [vmem:[%s5238_s24 + $0x3b0] sm:$0xff] }
 0x49d   : > { %v3206_v8 = vmul.f32 %v4628_v27, %v3077_v6  ;;  %v4631_v50 = vld [vmem:[%s5238_s24 + $0x2c0] sm:$0xff]  ;;  %v4634_v35 = vld [vmem:[%s5238_s24 + $0x250] sm:$0xff] }
 0x49e   : > { %v2890_v14 = vpop.permute.xlu0 %2889  ;;  %v3221_v7 = vmul.f32 %v4626_v55, %v3092_v24  ;;  %v7226_v55 = vld [vmem:[#allocation37_spill] sm:$0xff] }
 0x49f   : > { %v2953_v5 = vpop.permute.xlu1 %2952  ;;  %v3093_v4 = vmul.f32 %v2890_v14, %v7219_v45  ;;  %v3356_v14 = vadd.f32 %v3355_v52, %v3204_v30  ;;  %v4632_v52 = vld [vmem:[%s5238_s24 + $0x3b8] sm:$0xff] }
 0x4a0   : > { %v3108_v48 = vmul.f32 %v2953_v5, %v6562_v11  ;;  %v3377_v11 = vadd.f32 %v3376_v22, %v3220_v3  ;;  %v4629_v5 = vld [vmem:[%s5238_s24 + $0x338] sm:$0xff]  ;;  %v7224_v3 = vld [vmem:[#allocation63_spill] sm:$0xff] }
 0x4a1   : > { %v3222_v49 = vmul.f32 %v4629_v5, %v3093_v4  ;;  %v3357_v30 = vadd.f32 %v3356_v14, %v3205_v18  ;;  %v3398_v4 = vadd.f32 %v3397_v46, %v3236_v43  ;;  %v7227_v14 = vld [vmem:[#allocation108_spill] sm:$0xff]  ;;  %v7228_v43 = vld [vmem:[#allocation46_spill] sm:$0xff]  ;;  %v7231_v46 = vld [vmem:[#allocation95_spill] sm:$0xff] }
 0x4a2   : > { %v6713_v51 = vpop.permute.xlu0 %2956  ;;  %v3237_v42 = vmul.f32 %v4630_v44, %v3108_v48  ;;  %v4633_v48 = vld [vmem:[%s5238_s24 + $0x2c8] sm:$0xff]  ;;  %v4638_v44 = vld [vmem:[%s5238_s24 + $0x260] sm:$0xff] }
 0x4a3   : > { %v2827_v10 = vpop.permute.xlu1 %2826  ;;  %v3109_v56 = vmul.f32 %v6713_v51, %v6567_v26  ;;  %v3378_v51 = vadd.f32 %v3377_v11, %v3221_v7  ;;  %v4636_v11 = vld [vmem:[%s5238_s24 + $0x258] sm:$0xff] }
 0x4a4   : > { %v3078_v2 = vmul.f32 %v2827_v10, %v7220_v62  ;;  %v3399_v62 = vadd.f32 %v3398_v4, %v3237_v42 }
 0x4a5   : > { %v3238_v34 = vmul.f32 %v4632_v52, %v3109_v56  ;;  %v3379_v18 = vadd.f32 %v3378_v51, %v3222_v49  ;;  %v7229_v49 = vld [vmem:[#allocation38_spill] sm:$0xff]  ;;  %v4639_v51 = vld [vmem:[%s5238_s24 + $0x348] sm:$0xff] }
 0x4a6   : > { %v6715_v1 = vpop.permute.xlu0 %2830  ;;  %v3207_v36 = vmul.f32 %v4631_v50, %v3078_v2 }
 0x4a7   : > { %v6717_v61 = vpop.permute.xlu1 %2893  ;;  %v3079_v24 = vmul.f32 %v6715_v1, %v7221_v47 }
 0x4a8   : > { %v3094_v6 = vmul.f32 %v6717_v61, %v7223_v37  ;;  %v7232_v37 = vld [vmem:[#allocation86_spill] sm:$0xff] }
 0x4a9   : > { %v3208_v61 = vmul.f32 %v4633_v48, %v3079_v24  ;;  %v3400_v24 = vadd.f32 %v3399_v62, %v3238_v34  ;;  %v7235_v62 = vld [vmem:[#allocation111_spill] sm:$0xff] }
 0x4aa   : > { %v6719_v21 = vpop.permute.xlu0 %2767 }
 0x4ab   : > { %v6721_v38 = vpop.permute.xlu1 %2960  ;;  %v3064_v10 = vmul.f32 %v6719_v21, %v7222_v29  ;;  %v3358_v21 = vadd.f32 %v3357_v30, %v3206_v8  ;;  %v4637_v29 = vld [vmem:[%s5238_s24 + $0x2d0] sm:$0xff] }
 0x4ac   : > { %v3110_v56 = vmul.f32 %v6721_v38, %v6590_v0 }
 0x4ad   : > { %v3193_v22 = vmul.f32 %v4634_v35, %v3064_v10  ;;  %v3359_v8 = vadd.f32 %v3358_v21, %v3207_v36  ;;  %v7230_v10 = vld [vmem:[#allocation109_spill] sm:$0xff] }
 0x4ae   : > { %v6723_v31 = vpop.permute.xlu0 %2834  ;;  %v4640_v36 = vld [vmem:[%s5238_s24 + $0x2d8] sm:$0xff]  ;;  %v4643_v35 = vld [vmem:[%s5238_s24 + $0x350] sm:$0xff] }
 0x4af   : > { %v6725_v54 = vpop.permute.xlu1 %2897  ;;  %v3080_v28 = vmul.f32 %v6723_v31, %v7225_v60  ;;  %v3360_v0 = vadd.f32 %v3359_v8, %v3208_v61  ;;  %v3340_v38 = vadd.f32 %v6692_v58, %v3193_v22  ;;  %v4642_v58 = vld [vmem:[%s5238_s24 + $0x268] sm:$0xff] }
 0x4b0   : > { %v3095_v41 = vmul.f32 %v6725_v54, %v7227_v14  ;;  %v7234_v60 = vld [vmem:[#allocation47_spill] sm:$0xff] }
 0x4b1   : > { %v3209_v54 = vmul.f32 %v4637_v29, %v3080_v28  ;;  %v7238_v29 = vld [vmem:[#allocation85_spill] sm:$0xff] }
 0x4b2   : > { %v6727_v33 = vpop.permute.xlu0 %2771  ;;  %v3224_v50 = vmul.f32 %v4639_v51, %v3095_v41  ;;  %v7236_v41 = vld [vmem:[#allocation48_spill] sm:$0xff] }
 0x4b3   : > { %v6729_v32 = vpop.permute.xlu1 %2964  ;;  %v3065_v1 = vmul.f32 %v6727_v33, %v7224_v3  ;;  %v4635_v33 = vld [vmem:[%s5238_s24 + $0x340] sm:$0xff]  ;;  %v3361_v48 = vadd.f32 %v3360_v0, %v3209_v54  ;;  %v4652_v51 = vld [vmem:[%s5238_s24 + $0x3d0] sm:$0xff] }
 0x4b4   : > { %v3223_v2 = vmul.f32 %v4635_v33, %v3094_v6  ;;  %v3111_v61 = vmul.f32 %v6729_v32, %v6593_v59  ;;  %v4646_v59 = vld [vmem:[%s5238_s24 + $0x358] sm:$0xff] }
 0x4b5   : > { %v3194_v5 = vmul.f32 %v4636_v11, %v3065_v1  ;;  %v7233_v1 = vld [vmem:[#allocation110_spill] sm:$0xff]  ;;  %v4647_v11 = vld [vmem:[%s5238_s24 + $0x2e8] sm:$0xff] }
 0x4b6   : > { %v6731_v12 = vpop.permute.xlu0 %2838  ;;  %v3380_v6 = vadd.f32 %v3379_v18, %v3223_v2  ;;  %v4645_v2 = vld [vmem:[%s5238_s24 + $0x270] sm:$0xff] }
 0x4b7   : > { %v6733_v15 = vpop.permute.xlu1 %2901  ;;  %v3081_v27 = vmul.f32 %v6731_v12, %v7228_v43  ;;  %v3341_v52 = vadd.f32 %v3340_v38, %v3194_v5 }
 0x4b8   : > { %v3096_v12 = vmul.f32 %v6733_v15, %v7230_v10  ;;  %v4648_v10 = vld [vmem:[%s5238_s24 + $0x3c8] sm:$0xff] }
 0x4b9   : > { %v3210_v3 = vmul.f32 %v4640_v36, %v3081_v27 }
 0x4ba   : > { %v6739_v53 = vpop.permute.xlu0 %2775  ;;  %v3225_v22 = vmul.f32 %v4643_v35, %v3096_v12  ;;  %v3240_v12 = vmul.f32 %v4648_v10, %v3111_v61  ;;  %v4655_v61 = vld [vmem:[%s5238_s24 + $0x2f8] sm:$0xff] }
 0x4bb   : > { %v6743_v23 = vpop.permute.xlu1 %2968  ;;  %v3066_v7 = vmul.f32 %v6739_v53, %v7226_v55  ;;  %v4644_v55 = vld [vmem:[%s5238_s24 + $0x2e0] sm:$0xff]  ;;  %v3362_v27 = vadd.f32 %v3361_v48, %v3210_v3 }
 0x4bd   : > { %v3195_v42 = vmul.f32 %v4638_v44, %v3066_v7  ;;  %v4650_v44 = vld [vmem:[%s5238_s24 + $0x2f0] sm:$0xff] }
 0x4be   : > { %v6753_v13 = vpop.permute.xlu0 %2842 }
 0x4bf   : > { %v6758_v20 = vpop.permute.xlu1 %2905  ;;  %v3082_v30 = vmul.f32 %v6753_v13, %v7231_v46  ;;  %v4641_v13 = vld [vmem:[%s5238_s24 + $0x3c0] sm:$0xff]  ;;  %v3342_v7 = vadd.f32 %v3341_v52, %v3195_v42 }
 0x4c0   : > { %v3097_v15 = vmul.f32 %v6758_v20, %v7233_v1  ;;  %v3239_v21 = vmul.f32 %v4641_v13, %v3110_v56  ;;  %v7239_v52 = vld [vmem:[#allocation98_spill] sm:$0xff] }
 0x4c1   : > { %v3211_v20 = vmul.f32 %v4644_v55, %v3082_v30  ;;  %v4656_v55 = vld [vmem:[%s5238_s24 + $0x3e0] sm:$0xff] }
 0x4c2   : > { %v2780_v9 = vpop.permute.xlu0 %2779  ;;  %v3226_v32 = vmul.f32 %v4646_v59, %v3097_v15 }
 0x4c3   : > { %v6772_v39 = vpop.permute.xlu1 %2972  ;;  %v3067_v53 = vmul.f32 %v2780_v9, %v7229_v49  ;;  %v3363_v30 = vadd.f32 %v3362_v27, %v3211_v20 }
 0x4c5   : > { %v3196_v34 = vmul.f32 %v4642_v58, %v3067_v53 }
 0x4c6   : > { %v2847_v26 = vpop.permute.xlu0 %2846 }
 0x4c7   : > { %v2910_v45 = vpop.permute.xlu1 %2909  ;;  %v3083_v28 = vmul.f32 %v2847_v26, %v7234_v60  ;;  %v3381_v26 = vadd.f32 %v3380_v6, %v3224_v50  ;;  %v3343_v56 = vadd.f32 %v3342_v7, %v3196_v34  ;;  %v3401_v6 = vadd.f32 %v3400_v24, %v3239_v21  ;;  %v4654_v60 = vld [vmem:[%s5238_s24 + $0x3d8] sm:$0xff]  ;;  %v4657_v7 = vld [vmem:[%s5238_s24 + $0x370] sm:$0xff] }
 0x4c8   : > { %v3098_v33 = vmul.f32 %v2910_v45, %v7235_v62  ;;  %v7237_v45 = vld [vmem:[#allocation112_spill] sm:$0xff] }
 0x4c9   : > { %v3212_v5 = vmul.f32 %v4647_v11, %v3083_v28  ;;  %v3382_v46 = vadd.f32 %v3381_v26, %v3225_v22  ;;  %v3402_v34 = vadd.f32 %v3401_v6, %v3240_v12  ;;  %v7240_v28 = vld [vmem:[#allocation113_spill] sm:$0xff] }
 0x4ca   : > { %v2784_v31 = vpop.permute.xlu0 %2783 }
 0x4cb   : > { %v6805_v47 = vpop.permute.xlu1 %2976  ;;  %v3068_v9 = vmul.f32 %v2784_v31, %v7232_v37  ;;  %v3112_v31 = vmul.f32 %v6743_v23, %v6619_v40  ;;  %v3113_v40 = vmul.f32 %v6772_v39, %v6623_v16  ;;  %v4649_v23 = vld [vmem:[%s5238_s24 + $0x360] sm:$0xff]  ;;  %v4651_v37 = vld [vmem:[%s5238_s24 + $0x278] sm:$0xff]  ;;  %v3383_v36 = vadd.f32 %v3382_v46, %v3226_v32 }
 0x4cc   : > { %v3227_v0 = vmul.f32 %v4649_v23, %v3098_v33  ;;  %v3114_v3 = vmul.f32 %v6805_v47, %v6641_v19  ;;  %v3364_v15 = vadd.f32 %v3363_v30, %v3212_v5  ;;  %v4659_v5 = vld [vmem:[%s5238_s24 + $0x378] sm:$0xff] }
 0x4cd   : > { %v3197_v14 = vmul.f32 %v4645_v2, %v3068_v9  ;;  %v3241_v50 = vmul.f32 %v4652_v51, %v3112_v31  ;;  %v3242_v24 = vmul.f32 %v4654_v60, %v3113_v40  ;;  %v4658_v31 = vld [vmem:[%s5238_s24 + $0x3e8] sm:$0xff] }
 0x4ce   : > { %v2851_v4 = vpop.permute.xlu0 %2850  ;;  %v3384_v48 = vadd.f32 %v3383_v36, %v3227_v0  ;;  %v3243_v20 = vmul.f32 %v4656_v55, %v3114_v3 }
 0x4cf   : > { %v2914_v18 = vpop.permute.xlu1 %2913  ;;  %v3084_v43 = vmul.f32 %v2851_v4, %v7236_v41  ;;  %v3344_v38 = vadd.f32 %v3343_v56, %v3197_v14  ;;  %v4653_v4 = vld [vmem:[%s5238_s24 + $0x368] sm:$0xff]  ;;  %v3403_v22 = vadd.f32 %v3402_v34, %v3241_v50 }
 0x4d0   : > { %v3099_v49 = vmul.f32 %v2914_v18, %v7237_v45 }
 0x4d1   : > { %v3213_v42 = vmul.f32 %v4650_v44, %v3084_v43  ;;  %v7241_v43 = vld [vmem:[#allocation114_spill] sm:$0xff]  ;;  %v3404_v27 = vadd.f32 %v3403_v22, %v3242_v24  ;;  %v3118_v24 = vld [vmem:[#allocation3] sm:$0xff] }
 0x4d2   : > { %v2788_v8 = vpop.permute.xlu0 %2787  ;;  %v3228_v16 = vmul.f32 %v4653_v4, %v3099_v49  ;;  %v4661_v44 = vld [vmem:[%s5238_s24 + $0x3f8] sm:$0xff] }
 0x4d3   : > { %v2981_v53 = vpop.permute.xlu1 %2980  ;;  %v3069_v54 = vmul.f32 %v2788_v8, %v7238_v29  ;;  %v3365_v19 = vadd.f32 %v3364_v15, %v3213_v42  ;;  %v3405_v49 = vadd.f32 %v3404_v27, %v3243_v20 }
 0x4d4   : > { %v3115_v21 = vmul.f32 %v2981_v53, %v6645_v17  ;;  %v3385_v2 = vadd.f32 %v3384_v48, %v3228_v16  ;;  %v4660_v53 = vld [vmem:[%s5238_s24 + $0x3f0] sm:$0xff] }
 0x4d5   : > { %v3198_v9 = vmul.f32 %v4651_v37, %v3069_v54 }
 0x4d6   : > { %v2855_v1 = vpop.permute.xlu0 %2854  ;;  %v3244_v59 = vmul.f32 %v4658_v31, %v3115_v21 }
 0x4d7   : > { %v3345_v39 = vadd.f32 %v3344_v38, %v3198_v9  ;;  %v2918_v13 = vpop.permute.xlu1 %2917  ;;  %v3085_v58 = vmul.f32 %v2855_v1, %v7239_v52 }
 0x4d8   : > { %v3100_v18 = vmul.f32 %v2918_v13, %v7240_v28  ;;  %v3406_v30 = vadd.f32 %v3405_v49, %v3244_v59 }
 0x4d9   : > { %v3346_v47 = vrot.slane %v3345_v39, 4  ;;  %v3214_v35 = vmul.f32 %v4655_v61, %v3085_v58 }
 0x4da   : > { %v3229_v62 = vmul.f32 %v4657_v7, %v3100_v18  ;;  %v2922_v33 = vpop.permute.xlu0 %2921 }
 0x4db   : > { %v3347_v14 = vadd.f32 %v3346_v47, %v3345_v39  ;;  %v3366_v41 = vadd.f32 %v3365_v19, %v3214_v35  ;;  %v2985_v17 = vpop.permute.xlu1 %2984  ;;  %v3101_v26 = vmul.f32 %v2922_v33, %v7241_v43 }
 0x4dc   : > { %v3116_v32 = vmul.f32 %v2985_v17, %v6653_v57  ;;  %v3386_v56 = vadd.f32 %v3385_v2, %v3229_v62 }
 0x4dd   : > { %v3348_v8 = vrot.slane %v3347_v14, 2  ;;  %v3367_v11 = vrot.slane %v3366_v41, 4  ;;  %v3230_v45 = vmul.f32 %v4659_v5, %v3101_v26 }
 0x4de   : > { %v3245_v29 = vmul.f32 %v4660_v53, %v3116_v32 }
 0x4df   : > { %v3349_v54 = vadd.f32 %v3348_v8, %v3347_v14  ;;  %v3368_v10 = vadd.f32 %v3367_v11, %v3366_v41  ;;  %v3387_v12 = vadd.f32 %v3386_v56, %v3230_v45  ;;  %v2989_v46 = vpop.permute.xlu1 %2988 }
 0x4e0   : > { %v3117_v40 = vmul.f32 %v2989_v46, %v6655_v25  ;;  %v3407_v57 = vadd.f32 %v3406_v30, %v3245_v29 }
 0x4e1   : > { %v3350_v23 = vrot.slane %v3349_v54, 1  ;;  %v3369_v0 = vrot.slane %v3368_v10, 2  ;;  %v3388_v38 = vrot.slane %v3387_v12, 4 }
 0x4e2   : > { %v3246_v42 = vmul.f32 %v4661_v44, %v3117_v40 }
 0x4e3   : > { %v3351_v37 = vadd.f32 %v3350_v23, %v3349_v54  ;;  %v3370_v9 = vadd.f32 %v3369_v0, %v3368_v10  ;;  %v3389_v6 = vadd.f32 %v3388_v38, %v3387_v12 }
 0x4e4   : > { %v3408_v51 = vadd.f32 %v3407_v57, %v3246_v42 }
 0x4e5   : > { %v3430_v50 = vsel %vm3429_vm4, %v3351_v37, %v6685_v63  ;;  %v3371_v36 = vrot.slane %v3370_v9, 1  ;;  %v3390_v3 = vrot.slane %v3389_v6, 2 }
 0x4e6   : > { %v3409_v1 = vrot.slane %v3408_v51, 4 }
 0x4e7   : > { %v3372_v15 = vadd.f32 %v3371_v36, %v3370_v9  ;;  %v3391_v4 = vadd.f32 %v3390_v3, %v3389_v6 }
 0x4e8   : > { %v3410_v25 = vadd.f32 %v3409_v1, %v3408_v51 }
 0x4e9   : > { %v3432_v16 = vsel %vm3431_vm5, %v3372_v15, %v3430_v50  ;;  %v3392_v39 = vrot.slane %v3391_v4, 1 }
 0x4ea   : > { %v3411_v13 = vrot.slane %v3410_v25, 2 }
 0x4eb   : > { %v3393_v52 = vadd.f32 %v3392_v39, %v3391_v4 }
 0x4ec   : > { %v3412_v58 = vadd.f32 %v3411_v13, %v3410_v25 }
 0x4ed   : > { %v3434_v34 = vsel %vm3433_vm6, %v3393_v52, %v3432_v16 }
 0x4ee   : > { %v3413_v60 = vrot.slane %v3412_v58, 1 }
 0x4ef   : > { %3443 = sbr.rel (%p3635_p9) target bundleno = 1278 (0x4fe), region = 68 }
 0x4f0   : > { %v3414_v21 = vadd.f32 %v3413_v60, %v3412_v58 }
 0x4f2   : > { %v3436_v28 = vsel %vm3435_vm7, %v3414_v21, %v3434_v34 }
 0x4f3   : > { %v3438_v63 = vadd.f32 %v3436_v28, %v3118_v24 }
 0x4f5   : > { %3439 = vst [vmem:[#allocation3] sm:$0xff] %v3438_v63 }
 0x4fc   : > { %v3444_v18 = vld [vmem:[#allocation3] sm:$0xff] }
 0x4fd   : > { %3445 = vst [vmem:[%s5251_s9] sm:$0xff] %v3444_v18 }
 0x4fe PF: > { %s7243_s30 = sld [smem:[#allocation23_spill]]  ;;  %s7244_s11 = sld [smem:[#allocation29_spill]] }
 0x4ff   : > { %s7245_s17 = sld [smem:[#allocation117_spill]]  ;;  %s3460_s7 = sshll.u32 %s5251_s9, 4  ;;  %s3461_s7 = int_to_ptr.vmem [resolvable:$true] %s3460_s7 }
 0x500   : > { %s3447_s21 = scalar_lea.sflag [#allocation6], %s5226_s18  ;;  %s4774_s15 = scalar_lea.vmem %s3461_s7, 128 }
 0x501   : > { %p4775_p6 = scmp.ne.s32.totalorder %s3461_s7, %s4774_s15  ;;  %s4922_s10 = smov [#allocation13]  }
 0x502   : > { %s4778_s16 = sshll.u32 %s4922_s10, 4  ;;  %s4779_s16 = int_to_ptr.vmem [resolvable:$false] %s4778_s16 }
 0x503   : > { %s4780_s13 = scalar_lea.vmem %s4779_s16, 256  ;;  %p4781_p7 = scmp.lt.s32.totalorder %s3461_s7, %s4779_s16 }
 0x504   : > { %s3637_s0 = sshll.u32 %s7243_s30, 7  ;;  %p7246_p1 = scmp.ne.s32.totalorder %s7244_s11, 0 }
 0x505   : > { %s6866_s14 = scalar_lea.hbm %s7245_s17, %s3637_s0  ;;  %p4782_p13 = scmp.lt.s32.totalorder %s4780_s13, %s4774_s15 }
 0x506   : > { %p4776_p3 = pnand %p4775_p6, %p7246_p1 }
 0x507   : > { %p4783_p0 = por %p4782_p13, %p4781_p7 }
 0x508   : > { %p4777_p12 = pneg %p4776_p3 }
 0x50a   : > { %p4784_p10 = pnand %p4783_p0, %p4777_p12 }
 0x50c   : > { %4787 = shalt.err (!%p4784_p10)
}
 0x50d   : > { %s4788_s18 = scalar_lea.hbm %s6866_s14, 128  ;;  %s4792_s8 = scalar_lea.hbm %s7245_s17, 256 }
 0x50e   : > { %p4789_p4 = scmp.ne.s32.totalorder %s6866_s14, %s4788_s18  ;;  %p4793_p2 = scmp.lt.u32.totalorder %s6866_s14, %s7245_s17 }
 0x50f   : > { %p4794_p8 = scmp.lt.u32.totalorder %s4792_s8, %s4788_s18  ;;  %p4796_p6 = scmp.lt.u32.totalorder %s4788_s18, %s6866_s14 }
 0x510   : > { %p4790_p11 = pnand %p4789_p4, %p7246_p1 }
 0x511   : > { %p4795_p9 = por %p4794_p8, %p4793_p2 }
 0x512   : > { %p4791_p5 = pneg %p4790_p11 }
 0x513   : > { %p4797_p3 = por %p4796_p6, %p4795_p9 }
 0x515   : > { %p4798_p12 = pnand %p4797_p3, %p4791_p5 }
 0x517   : > { %4801 = shalt.err (!%p4798_p12)
}
 0x518   : > { %4154 = dma.vmem_to_hbm [thread:$0]  (%p7246_p1), %s3461_s7, 128, %s6866_s14, %s3447_s21  }
 0x519 PF: > { %s7247_s6 = sld [smem:[#allocation21_spill]]  ;;  %s7248_s29 = sld [smem:[#allocation30_spill]] }
 0x51a   : > { %p4171_p7 = scmp.ge.s32.totalorder %s4904_s28, 2 }
 0x51f   : > { %s3472_s30 = sand.u32 1, %s7247_s6   ;;  %p7249_p13 = scmp.ne.s32.totalorder %s7248_s29, 0 }
 0x520   : > { %s3473_s0 = scalar_lea.sflag [#allocation6], %s3472_s30 }
 0x521   : > { %p4164_p0 = pnand %p4171_p7, %p7249_p13 }
 0x523   : > { %4859 = dma.done.wait (!%p4164_p0), %s3473_s0, 128  }
 0x524   : > { %4861 = vsyncadd (!%p4164_p0), %s3473_s0, 4294967168  ;;  %s25_s28 = sadd.s32 1, %s4904_s28   ;;  %s7250_s3 = sld [smem:[#allocation27_spill]] }
 0x525   : > { %p22_p10 = scmp.ge.s32.totalorder %s25_s28, 6   ;;  %s7251_s11 = sld [smem:[#allocation26_spill]] }
 0x526   : > { %s7252_s5 = sld [smem:[#allocation24_spill]]  ;;  %s7253_s14 = sld [smem:[#allocation25_spill]] }
 0x527   : > { %s7254_s18 = smov %s4868_s19  ;;  %s7255_s19 = smov %s4872_s20 }
 0x528   : > { %s7257_s21 = smov %s4880_s22  ;;  %s7258_s22 = smov %s4884_s23 }
 0x529   : > { %s7260_s24 = smov %s4896_s26  ;;  %s7261_s25 = smov %s4900_s27 }
 0x52a   : > { %s7256_s20 = smov %s7250_s3  ;;  %24 = sbr.rel (!%p22_p10) target bundleno = 16 (0x10), region = 130 }
 0x52b   : > { %s7259_s23 = smov %s7251_s11 }
 0x52c   : > { %s7262_s26 = smov %s7252_s5  ;;  %s7263_s27 = smov %s7253_s14 }
 0x531   :  { %3478 = vsyncpa [#allocation5], 1 }
 0x532   :  { %3480 = vsyncpa [#allocation5 + $0x1], 1 }
 0x533   :  { %3481 = vsyncpa [#allocation8], 1 }
 0x534   :  { %3483 = vsyncpa [#allocation8 + $0x1], 1 }
 0x535   :  { %3484 = vsyncpa [#allocation11], 1 }
 0x536   :  { %3485 = vsyncpa [#allocation6], 1 }
 0x537   :  { %3487 = vsyncpa [#allocation6 + $0x1], 1 }

</bundles_post_ra>
